<compile_context>
chip_gen: v5e
topology: v5e:2x2
jax: 0.10.0
libtpu: 0.0.40
codegen_flags: <defaults>
</compile_context>

<pallas_src>
import functools

import jax
import jax.numpy as jnp
from jax import lax
from jax.experimental import pallas as pl
from jax.experimental.pallas import tpu as pltpu


# ------------------------------ Pallas kernel --------------------------------

def _mapping_kernel(z_ref, w_in_ref, b_in_ref, w_h_ref, b_h_ref,
                    w_out_ref, b_out_ref, out_ref, *, n_out_chunks):
    """Fused MLP: input layer -> hidden layers -> all output heads.

    z_ref:     (bm, D_in)          bf16
    w_in_ref:  (D_in, H) bf16      b_in_ref:  (1, H) f32
    w_h_ref:   (L, H, H) bf16      b_h_ref:   (L, 1, H) f32
    w_out_ref: (H, N_out) bf16     b_out_ref: (1, N_out) f32
    out_ref:   (bm, N_out) f32     (N_out = n_heads * 2*D_out)
    """
    cdt = w_in_ref.dtype  # MXU operand dtype (bf16)

    # Input layer + LeakyReLU(0.2); accumulate in f32.
    h = jnp.dot(z_ref[...], w_in_ref[...], preferred_element_type=jnp.float32)
    h = h + b_in_ref[...]
    h = jnp.maximum(h, 0.2 * h)

    # Hidden layers (L is a compile-time constant -> static unroll).
    for i in range(w_h_ref.shape[0]):
        h = jnp.dot(h.astype(cdt), w_h_ref[i],
                    preferred_element_type=jnp.float32)
        h = h + b_h_ref[i]
        h = jnp.maximum(h, 0.2 * h)

    # All output heads folded into one (H, N_out) weight; process in lane-dense
    # column chunks and store straight to out_ref (no full-width f32 temp).
    h_c = h.astype(cdt)
    n_out = w_out_ref.shape[1]
    tn = n_out // n_out_chunks
    for j in range(n_out_chunks):
        lo, hi = j * tn, (j + 1) * tn
        o = jnp.dot(h_c, w_out_ref[:, lo:hi],
                    preferred_element_type=jnp.float32)
        out_ref[:, lo:hi] = (o + b_out_ref[:, lo:hi]).astype(out_ref.dtype)


# ------------------------------- JAX wrappers ---------------------------------

def prepare_params(params, *, compute_dtype=jnp.bfloat16):
    """Fold the per-head output weights into one matrix and cast to the MXU
    compute dtype ONCE (outside the per-call path)."""
    w_out = params["w_out"]                          # (n_heads, H, 2*D_out)
    n_heads, H, two_d = w_out.shape
    L = params["w_h"].shape[0]
    return {
        "w_in": params["w_in"].astype(compute_dtype),                 # (D_in, H)
        "b_in": params["b_in"].reshape(1, H).astype(jnp.float32),
        "w_h": params["w_h"].astype(compute_dtype),                   # (L, H, H)
        "b_h": params["b_h"].reshape(L, 1, H).astype(jnp.float32),
        "w_out": jnp.transpose(w_out, (1, 0, 2))
                    .reshape(H, n_heads * two_d).astype(compute_dtype),
        "b_out": params["b_out"].reshape(1, n_heads * two_d).astype(jnp.float32),
        "n_heads": int(n_heads),
        "two_d": int(two_d),
    }


def mapping_network(z, params, *, block_m=256):
    """z: (B, input_dim) -> (B, n_heads, 2*output_dim).

    `params` must come from prepare_params() (folded + bf16-cast once)."""
    B, D_in = z.shape
    w_in, b_in = params["w_in"], params["b_in"]
    w_h, b_h = params["w_h"], params["b_h"]
    w_out, b_out = params["w_out"], params["b_out"]
    n_heads, two_d = params["n_heads"], params["two_d"]

    H = w_in.shape[1]
    L = w_h.shape[0]
    N_out = w_out.shape[1]

    # Batch tile: multiple of 8 (sublane) unless it equals B; ensure >= 2
    # "parallel" grid steps when the batch allows, so v7x's 2 TCs both work.
    # (On v5e prefer block_m=128; 256 targets the v6e/v7x 256-wide MXU.)
    bm = min(block_m, B)
    if bm < B:
        bm = max(8, (bm // 8) * 8)
    if B >= 16 and pl.cdiv(B, bm) < 2:
        bm = max(8, ((B // 2) // 8) * 8)
    grid = (pl.cdiv(B, bm),)

    # One lane-dense column chunk per head (2*output_dim wide) when possible.
    n_chunks = n_heads if (two_d % 128 == 0) else 1

    # Grid-invariant operands: constant index_map -> a single VMEM buffer.
    def _const_spec(shape):
        nd = len(shape)
        return pl.BlockSpec(shape, lambda i: (0,) * nd,
                            pipeline_mode=pl.Buffered(1))

    z_c = z.astype(w_in.dtype)

    out2d = pl.pallas_call(
        functools.partial(_mapping_kernel, n_out_chunks=n_chunks),
        out_shape=jax.ShapeDtypeStruct((B, N_out), jnp.float32),
        grid=grid,
        in_specs=[
            pl.BlockSpec((bm, D_in), lambda i: (i, 0)),
            _const_spec((D_in, H)),
            _const_spec((1, H)),
            _const_spec((L, H, H)),
            _const_spec((L, 1, H)),
            _const_spec((H, N_out)),
            _const_spec((1, N_out)),
        ],
        out_specs=pl.BlockSpec((bm, N_out), lambda i: (i, 0)),
        compiler_params=pltpu.CompilerParams(
            dimension_semantics=("parallel",),
            vmem_limit_bytes=32 * 1024 * 1024),
    )(z_c, w_in, b_in, w_h, b_h, w_out, b_out)

    # torch: cat([head_j(h).unsqueeze(1)], dim=1) -> (B, n_heads, 2*D_out).
    return out2d.reshape(B, n_heads, two_d)


# ----------------------------- pure-JAX reference -----------------------------

def _ref_forward(z, raw_params, *, compute_dtype=jnp.bfloat16):
    """Reference with the same bf16 quantization points as the kernel."""
    hi = lax.Precision.HIGHEST
    q = lambda v: v.astype(compute_dtype).astype(jnp.float32)
    lrelu = lambda v: jnp.where(v >= 0, v, 0.2 * v)
    h = lrelu(jnp.dot(q(z), q(raw_params["w_in"]), precision=hi)
              + raw_params["b_in"])
    for i in range(raw_params["w_h"].shape[0]):
        h = lrelu(jnp.dot(q(h), q(raw_params["w_h"][i]), precision=hi)
                  + raw_params["b_h"][i])
    outs = [jnp.dot(q(h), q(raw_params["w_out"][j]), precision=hi)
            + raw_params["b_out"][j]
            for j in range(raw_params["w_out"].shape[0])]
    return jnp.stack(outs, axis=1)


# ---------------------------------- main --------------------------------------

if __name__ == "__main__":
    # Module defaults: input_dim=output_dim=hidden_dim=256, output_layers=8,
    # hidden_layers=3.  The ModuleList holds output_layers + 1 = 9 heads.
    B = 16
    input_dim = output_dim = hidden_dim = 256
    output_layers, hidden_layers = 8, 3
    n_heads = output_layers + 1
    L = hidden_layers - 1

    key = jax.random.PRNGKey(0)
    ks = jax.random.split(key, 6)

    # Output-head biases mimic __init__: first output_dim entries = 1, rest 0.
    b_out = jnp.concatenate(
        [jnp.ones((n_heads, output_dim), jnp.float32),
         jnp.zeros((n_heads, output_dim), jnp.float32)], axis=1)

    raw_params = {
        "w_in": 0.1 * jax.random.normal(ks[0], (input_dim, hidden_dim), jnp.float32),
        "b_in": 0.1 * jax.random.normal(ks[1], (hidden_dim,), jnp.float32),
        "w_h": 0.1 * jax.random.normal(ks[2], (L, hidden_dim, hidden_dim), jnp.float32),
        "b_h": 0.1 * jax.random.normal(ks[3], (L, hidden_dim), jnp.float32),
        "w_out": 0.1 * jax.random.normal(
            ks[4], (n_heads, hidden_dim, 2 * output_dim), jnp.float32),
        "b_out": b_out,
    }
    z = jax.random.normal(ks[5], (B, input_dim), jnp.float32)

    # Fold heads + cast to bf16 exactly once, outside the per-call path.
    prepped = prepare_params(raw_params)

    run = jax.jit(functools.partial(mapping_network, params=prepped))
    out = jax.block_until_ready(run(z))
    ref = jax.block_until_ready(_ref_forward(z, raw_params))

    assert out.shape == (B, n_heads, 2 * output_dim), out.shape
    max_err = float(jnp.max(jnp.abs(out - ref)))
    assert jnp.allclose(out, ref, rtol=1e-2, atol=1e-2), max_err
    print("KERNEL_OK")
</pallas_src>

<mosaic_0001>
module attributes {stable_mosaic.version = 11 : i64} {
  func.func @_mapping_kernel(%arg0: i32, %arg1: memref<8x256xbf16, #tpu.memory_space<vmem>>, %arg2: memref<256x256xbf16, #tpu.memory_space<vmem>>, %arg3: memref<1x256xf32, #tpu.memory_space<vmem>>, %arg4: memref<2x256x256xbf16, #tpu.memory_space<vmem>>, %arg5: memref<2x1x256xf32, #tpu.memory_space<vmem>>, %arg6: memref<256x4608xbf16, #tpu.memory_space<vmem>>, %arg7: memref<1x4608xf32, #tpu.memory_space<vmem>>, %arg8: memref<8x4608xf32, #tpu.memory_space<vmem>>) attributes {dimension_semantics = [#tpu.dimension_semantics<parallel>], iteration_bounds = array<i64: 2>, scalar_prefetch = 0 : i64, scratch_operands = 0 : i64, tpu.core_type = #tpu.core_type<tc>, window_params = [{transform_indices = @transform_0, window_bounds = array<i64: 8, 256>}, {pipeline_mode = #tpu.pipeline_mode<synchronous>, transform_indices = @transform_1, window_bounds = array<i64: 256, 256>}, {pipeline_mode = #tpu.pipeline_mode<synchronous>, transform_indices = @transform_2, window_bounds = array<i64: 1, 256>}, {pipeline_mode = #tpu.pipeline_mode<synchronous>, transform_indices = @transform_3, window_bounds = array<i64: 2, 256, 256>}, {pipeline_mode = #tpu.pipeline_mode<synchronous>, transform_indices = @transform_4, window_bounds = array<i64: 2, 1, 256>}, {pipeline_mode = #tpu.pipeline_mode<synchronous>, transform_indices = @transform_5, window_bounds = array<i64: 256, 4608>}, {pipeline_mode = #tpu.pipeline_mode<synchronous>, transform_indices = @transform_6, window_bounds = array<i64: 1, 4608>}, {transform_indices = @transform_7, window_bounds = array<i64: 8, 4608>}]} {
    %c0 = arith.constant 0 : index
    %c0_0 = arith.constant 0 : index
    %0 = vector.load %arg1[%c0, %c0_0] : memref<8x256xbf16, #tpu.memory_space<vmem>>, vector<8x256xbf16>
    %c0_1 = arith.constant 0 : index
    %c0_2 = arith.constant 0 : index
    %1 = vector.load %arg2[%c0_1, %c0_2] : memref<256x256xbf16, #tpu.memory_space<vmem>>, vector<256x256xbf16>
    %cst = arith.constant dense<0.000000e+00> : vector<8x256xf32>
    %2 = tpu.matmul %0, %1, %cst {dimension_numbers = #tpu.dot_dimension_numbers<[1], [0], [0], [1], [0, 0, 1, 1], [], []>} : vector<8x256xbf16>, vector<256x256xbf16>, vector<8x256xf32> -> vector<8x256xf32>
    %c0_3 = arith.constant 0 : index
    %c0_4 = arith.constant 0 : index
    %3 = vector.load %arg3[%c0_3, %c0_4] : memref<1x256xf32, #tpu.memory_space<vmem>>, vector<1x256xf32>
    %4 = vector.broadcast %3 : vector<1x256xf32> to vector<8x256xf32>
    %5 = arith.addf %2, %4 : vector<8x256xf32>
    %cst_5 = arith.constant 2.000000e-01 : f32
    %6 = vector.broadcast %cst_5 : f32 to vector<8x256xf32>
    %7 = arith.mulf %6, %5 : vector<8x256xf32>
    %8 = arith.maximumf %5, %7 : vector<8x256xf32>
    %9 = arith.truncf %8 : vector<8x256xf32> to vector<8x256xbf16>
    %c0_6 = arith.constant 0 : index
    %c0_7 = arith.constant 0 : index
    %c0_8 = arith.constant 0 : index
    %10 = vector.load %arg4[%c0_6, %c0_7, %c0_8] : memref<2x256x256xbf16, #tpu.memory_space<vmem>>, vector<1x256x256xbf16>
    %11 = vector.shape_cast %10 : vector<1x256x256xbf16> to vector<256x256xbf16>
    %cst_9 = arith.constant dense<0.000000e+00> : vector<8x256xf32>
    %12 = tpu.matmul %9, %11, %cst_9 {dimension_numbers = #tpu.dot_dimension_numbers<[1], [0], [0], [1], [0, 0, 1, 1], [], []>} : vector<8x256xbf16>, vector<256x256xbf16>, vector<8x256xf32> -> vector<8x256xf32>
    %c0_10 = arith.constant 0 : index
    %c0_11 = arith.constant 0 : index
    %c0_12 = arith.constant 0 : index
    %13 = vector.load %arg5[%c0_10, %c0_11, %c0_12] : memref<2x1x256xf32, #tpu.memory_space<vmem>>, vector<1x1x256xf32>
    %14 = vector.shape_cast %13 : vector<1x1x256xf32> to vector<1x256xf32>
    %15 = vector.broadcast %14 : vector<1x256xf32> to vector<8x256xf32>
    %16 = arith.addf %12, %15 : vector<8x256xf32>
    %cst_13 = arith.constant 2.000000e-01 : f32
    %17 = vector.broadcast %cst_13 : f32 to vector<8x256xf32>
    %18 = arith.mulf %17, %16 : vector<8x256xf32>
    %19 = arith.maximumf %16, %18 : vector<8x256xf32>
    %20 = arith.truncf %19 : vector<8x256xf32> to vector<8x256xbf16>
    %c1 = arith.constant 1 : index
    %c0_14 = arith.constant 0 : index
    %c0_15 = arith.constant 0 : index
    %21 = vector.load %arg4[%c1, %c0_14, %c0_15] : memref<2x256x256xbf16, #tpu.memory_space<vmem>>, vector<1x256x256xbf16>
    %22 = vector.shape_cast %21 : vector<1x256x256xbf16> to vector<256x256xbf16>
    %cst_16 = arith.constant dense<0.000000e+00> : vector<8x256xf32>
    %23 = tpu.matmul %20, %22, %cst_16 {dimension_numbers = #tpu.dot_dimension_numbers<[1], [0], [0], [1], [0, 0, 1, 1], [], []>} : vector<8x256xbf16>, vector<256x256xbf16>, vector<8x256xf32> -> vector<8x256xf32>
    %c1_17 = arith.constant 1 : index
    %c0_18 = arith.constant 0 : index
    %c0_19 = arith.constant 0 : index
    %24 = vector.load %arg5[%c1_17, %c0_18, %c0_19] : memref<2x1x256xf32, #tpu.memory_space<vmem>>, vector<1x1x256xf32>
    %25 = vector.shape_cast %24 : vector<1x1x256xf32> to vector<1x256xf32>
    %26 = vector.broadcast %25 : vector<1x256xf32> to vector<8x256xf32>
    %27 = arith.addf %23, %26 : vector<8x256xf32>
    %cst_20 = arith.constant 2.000000e-01 : f32
    %28 = vector.broadcast %cst_20 : f32 to vector<8x256xf32>
    %29 = arith.mulf %28, %27 : vector<8x256xf32>
    %30 = arith.maximumf %27, %29 : vector<8x256xf32>
    %31 = arith.truncf %30 : vector<8x256xf32> to vector<8x256xbf16>
    %c0_21 = arith.constant 0 : index
    %c0_22 = arith.constant 0 : index
    %32 = vector.load %arg6[%c0_21, %c0_22] : memref<256x4608xbf16, #tpu.memory_space<vmem>>, vector<256x512xbf16>
    %cst_23 = arith.constant dense<0.000000e+00> : vector<8x512xf32>
    %33 = tpu.matmul %31, %32, %cst_23 {dimension_numbers = #tpu.dot_dimension_numbers<[1], [0], [0], [1], [0, 0, 1, 1], [], []>} : vector<8x256xbf16>, vector<256x512xbf16>, vector<8x512xf32> -> vector<8x512xf32>
    %c0_24 = arith.constant 0 : index
    %c0_25 = arith.constant 0 : index
    %34 = vector.load %arg7[%c0_24, %c0_25] : memref<1x4608xf32, #tpu.memory_space<vmem>>, vector<1x512xf32>
    %35 = vector.broadcast %34 : vector<1x512xf32> to vector<8x512xf32>
    %36 = arith.addf %33, %35 : vector<8x512xf32>
    %c0_26 = arith.constant 0 : index
    %c0_27 = arith.constant 0 : index
    %37 = vector.load %arg8[%c0_26, %c0_27] : memref<8x4608xf32, #tpu.memory_space<vmem>>, vector<8x512xf32>
    tpu.vector_store %arg8[%c0_26, %c0_27], %36 {strides = array<i32>} : memref<8x4608xf32, #tpu.memory_space<vmem>>, vector<8x512xf32>,
    %c0_28 = arith.constant 0 : index
    %c512 = arith.constant 512 : index
    %38 = vector.load %arg6[%c0_28, %c512] : memref<256x4608xbf16, #tpu.memory_space<vmem>>, vector<256x512xbf16>
    %cst_29 = arith.constant dense<0.000000e+00> : vector<8x512xf32>
    %39 = tpu.matmul %31, %38, %cst_29 {dimension_numbers = #tpu.dot_dimension_numbers<[1], [0], [0], [1], [0, 0, 1, 1], [], []>} : vector<8x256xbf16>, vector<256x512xbf16>, vector<8x512xf32> -> vector<8x512xf32>
    %c0_30 = arith.constant 0 : index
    %c512_31 = arith.constant 512 : index
    %40 = vector.load %arg7[%c0_30, %c512_31] : memref<1x4608xf32, #tpu.memory_space<vmem>>, vector<1x512xf32>
    %41 = vector.broadcast %40 : vector<1x512xf32> to vector<8x512xf32>
    %42 = arith.addf %39, %41 : vector<8x512xf32>
    %c0_32 = arith.constant 0 : index
    %c512_33 = arith.constant 512 : index
    %43 = vector.load %arg8[%c0_32, %c512_33] : memref<8x4608xf32, #tpu.memory_space<vmem>>, vector<8x512xf32>
    tpu.vector_store %arg8[%c0_32, %c512_33], %42 {strides = array<i32>} : memref<8x4608xf32, #tpu.memory_space<vmem>>, vector<8x512xf32>,
    %c0_34 = arith.constant 0 : index
    %c1024 = arith.constant 1024 : index
    %44 = vector.load %arg6[%c0_34, %c1024] : memref<256x4608xbf16, #tpu.memory_space<vmem>>, vector<256x512xbf16>
    %cst_35 = arith.constant dense<0.000000e+00> : vector<8x512xf32>
    %45 = tpu.matmul %31, %44, %cst_35 {dimension_numbers = #tpu.dot_dimension_numbers<[1], [0], [0], [1], [0, 0, 1, 1], [], []>} : vector<8x256xbf16>, vector<256x512xbf16>, vector<8x512xf32> -> vector<8x512xf32>
    %c0_36 = arith.constant 0 : index
    %c1024_37 = arith.constant 1024 : index
    %46 = vector.load %arg7[%c0_36, %c1024_37] : memref<1x4608xf32, #tpu.memory_space<vmem>>, vector<1x512xf32>
    %47 = vector.broadcast %46 : vector<1x512xf32> to vector<8x512xf32>
    %48 = arith.addf %45, %47 : vector<8x512xf32>
    %c0_38 = arith.constant 0 : index
    %c1024_39 = arith.constant 1024 : index
    %49 = vector.load %arg8[%c0_38, %c1024_39] : memref<8x4608xf32, #tpu.memory_space<vmem>>, vector<8x512xf32>
    tpu.vector_store %arg8[%c0_38, %c1024_39], %48 {strides = array<i32>} : memref<8x4608xf32, #tpu.memory_space<vmem>>, vector<8x512xf32>,
    %c0_40 = arith.constant 0 : index
    %c1536 = arith.constant 1536 : index
    %50 = vector.load %arg6[%c0_40, %c1536] : memref<256x4608xbf16, #tpu.memory_space<vmem>>, vector<256x512xbf16>
    %cst_41 = arith.constant dense<0.000000e+00> : vector<8x512xf32>
    %51 = tpu.matmul %31, %50, %cst_41 {dimension_numbers = #tpu.dot_dimension_numbers<[1], [0], [0], [1], [0, 0, 1, 1], [], []>} : vector<8x256xbf16>, vector<256x512xbf16>, vector<8x512xf32> -> vector<8x512xf32>
    %c0_42 = arith.constant 0 : index
    %c1536_43 = arith.constant 1536 : index
    %52 = vector.load %arg7[%c0_42, %c1536_43] : memref<1x4608xf32, #tpu.memory_space<vmem>>, vector<1x512xf32>
    %53 = vector.broadcast %52 : vector<1x512xf32> to vector<8x512xf32>
    %54 = arith.addf %51, %53 : vector<8x512xf32>
    %c0_44 = arith.constant 0 : index
    %c1536_45 = arith.constant 1536 : index
    %55 = vector.load %arg8[%c0_44, %c1536_45] : memref<8x4608xf32, #tpu.memory_space<vmem>>, vector<8x512xf32>
    tpu.vector_store %arg8[%c0_44, %c1536_45], %54 {strides = array<i32>} : memref<8x4608xf32, #tpu.memory_space<vmem>>, vector<8x512xf32>,
    %c0_46 = arith.constant 0 : index
    %c2048 = arith.constant 2048 : index
    %56 = vector.load %arg6[%c0_46, %c2048] : memref<256x4608xbf16, #tpu.memory_space<vmem>>, vector<256x512xbf16>
    %cst_47 = arith.constant dense<0.000000e+00> : vector<8x512xf32>
    %57 = tpu.matmul %31, %56, %cst_47 {dimension_numbers = #tpu.dot_dimension_numbers<[1], [0], [0], [1], [0, 0, 1, 1], [], []>} : vector<8x256xbf16>, vector<256x512xbf16>, vector<8x512xf32> -> vector<8x512xf32>
    %c0_48 = arith.constant 0 : index
    %c2048_49 = arith.constant 2048 : index
    %58 = vector.load %arg7[%c0_48, %c2048_49] : memref<1x4608xf32, #tpu.memory_space<vmem>>, vector<1x512xf32>
    %59 = vector.broadcast %58 : vector<1x512xf32> to vector<8x512xf32>
    %60 = arith.addf %57, %59 : vector<8x512xf32>
    %c0_50 = arith.constant 0 : index
    %c2048_51 = arith.constant 2048 : index
    %61 = vector.load %arg8[%c0_50, %c2048_51] : memref<8x4608xf32, #tpu.memory_space<vmem>>, vector<8x512xf32>
    tpu.vector_store %arg8[%c0_50, %c2048_51], %60 {strides = array<i32>} : memref<8x4608xf32, #tpu.memory_space<vmem>>, vector<8x512xf32>,
    %c0_52 = arith.constant 0 : index
    %c2560 = arith.constant 2560 : index
    %62 = vector.load %arg6[%c0_52, %c2560] : memref<256x4608xbf16, #tpu.memory_space<vmem>>, vector<256x512xbf16>
    %cst_53 = arith.constant dense<0.000000e+00> : vector<8x512xf32>
    %63 = tpu.matmul %31, %62, %cst_53 {dimension_numbers = #tpu.dot_dimension_numbers<[1], [0], [0], [1], [0, 0, 1, 1], [], []>} : vector<8x256xbf16>, vector<256x512xbf16>, vector<8x512xf32> -> vector<8x512xf32>
    %c0_54 = arith.constant 0 : index
    %c2560_55 = arith.constant 2560 : index
    %64 = vector.load %arg7[%c0_54, %c2560_55] : memref<1x4608xf32, #tpu.memory_space<vmem>>, vector<1x512xf32>
    %65 = vector.broadcast %64 : vector<1x512xf32> to vector<8x512xf32>
    %66 = arith.addf %63, %65 : vector<8x512xf32>
    %c0_56 = arith.constant 0 : index
    %c2560_57 = arith.constant 2560 : index
    %67 = vector.load %arg8[%c0_56, %c2560_57] : memref<8x4608xf32, #tpu.memory_space<vmem>>, vector<8x512xf32>
    tpu.vector_store %arg8[%c0_56, %c2560_57], %66 {strides = array<i32>} : memref<8x4608xf32, #tpu.memory_space<vmem>>, vector<8x512xf32>,
    %c0_58 = arith.constant 0 : index
    %c3072 = arith.constant 3072 : index
    %68 = vector.load %arg6[%c0_58, %c3072] : memref<256x4608xbf16, #tpu.memory_space<vmem>>, vector<256x512xbf16>
    %cst_59 = arith.constant dense<0.000000e+00> : vector<8x512xf32>
    %69 = tpu.matmul %31, %68, %cst_59 {dimension_numbers = #tpu.dot_dimension_numbers<[1], [0], [0], [1], [0, 0, 1, 1], [], []>} : vector<8x256xbf16>, vector<256x512xbf16>, vector<8x512xf32> -> vector<8x512xf32>
    %c0_60 = arith.constant 0 : index
    %c3072_61 = arith.constant 3072 : index
    %70 = vector.load %arg7[%c0_60, %c3072_61] : memref<1x4608xf32, #tpu.memory_space<vmem>>, vector<1x512xf32>
    %71 = vector.broadcast %70 : vector<1x512xf32> to vector<8x512xf32>
    %72 = arith.addf %69, %71 : vector<8x512xf32>
    %c0_62 = arith.constant 0 : index
    %c3072_63 = arith.constant 3072 : index
    %73 = vector.load %arg8[%c0_62, %c3072_63] : memref<8x4608xf32, #tpu.memory_space<vmem>>, vector<8x512xf32>
    tpu.vector_store %arg8[%c0_62, %c3072_63], %72 {strides = array<i32>} : memref<8x4608xf32, #tpu.memory_space<vmem>>, vector<8x512xf32>,
    %c0_64 = arith.constant 0 : index
    %c3584 = arith.constant 3584 : index
    %74 = vector.load %arg6[%c0_64, %c3584] : memref<256x4608xbf16, #tpu.memory_space<vmem>>, vector<256x512xbf16>
    %cst_65 = arith.constant dense<0.000000e+00> : vector<8x512xf32>
    %75 = tpu.matmul %31, %74, %cst_65 {dimension_numbers = #tpu.dot_dimension_numbers<[1], [0], [0], [1], [0, 0, 1, 1], [], []>} : vector<8x256xbf16>, vector<256x512xbf16>, vector<8x512xf32> -> vector<8x512xf32>
    %c0_66 = arith.constant 0 : index
    %c3584_67 = arith.constant 3584 : index
    %76 = vector.load %arg7[%c0_66, %c3584_67] : memref<1x4608xf32, #tpu.memory_space<vmem>>, vector<1x512xf32>
    %77 = vector.broadcast %76 : vector<1x512xf32> to vector<8x512xf32>
    %78 = arith.addf %75, %77 : vector<8x512xf32>
    %c0_68 = arith.constant 0 : index
    %c3584_69 = arith.constant 3584 : index
    %79 = vector.load %arg8[%c0_68, %c3584_69] : memref<8x4608xf32, #tpu.memory_space<vmem>>, vector<8x512xf32>
    tpu.vector_store %arg8[%c0_68, %c3584_69], %78 {strides = array<i32>} : memref<8x4608xf32, #tpu.memory_space<vmem>>, vector<8x512xf32>,
    %c0_70 = arith.constant 0 : index
    %c4096 = arith.constant 4096 : index
    %80 = vector.load %arg6[%c0_70, %c4096] : memref<256x4608xbf16, #tpu.memory_space<vmem>>, vector<256x512xbf16>
    %cst_71 = arith.constant dense<0.000000e+00> : vector<8x512xf32>
    %81 = tpu.matmul %31, %80, %cst_71 {dimension_numbers = #tpu.dot_dimension_numbers<[1], [0], [0], [1], [0, 0, 1, 1], [], []>} : vector<8x256xbf16>, vector<256x512xbf16>, vector<8x512xf32> -> vector<8x512xf32>
    %c0_72 = arith.constant 0 : index
    %c4096_73 = arith.constant 4096 : index
    %82 = vector.load %arg7[%c0_72, %c4096_73] : memref<1x4608xf32, #tpu.memory_space<vmem>>, vector<1x512xf32>
    %83 = vector.broadcast %82 : vector<1x512xf32> to vector<8x512xf32>
    %84 = arith.addf %81, %83 : vector<8x512xf32>
    %c0_74 = arith.constant 0 : index
    %c4096_75 = arith.constant 4096 : index
    %85 = vector.load %arg8[%c0_74, %c4096_75] : memref<8x4608xf32, #tpu.memory_space<vmem>>, vector<8x512xf32>
    tpu.vector_store %arg8[%c0_74, %c4096_75], %84 {strides = array<i32>} : memref<8x4608xf32, #tpu.memory_space<vmem>>, vector<8x512xf32>,
    return
  }
  func.func @transform_0(%arg0: i32) -> (i32, i32) {
    %c0_i32 = arith.constant 0 : i32
    %c0_i32_0 = arith.constant 0 : i32
    return %arg0, %c0_i32 : i32, i32
  }
  func.func @transform_1(%arg0: i32) -> (i32, i32) {
    %c0_i32 = arith.constant 0 : i32
    %c0_i32_0 = arith.constant 0 : i32
    %c0_i32_1 = arith.constant 0 : i32
    return %c0_i32, %c0_i32_0 : i32, i32
  }
  func.func @transform_2(%arg0: i32) -> (i32, i32) {
    %c0_i32 = arith.constant 0 : i32
    %c0_i32_0 = arith.constant 0 : i32
    %c0_i32_1 = arith.constant 0 : i32
    return %c0_i32, %c0_i32_0 : i32, i32
  }
  func.func @transform_3(%arg0: i32) -> (i32, i32, i32) {
    %c0_i32 = arith.constant 0 : i32
    %c0_i32_0 = arith.constant 0 : i32
    %c0_i32_1 = arith.constant 0 : i32
    %c0_i32_2 = arith.constant 0 : i32
    return %c0_i32, %c0_i32_0, %c0_i32_1 : i32, i32, i32
  }
  func.func @transform_4(%arg0: i32) -> (i32, i32, i32) {
    %c0_i32 = arith.constant 0 : i32
    %c0_i32_0 = arith.constant 0 : i32
    %c0_i32_1 = arith.constant 0 : i32
    %c0_i32_2 = arith.constant 0 : i32
    return %c0_i32, %c0_i32_0, %c0_i32_1 : i32, i32, i32
  }
  func.func @transform_5(%arg0: i32) -> (i32, i32) {
    %c0_i32 = arith.constant 0 : i32
    %c0_i32_0 = arith.constant 0 : i32
    %c0_i32_1 = arith.constant 0 : i32
    return %c0_i32, %c0_i32_0 : i32, i32
  }
  func.func @transform_6(%arg0: i32) -> (i32, i32) {
    %c0_i32 = arith.constant 0 : i32
    %c0_i32_0 = arith.constant 0 : i32
    %c0_i32_1 = arith.constant 0 : i32
    return %c0_i32, %c0_i32_0 : i32, i32
  }
  func.func @transform_7(%arg0: i32) -> (i32, i32) {
    %c0_i32 = arith.constant 0 : i32
    %c0_i32_0 = arith.constant 0 : i32
    return %arg0, %c0_i32 : i32, i32
  }
}

</mosaic_0001>

<bundles_post_ra>
// kernel: mapping_network.1
= control target key start
LH: loop header
LB: loop body
LE: loop exit
PB: predicated region body
PF: predicated region fallthrough
CT: control target
= control target key end

     0   :  { %12 = vsyncpa [#allocation3], 0  ;;  %s9749_s0 = inlined_call_operand.vmem [shape: bf16[16,256], index: 0, kind: input, shape index: {}]   ;;  %s9750_s1 = inlined_call_operand.hbm [shape: bf16[256,256], index: 1, kind: input, shape index: {}]   ;;  %s9751_s2 = inlined_call_operand.hbm [shape: f32[1,256], index: 2, kind: input, shape index: {}]   ;;  %s9752_s3 = inlined_call_operand.hbm [shape: bf16[2,256,256], index: 3, kind: input, shape index: {}]   ;;  %s9753_s4 = inlined_call_operand.hbm [shape: f32[2,1,256], index: 4, kind: input, shape index: {}]   ;;  %s9754_s5 = inlined_call_operand.hbm [shape: bf16[256,4608], index: 5, kind: input, shape index: {}]   ;;  %s9755_s6 = inlined_call_operand.hbm [shape: f32[1,4608], index: 6, kind: input, shape index: {}]   ;;  %s9756_s7 = inlined_call_operand.vmem [shape: f32[16,4608], index: 7, kind: output, shape index: {}]  }
   0x1   :  { %13 = vsyncpa [#allocation5], 0 }
   0x2   :  { %14 = vsyncpa [#allocation8], 0 }
   0x3   :  { %15 = vsyncpa [#allocation11], 0  ;;  %s9501_s24 = smov 0  }
   0x4 LB: > { %s230_s27 = sshll.u32 %s9751_s2, 4  ;;  %s9510_s28 = sadd.s32 4294967295, %s9447_s24   ;;  %s9447_s24 = sphi %s9501_s24, %s21_s24   ;;  %s231_s27 = int_to_ptr.hbm [resolvable:$true] %s230_s27 }
   0x5   : > { %p5788_p0 = scmp.ge.s32.totalorder %s9447_s24, 1  ;;  %p204_p1 = scmp.lt.s32.totalorder %s9447_s24, 3 }
   0x6   : > { %p9213_p2 = scmp.eq.s32.totalorder %s9510_s28, 0  ;;  %s9449_s30 = smov [#allocation4]  }
   0x7   : > { %p9515_p3 = pnand %p5788_p0, %p204_p1  ;;  %s232_s8 = sshll.u32 %s9449_s30, 4  ;;  %s233_s8 = int_to_ptr.vmem [resolvable:$true] %s232_s8 }
   0x8   : > { %s255_s11 = sshll.u32 %s9753_s4, 4  ;;  %s9450_s13 = smov [#allocation7]   ;;  %s256_s11 = int_to_ptr.hbm [resolvable:$true] %s255_s11 }
   0x9   : > { %p9194_p4 = pneg %p9515_p3  ;;  %s257_s14 = sshll.u32 %s9450_s13, 4  ;;  %s258_s14 = int_to_ptr.vmem [resolvable:$true] %s257_s14 }
   0xa   : > { %s215_s17 = sshll.u32 %s9750_s1, 4  ;;  %s9451_s18 = smov 32   ;;  %s216_s17 = int_to_ptr.hbm [resolvable:$true] %s215_s17 }
   0xb   : > { %p9526_p5 = pnand %p9213_p2, %p9194_p4  ;;  %s9452_s19 = smov 2  }
   0xc   : > { %s9453_s20 = smov [#allocation2]   ;;  %s9454_s22 = smov 128  }
   0xd   : > { %9200 = dma.hbm_to_vmem [thread:$0]  (!%p9526_p5), %s231_s27, 32, %s233_s8, [#allocation5]  }
   0xe   : > { %9206 = dma.hbm_to_vmem [thread:$0]  (!%p9526_p5), %s256_s11, 64, %s258_s14, [#allocation8], %s9451_s18, %s9451_s18, %s9452_s19  }
   0xf   : > { %s217_s21 = sshll.u32 %s9453_s20, 4  ;;  %s9455_s23 = smov 8   ;;  %s218_s21 = int_to_ptr.vmem [resolvable:$true] %s217_s21 }
  0x10   : > { %9197 = dma.hbm_to_vmem [thread:$0]  (!%p9526_p5), %s216_s17, 4096, %s218_s21, [#allocation3], %s9454_s22, %s9454_s22, %s9455_s23  }
  0x11   : > { %s241_s30 = sshll.u32 %s9752_s3, 4  ;;  %s9456_s27 = smov [#allocation6]   ;;  %s242_s30 = int_to_ptr.hbm [resolvable:$true] %s241_s30 }
  0x12   : > { %s243_s8 = sshll.u32 %s9456_s27, 4  ;;  %s269_s11 = sshll.u32 %s9754_s5, 4  ;;  %s244_s8 = int_to_ptr.vmem [resolvable:$true] %s243_s8  ;;  %s270_s11 = int_to_ptr.hbm [resolvable:$true] %s269_s11 }
  0x13   : > { %9203 = dma.hbm_to_vmem [thread:$0]  (!%p9526_p5), %s242_s30, 8192, %s244_s8, [#allocation5], %s9454_s22, %s9454_s22, %s9455_s23  }
  0x14   : > { %s9457_s13 = smov [#allocation9]   ;;  %s9458_s15 = smov 2304  }
  0x15   : > { %s271_s14 = sshll.u32 %s9457_s13, 4  ;;  %s9459_s16 = smov 144   ;;  %s272_s14 = int_to_ptr.vmem [resolvable:$true] %s271_s14 }
  0x16   : > { %9209 = dma.hbm_to_vmem [thread:$0]  (!%p9526_p5), %s270_s11, 73728, %s272_s14, [#allocation8], %s9458_s15, %s9458_s15, %s9459_s16  }
  0x17   : > { %s284_s19 = sshll.u32 %s9755_s6, 4  ;;  %s9460_s20 = smov [#allocation10]   ;;  %s285_s19 = int_to_ptr.hbm [resolvable:$true] %s284_s19 }
  0x18   : > { %s286_s21 = sshll.u32 %s9460_s20, 4  ;;  %307 = sbr.rel (%p9515_p3) target bundleno = 1148 (0x47c), region = 48  ;;  %s287_s21 = int_to_ptr.vmem [resolvable:$true] %s286_s21 }
  0x19   : > { %9212 = dma.hbm_to_vmem [thread:$0]  (!%p9526_p5), %s285_s19, 576, %s287_s21, [#allocation11]  }
  0x1d   : > { %9430 = dma.done.wait (%p9213_p2), [#allocation3], 4096  }
  0x1e   : > { %9432 = vsyncadd (%p9213_p2), [#allocation3], 4294963200 }
  0x1f   : > { %9434 = dma.done.wait (%p9213_p2), [#allocation5], 8224  }
  0x20   : > { %9436 = vsyncadd (%p9213_p2), [#allocation5], 4294959072 }
  0x21   : > { %9438 = dma.done.wait (%p9213_p2), [#allocation8], 73792  }
  0x22   : > { %9440 = vsyncadd (%p9213_p2), [#allocation8], 4294893504 }
  0x23   : > { %9442 = dma.done.wait (%p9213_p2), [#allocation11], 576  }
  0x24   : > { %9444 = vsyncadd (%p9213_p2), [#allocation11], 4294966720  ;;  %p365_p6 = scmp.lt.s32.totalorder %s9510_s28, 1  ;;  %v5864_v0 = vld [vmem:[#allocation2 + $0x70] sm:$0xf] }
  0x25   : > { %v8512_v1 = vld [vmem:[#allocation2 + $0x74] sm:$0xf0]  ;;  %v5928_v2 = vld [vmem:[#allocation2 + $0xf0] sm:$0xf]  ;;  %v8511_v5 = vld [vmem:[#allocation2 + $0x74] sm:$0xf] }
  0x26   : > { %v5865_v3 = vor.u32 %v8512_v1, %v5864_v0  ;;  %v8528_v4 = vld [vmem:[#allocation2 + $0xf4] sm:$0xf0]  ;;  %v5866_v6 = vld [vmem:[#allocation2 + $0x78] sm:$0xf0]  ;;  %v8527_v9 = vld [vmem:[#allocation2 + $0xf4] sm:$0xf] }
  0x27   : > { %v5929_v7 = vor.u32 %v8528_v4, %v5928_v2  ;;  %v5869_v8 = vor.u32 %v8511_v5, %v5866_v6  ;;  %v5930_v10 = vld [vmem:[#allocation2 + $0xf8] sm:$0xf0]  ;;  %v5856_v11 = vld [vmem:[#allocation2 + $0x60] sm:$0xf]  ;;  %v8510_v13 = vld [vmem:[#allocation2 + $0x64] sm:$0xf0] }
  0x28   : > { %581 = vmatpush.bf16.msra.mxu0 %v5865_v3  ;;  %v5933_v12 = vor.u32 %v8527_v9, %v5930_v10  ;;  %v5920_v14 = vld [vmem:[#allocation2 + $0xe0] sm:$0xf]  ;;  %v8526_v15 = vld [vmem:[#allocation2 + $0xe4] sm:$0xf0]  ;;  %v5857_v16 = vor.u32 %v8510_v13, %v5856_v11  ;;  %v8509_v18 = vld [vmem:[#allocation2 + $0x64] sm:$0xf] }
  0x29   : > { %594 = vmatpush.bf16.msra.mxu1 %v5929_v7  ;;  %607 = vmatpush.bf16.msra.mxu2 %v5869_v8  ;;  %v5921_v17 = vor.u32 %v8526_v15, %v5920_v14  ;;  %v5858_v19 = vld [vmem:[#allocation2 + $0x68] sm:$0xf0]  ;;  %v8525_v20 = vld [vmem:[#allocation2 + $0xe4] sm:$0xf]  ;;  %v5848_v23 = vld [vmem:[#allocation2 + $0x50] sm:$0xf] }
  0x2a   : > { %620 = vmatpush.bf16.msra.mxu3 %v5933_v12  ;;  %v5861_v21 = vor.u32 %v8509_v18, %v5858_v19  ;;  %v5922_v22 = vld [vmem:[#allocation2 + $0xe8] sm:$0xf0]  ;;  %v8508_v24 = vld [vmem:[#allocation2 + $0x54] sm:$0xf0]  ;;  %v5912_v26 = vld [vmem:[#allocation2 + $0xd0] sm:$0xf] }
  0x2b   : > { %v5925_v25 = vor.u32 %v8525_v20, %v5922_v22  ;;  %v8524_v27 = vld [vmem:[#allocation2 + $0xd4] sm:$0xf0]  ;;  %v8507_v28 = vld [vmem:[#allocation2 + $0x54] sm:$0xf]  ;;  %v5849_v29 = vor.u32 %v8508_v24, %v5848_v23  ;;  %v5850_v30 = vld [vmem:[#allocation2 + $0x58] sm:$0xf0] }
  0x2c   : > { %582 = vmatpush.bf16.msra.mxu0 %v5857_v16  ;;  %v8523_v31 = vld [vmem:[#allocation2 + $0xd4] sm:$0xf]  ;;  %v5914_v32 = vld [vmem:[#allocation2 + $0xd8] sm:$0xf0]  ;;  %v5913_v33 = vor.u32 %v8524_v27, %v5912_v26  ;;  %v5853_v34 = vor.u32 %v8507_v28, %v5850_v30  ;;  %v5840_v35 = vld [vmem:[#allocation2 + $0x40] sm:$0xf] }
  0x2d   : > { %595 = vmatpush.bf16.msra.mxu1 %v5921_v17  ;;  %608 = vmatpush.bf16.msra.mxu2 %v5861_v21  ;;  %v8506_v36 = vld [vmem:[#allocation2 + $0x44] sm:$0xf0]  ;;  %v5904_v37 = vld [vmem:[#allocation2 + $0xc0] sm:$0xf]  ;;  %v5917_v38 = vor.u32 %v8523_v31, %v5914_v32  ;;  %v8505_v40 = vld [vmem:[#allocation2 + $0x44] sm:$0xf] }
  0x2e   : > { %621 = vmatpush.bf16.msra.mxu3 %v5925_v25  ;;  %v8522_v39 = vld [vmem:[#allocation2 + $0xc4] sm:$0xf0]  ;;  %v5842_v41 = vld [vmem:[#allocation2 + $0x48] sm:$0xf0]  ;;  %v8521_v42 = vld [vmem:[#allocation2 + $0xc4] sm:$0xf]  ;;  %v5841_v44 = vor.u32 %v8506_v36, %v5840_v35 }
  0x2f   : > { %v5906_v43 = vld [vmem:[#allocation2 + $0xc8] sm:$0xf0]  ;;  %s9760_s28 = smov (!%p365_p6, %s9510_s28), 1  ;;  %v5905_v45 = vor.u32 %v8522_v39, %v5904_v37  ;;  %v5845_v46 = vor.u32 %v8505_v40, %v5842_v41  ;;  %v5832_v47 = vld [vmem:[#allocation2 + $0x30] sm:$0xf] }
  0x30   : > { %583 = vmatpush.bf16.msra.mxu0 %v5849_v29  ;;  %v8504_v48 = vld [vmem:[#allocation2 + $0x34] sm:$0xf0]  ;;  %v5896_v49 = vld [vmem:[#allocation2 + $0xb0] sm:$0xf]  ;;  %v5909_v50 = vor.u32 %v8521_v42, %v5906_v43  ;;  %v8503_v52 = vld [vmem:[#allocation2 + $0x34] sm:$0xf] }
  0x31   : > { %596 = vmatpush.bf16.msra.mxu1 %v5913_v33  ;;  %609 = vmatpush.bf16.msra.mxu2 %v5853_v34  ;;  %v8520_v51 = vld [vmem:[#allocation2 + $0xb4] sm:$0xf0]  ;;  %v5834_v53 = vld [vmem:[#allocation2 + $0x38] sm:$0xf0]  ;;  %v8519_v54 = vld [vmem:[#allocation2 + $0xb4] sm:$0xf]  ;;  %v5833_v56 = vor.u32 %v8504_v48, %v5832_v47 }
  0x32   : > { %622 = vmatpush.bf16.msra.mxu3 %v5917_v38  ;;  %v5898_v55 = vld [vmem:[#allocation2 + $0xb8] sm:$0xf0]  ;;  %s8496_s29 = sshll.u32 %s9760_s28, 3  ;;  %v5897_v57 = vor.u32 %v8520_v51, %v5896_v49  ;;  %v5837_v58 = vor.u32 %v8503_v52, %v5834_v53  ;;  %v5824_v59 = vld [vmem:[#allocation2 + $0x20] sm:$0xf]  ;;  %s9169_s25 = smul.u32 288, %s9760_s28 }
  0x33   : > { %v8502_v60 = vld [vmem:[#allocation2 + $0x24] sm:$0xf0]  ;;  %v5888_v61 = vld [vmem:[#allocation2 + $0xa0] sm:$0xf]  ;;  %v5901_v62 = vor.u32 %v8519_v54, %v5898_v55  ;;  %v8501_v0 = vld [vmem:[#allocation2 + $0x24] sm:$0xf]  ;;  %s369_s23 = scalar_lea.vmem %s9749_s0, %s8496_s29 }
  0x34   : > { %584 = vmatpush.bf16.msra.mxu0 %v5841_v44  ;;  %v8518_v63 = vld [vmem:[#allocation2 + $0xa4] sm:$0xf0]  ;;  %v5826_v1 = vld [vmem:[#allocation2 + $0x28] sm:$0xf0]  ;;  %v8517_v2 = vld [vmem:[#allocation2 + $0xa4] sm:$0xf]  ;;  %v5825_v4 = vor.u32 %v8502_v60, %v5824_v59  ;;  %s9621_s28 = scalar_lea.vmem %s9756_s7, %s9169_s25 }
  0x35   : > { %597 = vmatpush.bf16.msra.mxu1 %v5905_v45  ;;  %610 = vmatpush.bf16.msra.mxu2 %v5845_v46  ;;  %v5890_v3 = vld [vmem:[#allocation2 + $0xa8] sm:$0xf0]  ;;  %v5889_v5 = vor.u32 %v8518_v63, %v5888_v61  ;;  %v5829_v6 = vor.u32 %v8501_v0, %v5826_v1  ;;  %v5816_v7 = vld [vmem:[#allocation2 + $0x10] sm:$0xf]  ;;  %v8500_v8 = vld [vmem:[#allocation2 + $0x14] sm:$0xf0] }
  0x36   : > { %623 = vmatpush.bf16.msra.mxu3 %v5909_v50  ;;  %v5880_v9 = vld [vmem:[#allocation2 + $0x90] sm:$0xf]  ;;  %v5893_v10 = vor.u32 %v8517_v2, %v5890_v3  ;;  %v8516_v11 = vld [vmem:[#allocation2 + $0x94] sm:$0xf0]  ;;  %v8499_v12 = vld [vmem:[#allocation2 + $0x14] sm:$0xf]  ;;  %v5817_v16 = vor.u32 %v8500_v8, %v5816_v7 }
  0x37   : > { %v5818_v13 = vld [vmem:[#allocation2 + $0x18] sm:$0xf0]  ;;  %v8515_v14 = vld [vmem:[#allocation2 + $0x94] sm:$0xf]  ;;  %v5808_v17 = vld [vmem:[#allocation2] sm:$0xf]  ;;  %v5881_v19 = vor.u32 %v8516_v11, %v5880_v9 }
  0x38   : > { %585 = vmatpush.bf16.msra.mxu0 %v5833_v56  ;;  %v5882_v15 = vld [vmem:[#allocation2 + $0x98] sm:$0xf0]  ;;  %v375_v18 = vld [vmem:[%s369_s23] sm:$0xff]  ;;  %v5821_v20 = vor.u32 %v8499_v12, %v5818_v13  ;;  %v8498_v21 = vld [vmem:[#allocation2 + $0x4] sm:$0xf0] }
  0x39   : > { %598 = vmatpush.bf16.msra.mxu1 %v5897_v57  ;;  %611 = vmatpush.bf16.msra.mxu2 %v5837_v58  ;;  %v5872_v22 = vld [vmem:[#allocation2 + $0x80] sm:$0xf]  ;;  %v8514_v23 = vld [vmem:[#allocation2 + $0x84] sm:$0xf0]  ;;  %v5885_v24 = vor.u32 %v8515_v14, %v5882_v15  ;;  %v8497_v25 = vld [vmem:[#allocation2 + $0x4] sm:$0xf]  ;;  %v415_v29 = vunpack.c.l.b16 %v375_v18  ;;  %v5809_v32 = vor.u32 %v8498_v21, %v5808_v17  ;;  %v416_v33 = vunpack.c.h.b16 %v375_v18 }
  0x3a   : > { %624 = vmatpush.bf16.msra.mxu3 %v5901_v62  ;;  %v5810_v26 = vld [vmem:[#allocation2 + $0x8] sm:$0xf0]  ;;  %v8513_v27 = vld [vmem:[#allocation2 + $0x84] sm:$0xf]  ;;  %v5992_v30 = vld [vmem:[#allocation6 + $0x70] sm:$0xf]  ;;  %v5873_v36 = vor.u32 %v8514_v23, %v5872_v22 }
  0x3b   : > { %v5874_v28 = vld [vmem:[#allocation2 + $0x88] sm:$0xf0]  ;;  %v8544_v31 = vld [vmem:[#allocation6 + $0x74] sm:$0xf0]  ;;  %v8543_v34 = vld [vmem:[#allocation6 + $0x74] sm:$0xf]  ;;  %v5813_v37 = vor.u32 %v8497_v25, %v5810_v26  ;;  %v417_v43 = vpack.c.b16 %v415_v29, %v415_v29  ;;  %v418_v48 = vpack.c.b16 %v416_v33, %v416_v33 }
  0x3c   : > { %586 = vmatpush.bf16.msra.mxu0 %v5825_v4  ;;  %v5994_v35 = vld [vmem:[#allocation6 + $0x78] sm:$0xf0]  ;;  %v5877_v38 = vor.u32 %v8513_v27, %v5874_v28  ;;  %v5993_v39 = vor.u32 %v8544_v31, %v5992_v30  ;;  %v5984_v40 = vld [vmem:[#allocation6 + $0x60] sm:$0xf]  ;;  %v6056_v41 = vld [vmem:[#allocation6 + $0xf0] sm:$0xf] }
  0x3d   : > { %599 = vmatpush.bf16.msra.mxu1 %v5889_v5  ;;  %612 = vmatpush.bf16.msra.mxu2 %v5829_v6  ;;  %v8560_v42 = vld [vmem:[#allocation6 + $0xf4] sm:$0xf0]  ;;  %v5997_v44 = vor.u32 %v8543_v34, %v5994_v35  ;;  %v8542_v45 = vld [vmem:[#allocation6 + $0x64] sm:$0xf0]  ;;  %v8559_v46 = vld [vmem:[#allocation6 + $0xf4] sm:$0xf] }
  0x3e   : > { %625 = vmatpush.bf16.msra.mxu3 %v5893_v10  ;;  %v6058_v47 = vld [vmem:[#allocation6 + $0xf8] sm:$0xf0]  ;;  %v8541_v49 = vld [vmem:[#allocation6 + $0x64] sm:$0xf]  ;;  %v5986_v50 = vld [vmem:[#allocation6 + $0x68] sm:$0xf0]  ;;  %v6057_v51 = vor.u32 %v8560_v42, %v6056_v41  ;;  %v5985_v52 = vor.u32 %v8542_v45, %v5984_v40 }
  0x3f   : > { %v6061_v53 = vor.u32 %v8559_v46, %v6058_v47  ;;  %v5976_v54 = vld [vmem:[#allocation6 + $0x50] sm:$0xf]  ;;  %v6048_v55 = vld [vmem:[#allocation6 + $0xe0] sm:$0xf]  ;;  %v8558_v56 = vld [vmem:[#allocation6 + $0xe4] sm:$0xf0]  ;;  %v5989_v57 = vor.u32 %v8541_v49, %v5986_v50 }
  0x40   : > { %587 = vmatpush.bf16.msra.mxu0 %v5817_v16  ;;  %v8540_v58 = vld [vmem:[#allocation6 + $0x54] sm:$0xf0]  ;;  %v8557_v59 = vld [vmem:[#allocation6 + $0xe4] sm:$0xf]  ;;  %v6050_v60 = vld [vmem:[#allocation6 + $0xe8] sm:$0xf0]  ;;  %v6049_v63 = vor.u32 %v8558_v56, %v6048_v55 }
  0x41   : > { %600 = vmatpush.bf16.msra.mxu1 %v5881_v19  ;;  %613 = vmatpush.bf16.msra.mxu2 %v5821_v20  ;;  %v8539_v61 = vld [vmem:[#allocation6 + $0x54] sm:$0xf]  ;;  %v5978_v62 = vld [vmem:[#allocation6 + $0x58] sm:$0xf0]  ;;  %v5977_v0 = vor.u32 %v8540_v58, %v5976_v54  ;;  %v6053_v1 = vor.u32 %v8557_v59, %v6050_v60  ;;  %v5968_v2 = vld [vmem:[#allocation6 + $0x40] sm:$0xf] }
  0x42   : > { %626 = vmatpush.bf16.msra.mxu3 %v5885_v24  ;;  %v6040_v3 = vld [vmem:[#allocation6 + $0xd0] sm:$0xf]  ;;  %v8556_v4 = vld [vmem:[#allocation6 + $0xd4] sm:$0xf0]  ;;  %v5981_v5 = vor.u32 %v8539_v61, %v5978_v62  ;;  %v8538_v6 = vld [vmem:[#allocation6 + $0x44] sm:$0xf0] }
  0x43   : > { %v8555_v7 = vld [vmem:[#allocation6 + $0xd4] sm:$0xf]  ;;  %v6042_v8 = vld [vmem:[#allocation6 + $0xd8] sm:$0xf0]  ;;  %v8537_v9 = vld [vmem:[#allocation6 + $0x44] sm:$0xf]  ;;  %v6041_v11 = vor.u32 %v8556_v4, %v6040_v3  ;;  %v5969_v12 = vor.u32 %v8538_v6, %v5968_v2 }
  0x44   : > { %588 = vmatpush.bf16.msra.mxu0 %v5809_v32  ;;  %v5970_v10 = vld [vmem:[#allocation6 + $0x48] sm:$0xf0]  ;;  %v6045_v13 = vor.u32 %v8555_v7, %v6042_v8  ;;  %v5960_v14 = vld [vmem:[#allocation6 + $0x30] sm:$0xf]  ;;  %v6032_v15 = vld [vmem:[#allocation6 + $0xc0] sm:$0xf] }
  0x45   : > { %601 = vmatpush.bf16.msra.mxu1 %v5873_v36  ;;  %614 = vmatpush.bf16.msra.mxu2 %v5813_v37  ;;  %v8554_v16 = vld [vmem:[#allocation6 + $0xc4] sm:$0xf0]  ;;  %v5973_v17 = vor.u32 %v8537_v9, %v5970_v10  ;;  %v8536_v18 = vld [vmem:[#allocation6 + $0x34] sm:$0xf0]  ;;  %v8553_v19 = vld [vmem:[#allocation6 + $0xc4] sm:$0xf] }
  0x46   : > { %627 = vmatpush.bf16.msra.mxu3 %v5877_v38  ;;  %v6034_v20 = vld [vmem:[#allocation6 + $0xc8] sm:$0xf0]  ;;  %v8535_v21 = vld [vmem:[#allocation6 + $0x34] sm:$0xf]  ;;  %v5962_v22 = vld [vmem:[#allocation6 + $0x38] sm:$0xf0]  ;;  %v6033_v23 = vor.u32 %v8554_v16, %v6032_v15  ;;  %v5961_v24 = vor.u32 %v8536_v18, %v5960_v14 }
  0x47   : > { %589 = vmatmul.bf16.vlgmr.msra.gmra.mxu0 %v417_v43  ;;  %v6037_v25 = vor.u32 %v8553_v19, %v6034_v20  ;;  %v5965_v26 = vor.u32 %v8535_v21, %v5962_v22  ;;  %v5952_v27 = vld [vmem:[#allocation6 + $0x20] sm:$0xf]  ;;  %v8534_v28 = vld [vmem:[#allocation6 + $0x24] sm:$0xf0]  ;;  %v8533_v29 = vld [vmem:[#allocation6 + $0x24] sm:$0xf] }
  0x48   : > { %837 = vmatpush.bf16.msrb.mxu0 %v5993_v39  ;;  %602 = vmatmul.bf16.vlgmr.msra.gmra.mxu1 %v418_v48  ;;  %v5953_v30 = vor.u32 %v8534_v28, %v5952_v27  ;;  %v5954_v31 = vld [vmem:[#allocation6 + $0x28] sm:$0xf0]  ;;  %v6024_v33 = vld [vmem:[#allocation6 + $0xb0] sm:$0xf]  ;;  %v8552_v34 = vld [vmem:[#allocation6 + $0xb4] sm:$0xf0] }
  0x49   : > { %863 = vmatpush.bf16.msrb.mxu2 %v5997_v44  ;;  %628 = vmatmul.bf16.vlgmr.msra.gmra.mxu3 %v418_v48  ;;  %v5957_v32 = vor.u32 %v8533_v29, %v5954_v31  ;;  %v8551_v35 = vld [vmem:[#allocation6 + $0xb4] sm:$0xf]  ;;  %v6025_v36 = vor.u32 %v8552_v34, %v6024_v33  ;;  %v6026_v37 = vld [vmem:[#allocation6 + $0xb8] sm:$0xf0]  ;;  %v5944_v39 = vld [vmem:[#allocation6 + $0x10] sm:$0xf] }
  0x4a   : > { %615 = vmatmul.bf16.vlgmr.msra.gmra.mxu2 %v417_v43  ;;  %850 = vmatpush.bf16.msrb.mxu1 %v6057_v51  ;;  %v6029_v38 = vor.u32 %v8551_v35, %v6026_v37  ;;  %v8532_v40 = vld [vmem:[#allocation6 + $0x14] sm:$0xf0]  ;;  %v8531_v41 = vld [vmem:[#allocation6 + $0x14] sm:$0xf]  ;;  %v5946_v43 = vld [vmem:[#allocation6 + $0x18] sm:$0xf0] }
  0x4b   : > { %876 = vmatpush.bf16.msrb.mxu3 %v6061_v53  ;;  %v5945_v42 = vor.u32 %v8532_v40, %v5944_v39  ;;  %v5949_v44 = vor.u32 %v8531_v41, %v5946_v43  ;;  %v6016_v45 = vld [vmem:[#allocation6 + $0xa0] sm:$0xf]  ;;  %v8550_v46 = vld [vmem:[#allocation6 + $0xa4] sm:$0xf0]  ;;  %v8549_v47 = vld [vmem:[#allocation6 + $0xa4] sm:$0xf] }
  0x4c   : > { %838 = vmatpush.bf16.msrb.mxu0 %v5985_v52  ;;  %v6017_v48 = vor.u32 %v8550_v46, %v6016_v45  ;;  %v6018_v49 = vld [vmem:[#allocation6 + $0xa8] sm:$0xf0]  ;;  %v5936_v51 = vld [vmem:[#allocation6] sm:$0xf]  ;;  %v8530_v52 = vld [vmem:[#allocation6 + $0x4] sm:$0xf0] }
  0x4d   : > { %864 = vmatpush.bf16.msrb.mxu2 %v5989_v57  ;;  %v6021_v50 = vor.u32 %v8549_v47, %v6018_v49  ;;  %v5937_v53 = vor.u32 %v8530_v52, %v5936_v51  ;;  %v8529_v54 = vld [vmem:[#allocation6 + $0x4] sm:$0xf]  ;;  %v5938_v55 = vld [vmem:[#allocation6 + $0x8] sm:$0xf0]  ;;  %v6008_v57 = vld [vmem:[#allocation6 + $0x90] sm:$0xf] }
  0x4e   : > { %851 = vmatpush.bf16.msrb.mxu1 %v6049_v63  ;;  %v5941_v56 = vor.u32 %v8529_v54, %v5938_v55  ;;  %v8548_v58 = vld [vmem:[#allocation6 + $0x94] sm:$0xf0]  ;;  %v8547_v59 = vld [vmem:[#allocation6 + $0x94] sm:$0xf]  ;;  %v6010_v61 = vld [vmem:[#allocation6 + $0x98] sm:$0xf0] }
  0x4f   : > { %877 = vmatpush.bf16.msrb.mxu3 %v6053_v1  ;;  %v6009_v60 = vor.u32 %v8548_v58, %v6008_v57  ;;  %v6013_v62 = vor.u32 %v8547_v59, %v6010_v61  ;;  %v6000_v63 = vld [vmem:[#allocation6 + $0x80] sm:$0xf]  ;;  %v8545_v1 = vld [vmem:[#allocation6 + $0x84] sm:$0xf]  ;;  %v6002_v3 = vld [vmem:[#allocation6 + $0x88] sm:$0xf0] }
  0x50   : > { %839 = vmatpush.bf16.msrb.mxu0 %v5977_v0  ;;  %v8546_v0 = vld [vmem:[#allocation6 + $0x84] sm:$0xf0]  ;;  %v6005_v4 = vor.u32 %v8545_v1, %v6002_v3  ;;  %v8576_v6 = vld [vmem:[#allocation6 + $0x174] sm:$0xf0]  ;;  %v8575_v7 = vld [vmem:[#allocation6 + $0x174] sm:$0xf] }
  0x51   : > { %865 = vmatpush.bf16.msrb.mxu2 %v5981_v5  ;;  %v6001_v2 = vor.u32 %v8546_v0, %v6000_v63  ;;  %v6120_v5 = vld [vmem:[#allocation6 + $0x170] sm:$0xf]  ;;  %v6122_v9 = vld [vmem:[#allocation6 + $0x178] sm:$0xf0]  ;;  %v6112_v10 = vld [vmem:[#allocation6 + $0x160] sm:$0xf] }
  0x52   : > { %852 = vmatpush.bf16.msrb.mxu1 %v6041_v11  ;;  %v6121_v8 = vor.u32 %v8576_v6, %v6120_v5  ;;  %v8574_v11 = vld [vmem:[#allocation6 + $0x164] sm:$0xf0]  ;;  %v6114_v14 = vld [vmem:[#allocation6 + $0x168] sm:$0xf0]  ;;  %v6184_v15 = vld [vmem:[#allocation6 + $0x1f0] sm:$0xf] }
  0x53   : > { %878 = vmatpush.bf16.msrb.mxu3 %v6045_v13  ;;  %v8573_v13 = vld [vmem:[#allocation6 + $0x164] sm:$0xf]  ;;  %v6113_v16 = vor.u32 %v8574_v11, %v6112_v10  ;;  %v8591_v18 = vld [vmem:[#allocation6 + $0x1f4] sm:$0xf]  ;;  %v6186_v19 = vld [vmem:[#allocation6 + $0x1f8] sm:$0xf0] }
  0x54   : > { %840 = vmatpush.bf16.msrb.mxu0 %v5969_v12  ;;  %v6125_v12 = vor.u32 %v8575_v7, %v6122_v9  ;;  %v6117_v20 = vor.u32 %v8573_v13, %v6114_v14  ;;  %v6189_v22 = vor.u32 %v8591_v18, %v6186_v19  ;;  %v6176_v27 = vld [vmem:[#allocation6 + $0x1e0] sm:$0xf]  ;;  %v8590_v28 = vld [vmem:[#allocation6 + $0x1e4] sm:$0xf0]  ;;  %v6178_v31 = vld [vmem:[#allocation6 + $0x1e8] sm:$0xf0] }
  0x55   : > { %866 = vmatpush.bf16.msrb.mxu2 %v5973_v17  ;;  %v8592_v17 = vld [vmem:[#allocation6 + $0x1f4] sm:$0xf0]  ;;  %v6177_v29 = vor.u32 %v8590_v28, %v6176_v27  ;;  %v6096_v35 = vld [vmem:[#allocation6 + $0x140] sm:$0xf]  ;;  %v8587_v40 = vld [vmem:[#allocation6 + $0x1d4] sm:$0xf] }
  0x56   : > { %853 = vmatpush.bf16.msrb.mxu1 %v6033_v23  ;;  %v6185_v21 = vor.u32 %v8592_v17, %v6184_v15  ;;  %v6104_v23 = vld [vmem:[#allocation6 + $0x150] sm:$0xf]  ;;  %v8588_v39 = vld [vmem:[#allocation6 + $0x1d4] sm:$0xf0]  ;;  %v8569_v41 = vld [vmem:[#allocation6 + $0x144] sm:$0xf] }
  0x57   : > { %879 = vmatpush.bf16.msrb.mxu3 %v6037_v25  ;;  %v8571_v25 = vld [vmem:[#allocation6 + $0x154] sm:$0xf]  ;;  %v6170_v43 = vld [vmem:[#allocation6 + $0x1d8] sm:$0xf0]  ;;  %v8568_v5 = vld [vmem:[#allocation6 + $0x134] sm:$0xf0] }
  0x58   : > { %841 = vmatpush.bf16.msrb.mxu0 %v5961_v24  ;;  %v8572_v24 = vld [vmem:[#allocation6 + $0x154] sm:$0xf0]  ;;  %v6173_v45 = vor.u32 %v8587_v40, %v6170_v43  ;;  %v8567_v6 = vld [vmem:[#allocation6 + $0x134] sm:$0xf]  ;;  %v6160_v10 = vld [vmem:[#allocation6 + $0x1c0] sm:$0xf] }
  0x59   : > { %867 = vmatpush.bf16.msrb.mxu2 %v5965_v26  ;;  %v6106_v26 = vld [vmem:[#allocation6 + $0x158] sm:$0xf0]  ;;  %v6105_v33 = vor.u32 %v8572_v24, %v6104_v23  ;;  %v8586_v11 = vld [vmem:[#allocation6 + $0x1c4] sm:$0xf0]  ;;  %v6162_v14 = vld [vmem:[#allocation6 + $0x1c8] sm:$0xf0] }
  0x5a   : > { %854 = vmatpush.bf16.msrb.mxu1 %v6025_v36  ;;  %v8570_v36 = vld [vmem:[#allocation6 + $0x144] sm:$0xf0]  ;;  %v6109_v37 = vor.u32 %v8571_v25, %v6106_v26  ;;  %v6161_v13 = vor.u32 %v8586_v11, %v6160_v10  ;;  %v6080_v15 = vld [vmem:[#allocation6 + $0x120] sm:$0xf]  ;;  %v8565_v19 = vld [vmem:[#allocation6 + $0x124] sm:$0xf] }
  0x5b   : > { %880 = vmatpush.bf16.msrb.mxu3 %v6029_v38  ;;  %v6168_v38 = vld [vmem:[#allocation6 + $0x1d0] sm:$0xf]  ;;  %v6097_v47 = vor.u32 %v8570_v36, %v6096_v35  ;;  %v8584_v23 = vld [vmem:[#allocation6 + $0x1b4] sm:$0xf0]  ;;  %v8583_v24 = vld [vmem:[#allocation6 + $0x1b4] sm:$0xf] }
  0x5c   : > { %842 = vmatpush.bf16.msrb.mxu0 %v5953_v30  ;;  %v8589_v30 = vld [vmem:[#allocation6 + $0x1e4] sm:$0xf]  ;;  %v6154_v26 = vld [vmem:[#allocation6 + $0x1b8] sm:$0xf0]  ;;  %v6072_v28 = vld [vmem:[#allocation6 + $0x110] sm:$0xf] }
  0x5d   : > { %868 = vmatpush.bf16.msrb.mxu2 %v5957_v32  ;;  %v408_v32 = vld [vmem:[#allocation4] sm:$0x3]  ;;  %v6181_v34 = vor.u32 %v8589_v30, %v6178_v31  ;;  %v6157_v27 = vor.u32 %v8583_v24, %v6154_v26  ;;  %v8563_v30 = vld [vmem:[#allocation6 + $0x114] sm:$0xf]  ;;  %v8582_v35 = vld [vmem:[#allocation6 + $0x1a4] sm:$0xf0] }
  0x5e   : > { %855 = vmatpush.bf16.msrb.mxu1 %v6017_v48  ;;  %v410_v46 = vperm.slane %v408_v32, 0  ;;  %v6064_v40 = vld [vmem:[#allocation6 + $0x100] sm:$0xf]  ;;  %v6256_v24 = vld [vmem:[#allocation9 + $0x480] sm:$0xf] }
  0x5f   : > { %881 = vmatpush.bf16.msrb.mxu3 %v6021_v50 }
  0x60   : > { %843 = vmatpush.bf16.msrb.mxu0 %v5945_v42  ;;  %v6098_v42 = vld [vmem:[#allocation6 + $0x148] sm:$0xf0] }
  0x61   : > { %869 = vmatpush.bf16.msrb.mxu2 %v5949_v44  ;;  %v6169_v44 = vor.u32 %v8588_v39, %v6168_v38  ;;  %v6101_v48 = vor.u32 %v8569_v41, %v6098_v42  ;;  %v6146_v38 = vld [vmem:[#allocation6 + $0x1a8] sm:$0xf0]  ;;  %v8562_v41 = vld [vmem:[#allocation6 + $0x104] sm:$0xf0]  ;;  %v8561_v42 = vld [vmem:[#allocation6 + $0x104] sm:$0xf] }
  0x62   : > { %856 = vmatpush.bf16.msrb.mxu1 %v6009_v60  ;;  %v6065_v43 = vor.u32 %v8562_v41, %v6064_v40  ;;  %v6386_v40 = vld [vmem:[#allocation9 + $0xe10] sm:$0xf0] }
  0x63   : > { %882 = vmatpush.bf16.msrb.mxu3 %v6013_v62 }
  0x64   : > { %844 = vmatpush.bf16.msrb.mxu0 %v5937_v53  ;;  %v411_v53 = vperm.slane %v408_v32, 1  ;;  %v6074_v32 = vld [vmem:[#allocation6 + $0x118] sm:$0xf0] }
  0x65   : > { %870 = vmatpush.bf16.msrb.mxu2 %v5941_v56 }
  0x66   : > { %857 = vmatpush.bf16.msrb.mxu1 %v6001_v2 }
  0x67   : > { %883 = vmatpush.bf16.msrb.mxu3 %v6005_v4  ;;  %v6088_v4 = vld [vmem:[#allocation6 + $0x130] sm:$0xf] }
  0x68   : > { %1095 = vmatpush.bf16.msra.mxu0 %v6121_v8  ;;  %v6089_v7 = vor.u32 %v8568_v5, %v6088_v4  ;;  %v6090_v8 = vld [vmem:[#allocation6 + $0x138] sm:$0xf0]  ;;  %v6432_v4 = vld [vmem:[#allocation9 + $0x10e0] sm:$0xf] }
  0x69   : > { %1121 = vmatpush.bf16.msra.mxu2 %v6125_v12  ;;  %v6093_v9 = vor.u32 %v8567_v6, %v6090_v8  ;;  %v8585_v12 = vld [vmem:[#allocation6 + $0x1c4] sm:$0xf]  ;;  %v8655_v6 = vld [vmem:[#allocation9 + $0x116c] sm:$0xf0]  ;;  %v6434_v8 = vld [vmem:[#allocation9 + $0x1170] sm:$0xf0] }
  0x6a   : > { %1108 = vmatpush.bf16.msra.mxu1 %v6185_v21  ;;  %v6165_v17 = vor.u32 %v8585_v12, %v6162_v14  ;;  %v6433_v10 = vor.u32 %v8655_v6, %v6432_v4  ;;  %v6272_v12 = vld [vmem:[#allocation9 + $0x5a0] sm:$0xf]  ;;  %v8613_v14 = vld [vmem:[#allocation9 + $0x5a4] sm:$0xf] }
  0x6b   : > { %1134 = vmatpush.bf16.msra.mxu3 %v6189_v22  ;;  %v6152_v22 = vld [vmem:[#allocation6 + $0x1b0] sm:$0xf]  ;;  %v6208_v4 = vld [vmem:[#allocation9 + $0x120] sm:$0xf]  ;;  %v8597_v6 = vld [vmem:[#allocation9 + $0x124] sm:$0xf] }
  0x6c   : > { %1096 = vmatpush.bf16.msra.mxu0 %v6113_v16  ;;  %v8566_v16 = vld [vmem:[#allocation6 + $0x124] sm:$0xf0]  ;;  %v6153_v25 = vor.u32 %v8584_v23, %v6152_v22 }
  0x6d   : > { %1122 = vmatpush.bf16.msra.mxu2 %v6117_v20  ;;  %v6081_v18 = vor.u32 %v8566_v16, %v6080_v15  ;;  %v6082_v20 = vld [vmem:[#allocation6 + $0x128] sm:$0xf0]  ;;  %v6274_v15 = vld [vmem:[#allocation9 + $0x630] sm:$0xf0]  ;;  %v6416_v16 = vld [vmem:[#allocation9 + $0xfc0] sm:$0xf] }
  0x6e   : > { %1109 = vmatpush.bf16.msra.mxu1 %v6177_v29  ;;  %v6085_v21 = vor.u32 %v8565_v19, %v6082_v20  ;;  %v8564_v29 = vld [vmem:[#allocation6 + $0x114] sm:$0xf0]  ;;  %v8649_v19 = vld [vmem:[#allocation9 + $0xfc4] sm:$0xf]  ;;  %v6277_v26 = vor.u32 %v8613_v14, %v6274_v15 }
  0x6f   : > { %1135 = vmatpush.bf16.msra.mxu3 %v6181_v34  ;;  %v6073_v31 = vor.u32 %v8564_v29, %v6072_v28  ;;  %v6144_v34 = vld [vmem:[#allocation6 + $0x1a0] sm:$0xf]  ;;  %v6418_v20 = vld [vmem:[#allocation9 + $0x1050] sm:$0xf0]  ;;  %v8647_v28 = vld [vmem:[#allocation9 + $0xf2c] sm:$0xf0] }
  0x70   : > { %1097 = vmatpush.bf16.msra.mxu0 %v6105_v33  ;;  %v6077_v33 = vor.u32 %v8563_v30, %v6074_v32  ;;  %v6145_v36 = vor.u32 %v8582_v35, %v6144_v34  ;;  %v6421_v23 = vor.u32 %v8649_v19, %v6418_v20  ;;  %v8645_v29 = vld [vmem:[#allocation9 + $0xea4] sm:$0xf]  ;;  %v6402_v32 = vld [vmem:[#allocation9 + $0xf30] sm:$0xf0]  ;;  %v6192_v19 = vld [vmem:[#allocation9] sm:$0xf] }
  0x71   : > { %1123 = vmatpush.bf16.msra.mxu2 %v6109_v37  ;;  %v8581_v37 = vld [vmem:[#allocation6 + $0x1a4] sm:$0xf]  ;;  %v8609_v30 = vld [vmem:[#allocation9 + $0x484] sm:$0xf]  ;;  %v6405_v35 = vor.u32 %v8645_v29, %v6402_v32 }
  0x72   : > { %1110 = vmatpush.bf16.msra.mxu1 %v6169_v44  ;;  %v6149_v39 = vor.u32 %v8581_v37, %v6146_v38  ;;  %v6066_v44 = vld [vmem:[#allocation6 + $0x108] sm:$0xf0]  ;;  %v8643_v38 = vld [vmem:[#allocation9 + $0xe0c] sm:$0xf0]  ;;  %v8593_v29 = vld [vmem:[#allocation9 + $0x4] sm:$0xf] }
  0x73   : > { %1136 = vmatpush.bf16.msra.mxu3 %v6173_v45  ;;  %v6069_v45 = vor.u32 %v8561_v42, %v6066_v44  ;;  %v8607_v44 = vld [vmem:[#allocation9 + $0x3ec] sm:$0xf0] }
  0x74   : > { %1098 = vmatpush.bf16.msra.mxu0 %v6097_v47  ;;  %v8580_v47 = vld [vmem:[#allocation6 + $0x194] sm:$0xf0] }
  0x75   : > { %1124 = vmatpush.bf16.msra.mxu2 %v6101_v48  ;;  %v8579_v48 = vld [vmem:[#allocation6 + $0x194] sm:$0xf] }
  0x76   : > { %1111 = vmatpush.bf16.msra.mxu1 %v6161_v13  ;;  %v8615_v13 = vld [vmem:[#allocation9 + $0x62c] sm:$0xf0] }
  0x77   : > { %1137 = vmatpush.bf16.msra.mxu3 %v6165_v17  ;;  %v8651_v17 = vld [vmem:[#allocation9 + $0x104c] sm:$0xf0]  ;;  %v6273_v22 = vor.u32 %v8615_v13, %v6272_v12  ;;  %v8633_v12 = vld [vmem:[#allocation9 + $0xb44] sm:$0xf]  ;;  %v6354_v13 = vld [vmem:[#allocation9 + $0xbd0] sm:$0xf0] }
  0x78   : > { %1099 = vmatpush.bf16.msra.mxu0 %v6089_v7  ;;  %v8653_v7 = vld [vmem:[#allocation9 + $0x10e4] sm:$0xf] }
  0x79   : > { %1125 = vmatpush.bf16.msra.mxu2 %v6093_v9  ;;  %v6437_v11 = vor.u32 %v8653_v7, %v6434_v8 }
  0x7a   : > { %1112 = vmatpush.bf16.msra.mxu1 %v6153_v25  ;;  %v8611_v25 = vld [vmem:[#allocation9 + $0x50c] sm:$0xf0] }
  0x7b   : > { %1138 = vmatpush.bf16.msra.mxu3 %v6157_v27  ;;  %v6400_v27 = vld [vmem:[#allocation9 + $0xea0] sm:$0xf]  ;;  %v6257_v37 = vor.u32 %v8611_v25, %v6256_v24  ;;  %v6357_v24 = vor.u32 %v8633_v12, %v6354_v13  ;;  %v8595_v25 = vld [vmem:[#allocation9 + $0x8c] sm:$0xf0]  ;;  %v6264_v12 = vld [vmem:[#allocation9 + $0x488] sm:$0xf] }
  0x7c   : > { %1100 = vmatpush.bf16.msra.mxu0 %v6081_v18  ;;  %v6417_v18 = vor.u32 %v8651_v17, %v6416_v16  ;;  %v6401_v34 = vor.u32 %v8647_v28, %v6400_v27  ;;  %v8631_v27 = vld [vmem:[#allocation9 + $0xaac] sm:$0xf0]  ;;  %v8612_v13 = vld [vmem:[#allocation9 + $0x514] sm:$0xf0] }
  0x7d   : > { %1126 = vmatpush.bf16.msra.mxu2 %v6085_v21  ;;  %v9582_v21 = vld [vmem:[#allocation7] sm:$0x3] }
  0x7e   : > { %1113 = vmatpush.bf16.msra.mxu1 %v6145_v36  ;;  %v6384_v36 = vld [vmem:[#allocation9 + $0xd80] sm:$0xf]  ;;  %v673_v41 = vperm.slane %v9582_v21, 0 }
  0x7f   : > { %1139 = vmatpush.bf16.msra.mxu3 %v6149_v39  ;;  %v8641_v39 = vld [vmem:[#allocation9 + $0xd84] sm:$0xf] }
  0x80   : > { %1101 = vmatpush.bf16.msra.mxu0 %v6073_v31  ;;  %v6258_v31 = vld [vmem:[#allocation9 + $0x510] sm:$0xf0] }
  0x81   : > { %1127 = vmatpush.bf16.msra.mxu2 %v6077_v33  ;;  %v6261_v42 = vor.u32 %v8609_v30, %v6258_v31  ;;  %v6194_v30 = vld [vmem:[#allocation9 + $0x90] sm:$0xf0]  ;;  %v6312_v31 = vld [vmem:[#allocation9 + $0x7e8] sm:$0xf] }
  0x84   : > { %1102 = vmatpush.bf16.msra.mxu0 %v6065_v43  ;;  %v6240_v43 = vld [vmem:[#allocation9 + $0x360] sm:$0xf] }
  0x85   : > { %1128 = vmatpush.bf16.msra.mxu2 %v6069_v45  ;;  %v8605_v45 = vld [vmem:[#allocation9 + $0x364] sm:$0xf] }
  0xc4   : > { %v590_v49 = vpop.f32.mrf.mxu0 }
  0xc5   : > { %v591_v50 = vadd.f32 %v590_v49, %v410_v46  ;;  %v603_v51 = vpop.f32.mrf.mxu1  ;;  %v6136_v46 = vld [vmem:[#allocation6 + $0x190] sm:$0xf] }
  0xc6   : > { %v6137_v49 = vor.u32 %v8580_v47, %v6136_v46  ;;  %v6242_v46 = vld [vmem:[#allocation9 + $0x3f0] sm:$0xf0]  ;;  %v6385_v47 = vor.u32 %v8643_v38, %v6384_v36  ;;  %v6314_v36 = vld [vmem:[#allocation9 + $0x878] sm:$0xf0]  ;;  %v8629_v38 = vld [vmem:[#allocation9 + $0xa24] sm:$0xf] }
  0xc7   : > { %v604_v52 = vadd.f32 %v603_v51, %v591_v50  ;;  %v6138_v50 = vld [vmem:[#allocation6 + $0x198] sm:$0xf0] }
  0xc8   : > { %v6141_v51 = vor.u32 %v8579_v48, %v6138_v50  ;;  %1114 = vmatpush.bf16.msra.mxu1 %v6137_v49  ;;  %v6389_v48 = vor.u32 %v8641_v39, %v6386_v40  ;;  %v6368_v49 = vld [vmem:[#allocation9 + $0xc60] sm:$0xf]  ;;  %v6241_v50 = vor.u32 %v8607_v44, %v6240_v43  ;;  %v6338_v39 = vld [vmem:[#allocation9 + $0xab0] sm:$0xf0]  ;;  %v6197_v43 = vor.u32 %v8593_v29, %v6194_v30  ;;  %v6250_v29 = vld [vmem:[#allocation9 + $0x3f8] sm:$0xf0] }
  0xc9   : > { %v633_v54 = vmul.f32 0.2, %v604_v52  ;;  %v6392_v30 = vld [vmem:[#allocation9 + $0xd88] sm:$0xf] }
  0xca   : > { %1140 = vmatpush.bf16.msra.mxu3 %v6141_v51  ;;  %v8639_v51 = vld [vmem:[#allocation9 + $0xcec] sm:$0xf0] }
  0xcb   : > { %v635_v55 = vmax.f32 %v604_v52, %v633_v54  ;;  %v6128_v52 = vld [vmem:[#allocation6 + $0x180] sm:$0xf]  ;;  %v8577_v54 = vld [vmem:[#allocation6 + $0x184] sm:$0xf] }
  0xcc   : > { %v629_v58 = vpop.f32.mrf.mxu3  ;;  %v592_v59 = vpop.f32.mrf.mxu0 }
  0xcd   : > { %v616_v56 = vpop.f32.mrf.mxu2  ;;  %v637_v60 = vpack.c.bf16 %v635_v55, %v635_v55  ;;  %v605_v61 = vpop.f32.mrf.mxu1  ;;  %v8623_v59 = vld [vmem:[#allocation9 + $0x86c] sm:$0xf0] }
  0xce   : > { %v617_v57 = vadd.f32 %v616_v56, %v411_v53  ;;  %v8578_v53 = vld [vmem:[#allocation6 + $0x184] sm:$0xf0]  ;;  %v6130_v56 = vld [vmem:[#allocation6 + $0x188] sm:$0xf0] }
  0xcf   : > { %845 = vmatmul.bf16.vlgmr.msrb.gmra.mxu0 %v637_v60  ;;  %871 = vmatmul.bf16.vlgmr.msrb.gmra.mxu2 %v637_v60  ;;  %v6129_v55 = vor.u32 %v8578_v53, %v6128_v52  ;;  %v8621_v60 = vld [vmem:[#allocation9 + $0x7e4] sm:$0xf]  ;;  %v6370_v53 = vld [vmem:[#allocation9 + $0xcf0] sm:$0xf0] }
  0xd0   : > { %v630_v62 = vadd.f32 %v629_v58, %v617_v57  ;;  %v6133_v57 = vor.u32 %v8577_v54, %v6130_v56  ;;  %v6304_v58 = vld [vmem:[#allocation9 + $0x7e0] sm:$0xf]  ;;  %v8637_v52 = vld [vmem:[#allocation9 + $0xc64] sm:$0xf]  ;;  %v6245_v56 = vor.u32 %v8605_v45, %v6242_v46  ;;  %v6440_v45 = vld [vmem:[#allocation9 + $0x10e8] sm:$0xf] }
  0xd1   : > { %1115 = vmatpush.bf16.msra.mxu1 %v6129_v55  ;;  %v6305_v61 = vor.u32 %v8623_v59, %v6304_v58  ;;  %v8603_v58 = vld [vmem:[#allocation9 + $0x2cc] sm:$0xf0]  ;;  %v8656_v46 = vld [vmem:[#allocation9 + $0x1174] sm:$0xf0] }
  0xd2   : > { %v634_v63 = vmul.f32 0.2, %v630_v62  ;;  %1141 = vmatpush.bf16.msra.mxu3 %v6133_v57  ;;  %v6224_v57 = vld [vmem:[#allocation9 + $0x240] sm:$0xf] }
  0xd3   : > { %1547 = vmatpush.bf16.msrb.mxu0 %v6305_v61  ;;  %v6226_v61 = vld [vmem:[#allocation9 + $0x2d0] sm:$0xf0] }
  0xd4   : > { %v636_v0 = vmax.f32 %v630_v62, %v634_v63  ;;  %v631_v3 = vpop.f32.mrf.mxu3  ;;  %v6306_v62 = vld [vmem:[#allocation9 + $0x870] sm:$0xf0]  ;;  %v6288_v63 = vld [vmem:[#allocation9 + $0x6c0] sm:$0xf] }
  0xd5   : > { %v618_v1 = vpop.f32.mrf.mxu2  ;;  %v6290_v3 = vld [vmem:[#allocation9 + $0x750] sm:$0xf0] }
  0xd6   : > { %v638_v2 = vpack.c.bf16 %v636_v0, %v636_v0  ;;  %v8619_v0 = vld [vmem:[#allocation9 + $0x74c] sm:$0xf0]  ;;  %v6309_v1 = vor.u32 %v8621_v60, %v6306_v62  ;;  %v8601_v60 = vld [vmem:[#allocation9 + $0x244] sm:$0xf] }
  0xd7   : > { %v6289_v5 = vor.u32 %v8619_v0, %v6288_v63  ;;  %v674_v63 = vperm.slane %v9582_v21, 1  ;;  %v6229_v8 = vor.u32 %v8601_v60, %v6226_v61  ;;  %v6442_v60 = vld [vmem:[#allocation9 + $0x1178] sm:$0xf0] }
  0xd8   : > { %858 = vmatmul.bf16.vlgmr.msrb.gmra.mxu1 %v638_v2  ;;  %884 = vmatmul.bf16.vlgmr.msrb.gmra.mxu3 %v638_v2  ;;  %v8617_v2 = vld [vmem:[#allocation9 + $0x6c4] sm:$0xf] }
  0xd9   : > { %1573 = vmatpush.bf16.msrb.mxu2 %v6309_v1  ;;  %v6293_v9 = vor.u32 %v8617_v2, %v6290_v3  ;;  %1560 = vmatpush.bf16.msrb.mxu1 %v6433_v10  ;;  %v6369_v1 = vor.u32 %v8639_v51, %v6368_v49  ;;  %v6373_v2 = vor.u32 %v8637_v52, %v6370_v53  ;;  %v8635_v10 = vld [vmem:[#allocation9 + $0xbcc] sm:$0xf0]  ;;  %v8620_v51 = vld [vmem:[#allocation9 + $0x754] sm:$0xf0]  ;;  %v8618_v52 = vld [vmem:[#allocation9 + $0x6cc] sm:$0xf] }
  0xda   : > { %1586 = vmatpush.bf16.msrb.mxu3 %v6437_v11  ;;  %1548 = vmatpush.bf16.msrb.mxu0 %v6289_v5  ;;  %v6225_v3 = vor.u32 %v8603_v58, %v6224_v57  ;;  %v8599_v5 = vld [vmem:[#allocation9 + $0x1ac] sm:$0xf0]  ;;  %v6210_v11 = vld [vmem:[#allocation9 + $0x1b0] sm:$0xf0]  ;;  %v6341_v49 = vor.u32 %v8629_v38, %v6338_v39  ;;  %v6441_v58 = vor.u32 %v8656_v46, %v6440_v45  ;;  %v8604_v38 = vld [vmem:[#allocation9 + $0x2d4] sm:$0xf0] }
  0xdb   : > { %v6209_v17 = vor.u32 %v8599_v5, %v6208_v4  ;;  %v6322_v57 = vld [vmem:[#allocation9 + $0x990] sm:$0xf0]  ;;  %v8614_v5 = vld [vmem:[#allocation9 + $0x5ac] sm:$0xf] }
  0xdc   : > { %v8602_v39 = vld [vmem:[#allocation9 + $0x24c] sm:$0xf] }
  0xdd   : > { %1574 = vmatpush.bf16.msrb.mxu2 %v6293_v9  ;;  %1561 = vmatpush.bf16.msrb.mxu1 %v6417_v18  ;;  %v6352_v9 = vld [vmem:[#allocation9 + $0xb40] sm:$0xf]  ;;  %v8638_v46 = vld [vmem:[#allocation9 + $0xc6c] sm:$0xf] }
  0xde   : > { %1587 = vmatpush.bf16.msrb.mxu3 %v6421_v23  ;;  %1549 = vmatpush.bf16.msrb.mxu0 %v6273_v22  ;;  %v6353_v18 = vor.u32 %v8635_v10, %v6352_v9  ;;  %v6213_v23 = vor.u32 %v8597_v6, %v6210_v11  ;;  %v6282_v6 = vld [vmem:[#allocation9 + $0x638] sm:$0xf0] }
  0xdf   : > { %v6426_v9 = vld [vmem:[#allocation9 + $0x1058] sm:$0xf0]  ;;  %v6285_v11 = vor.u32 %v8614_v5, %v6282_v6  ;;  %v8630_v5 = vld [vmem:[#allocation9 + $0xa2c] sm:$0xf] }
  0xe0   : > { %v6346_v6 = vld [vmem:[#allocation9 + $0xab8] sm:$0xf0] }
  0xe1   : > { %1575 = vmatpush.bf16.msrb.mxu2 %v6277_v26  ;;  %1562 = vmatpush.bf16.msrb.mxu1 %v6401_v34  ;;  %v6336_v26 = vld [vmem:[#allocation9 + $0xa20] sm:$0xf]  ;;  %v8622_v34 = vld [vmem:[#allocation9 + $0x7ec] sm:$0xf] }
  0xe2   : > { %1588 = vmatpush.bf16.msrb.mxu3 %v6405_v35  ;;  %1550 = vmatpush.bf16.msrb.mxu0 %v6257_v37  ;;  %v6193_v35 = vor.u32 %v8595_v25, %v6192_v19  ;;  %v6337_v37 = vor.u32 %v8631_v27, %v6336_v26  ;;  %v6408_v19 = vld [vmem:[#allocation9 + $0xea8] sm:$0xf]  ;;  %v8608_v26 = vld [vmem:[#allocation9 + $0x3f4] sm:$0xf0]  ;;  %v8606_v27 = vld [vmem:[#allocation9 + $0x36c] sm:$0xf] }
  0xe3   : > { %v6248_v25 = vld [vmem:[#allocation9 + $0x368] sm:$0xf] }
  0xe5   : > { %1576 = vmatpush.bf16.msrb.mxu2 %v6261_v42  ;;  %1563 = vmatpush.bf16.msrb.mxu1 %v6385_v47  ;;  %v8627_v42 = vld [vmem:[#allocation9 + $0x98c] sm:$0xf0] }
  0xe6   : > { %1589 = vmatpush.bf16.msrb.mxu3 %v6389_v48  ;;  %1551 = vmatpush.bf16.msrb.mxu0 %v6241_v50  ;;  %v6317_v48 = vor.u32 %v8622_v34, %v6314_v36  ;;  %v6296_v50 = vld [vmem:[#allocation9 + $0x6c8] sm:$0xf]  ;;  %v8642_v34 = vld [vmem:[#allocation9 + $0xd8c] sm:$0xf] }
  0xe7   : > { %v6297_v61 = vor.u32 %v8620_v51, %v6296_v50  ;;  %v8600_v50 = vld [vmem:[#allocation9 + $0x1b4] sm:$0xf0]  ;;  %v8598_v51 = vld [vmem:[#allocation9 + $0x12c] sm:$0xf] }
  0xe9   : > { %1577 = vmatpush.bf16.msrb.mxu2 %v6245_v56  ;;  %1564 = vmatpush.bf16.msrb.mxu1 %v6369_v1  ;;  %v8625_v56 = vld [vmem:[#allocation9 + $0x904] sm:$0xf] }
  0xea   : > { %1590 = vmatpush.bf16.msrb.mxu3 %v6373_v2  ;;  %1552 = vmatpush.bf16.msrb.mxu0 %v6225_v3  ;;  %v6325_v1 = vor.u32 %v8625_v56, %v6322_v57  ;;  %v6280_v2 = vld [vmem:[#allocation9 + $0x5a8] sm:$0xf]  ;;  %v8616_v3 = vld [vmem:[#allocation9 + $0x634] sm:$0xf0]  ;;  %v8634_v57 = vld [vmem:[#allocation9 + $0xb4c] sm:$0xf] }
  0xeb   : > { %v6281_v10 = vor.u32 %v8616_v3, %v6280_v2  ;;  %v8636_v56 = vld [vmem:[#allocation9 + $0xbd4] sm:$0xf0]  ;;  %v6344_v3 = vld [vmem:[#allocation9 + $0xa28] sm:$0xf] }
  0xed   : > { %1578 = vmatpush.bf16.msrb.mxu2 %v6229_v8  ;;  %1565 = vmatpush.bf16.msrb.mxu1 %v6353_v18  ;;  %v8650_v8 = vld [vmem:[#allocation9 + $0xfcc] sm:$0xf] }
  0xee   : > { %1553 = vmatpush.bf16.msrb.mxu0 %v6209_v17  ;;  %1591 = vmatpush.bf16.msrb.mxu3 %v6357_v24  ;;  %v6265_v17 = vor.u32 %v8612_v13, %v6264_v12  ;;  %v8626_v12 = vld [vmem:[#allocation9 + $0x90c] sm:$0xf]  ;;  %v6330_v13 = vld [vmem:[#allocation9 + $0x998] sm:$0xf0] }
  0xf1   : > { %1579 = vmatpush.bf16.msrb.mxu2 %v6213_v23  ;;  %1566 = vmatpush.bf16.msrb.mxu1 %v6337_v37  ;;  %v6410_v23 = vld [vmem:[#allocation9 + $0xf38] sm:$0xf0]  ;;  %v6232_v37 = vld [vmem:[#allocation9 + $0x248] sm:$0xf] }
  0xf2   : > { %1554 = vmatpush.bf16.msrb.mxu0 %v6193_v35  ;;  %1592 = vmatpush.bf16.msrb.mxu3 %v6341_v49  ;;  %v6394_v35 = vld [vmem:[#allocation9 + $0xe18] sm:$0xf0]  ;;  %v6216_v49 = vld [vmem:[#allocation9 + $0x128] sm:$0xf] }
  0xf3   : > { %v6397_v36 = vor.u32 %v8642_v34, %v6394_v35  ;;  %v6544_v34 = vld [vmem:[#allocation9 + $0x6d0] sm:$0xf] }
  0xf5   : > { %1580 = vmatpush.bf16.msrb.mxu2 %v6197_v43  ;;  %v6376_v43 = vld [vmem:[#allocation9 + $0xc68] sm:$0xf] }
  0xf6   : > { %1593 = vmatpush.bf16.msrb.mxu3 %v6325_v1  ;;  %v6202_v1 = vld [vmem:[#allocation9 + $0x98] sm:$0xf0] }
 0x14c   : > { %v846_v33 = vpop.f32.mrf.mxu0 }
 0x14d   : > { %v847_v54 = vadd.f32 %v846_v33, %v673_v41  ;;  %v8624_v33 = vld [vmem:[#allocation9 + $0x874] sm:$0xf0]  ;;  %v6320_v41 = vld [vmem:[#allocation9 + $0x900] sm:$0xf] }
 0x14e   : > { %v6313_v44 = vor.u32 %v8624_v33, %v6312_v31  ;;  %v8644_v31 = vld [vmem:[#allocation9 + $0xe14] sm:$0xf0] }
 0x14f   : > { %v6393_v33 = vor.u32 %v8644_v31, %v6392_v30 }
 0x152   : > { %v872_v55 = vpop.f32.mrf.mxu2 }
 0x153   : > { %v873_v15 = vadd.f32 %v872_v55, %v674_v63  ;;  %v6321_v55 = vor.u32 %v8627_v42, %v6320_v41  ;;  %v8652_v63 = vld [vmem:[#allocation9 + $0x1054] sm:$0xf0]  ;;  %v6234_v41 = vld [vmem:[#allocation9 + $0x2d8] sm:$0xf0] }
 0x154   : > { %v848_v0 = vpop.f32.mrf.mxu0  ;;  %v6237_v42 = vor.u32 %v8602_v39, %v6234_v41  ;;  %v6546_v39 = vld [vmem:[#allocation9 + $0x760] sm:$0xf0] }
 0x155   : > { %v859_v59 = vpop.f32.mrf.mxu1  ;;  %1567 = vmatpush.bf16.msrb.mxu1 %v6321_v55  ;;  %v6360_v55 = vld [vmem:[#allocation9 + $0xb48] sm:$0xf] }
 0x156   : > { %v860_v62 = vadd.f32 %v859_v59, %v847_v54  ;;  %v6298_v54 = vld [vmem:[#allocation9 + $0x758] sm:$0xf0]  ;;  %v8654_v59 = vld [vmem:[#allocation9 + $0x10ec] sm:$0xf] }
 0x157   : > { %v6301_v0 = vor.u32 %v8618_v52, %v6298_v54  ;;  %v6445_v4 = vor.u32 %v8654_v59, %v6442_v60  ;;  %v6217_v52 = vor.u32 %v8600_v50, %v6216_v49  ;;  %v6362_v59 = vld [vmem:[#allocation9 + $0xbd8] sm:$0xf0]  ;;  %v6528_v49 = vld [vmem:[#allocation9 + $0x5b0] sm:$0xf] }
 0x158   : > { %v889_v7 = vmul.f32 0.2, %v860_v62  ;;  %v6365_v60 = vor.u32 %v8634_v57, %v6362_v59  ;;  %v8713_v59 = vld [vmem:[#allocation9 + $0xfd4] sm:$0xf] }
 0x15a   : > { %v891_v14 = vmax.f32 %v860_v62, %v889_v7  ;;  %v874_v22 = vpop.f32.mrf.mxu2  ;;  %v6424_v62 = vld [vmem:[#allocation9 + $0xfc8] sm:$0xf] }
 0x15b   : > { %v885_v16 = vpop.f32.mrf.mxu3  ;;  %v6425_v7 = vor.u32 %v8652_v63, %v6424_v62  ;;  %v8596_v62 = vld [vmem:[#allocation9 + $0x94] sm:$0xf0]  ;;  %v8594_v63 = vld [vmem:[#allocation9 + $0xc] sm:$0xf] }
 0x15c   : > { %v893_v20 = vpack.c.bf16 %v891_v14, %v891_v14  ;;  %v886_v21 = vadd.f32 %v885_v16, %v873_v15  ;;  %v6429_v14 = vor.u32 %v8650_v8, %v6426_v9  ;;  %v8610_v15 = vld [vmem:[#allocation9 + $0x48c] sm:$0xf]  ;;  %v6266_v16 = vld [vmem:[#allocation9 + $0x518] sm:$0xf0]  ;;  %v6205_v2 = vor.u32 %v8594_v63, %v6202_v1  ;;  %v6328_v9 = vld [vmem:[#allocation9 + $0x908] sm:$0xf] }
 0x15d   : > { %v861_v28 = vpop.f32.mrf.mxu1  ;;  %v6269_v18 = vor.u32 %v8610_v15, %v6266_v16  ;;  %v6349_v8 = vor.u32 %v8630_v5, %v6346_v6  ;;  %v929_v15 = vld [vmem:[#allocation7 + $0x2] sm:$0x3]  ;;  %v8675_v1 = vld [vmem:[#allocation9 + $0x51c] sm:$0xf0]  ;;  %v6656_v6 = vld [vmem:[#allocation9 + $0xeb0] sm:$0xf] }
 0x15e   : > { %v890_v32 = vmul.f32 0.2, %v886_v21  ;;  %1103 = vmatmul.bf16.vlgmr.msra.gmra.mxu0 %v893_v20  ;;  %1129 = vmatmul.bf16.vlgmr.msra.gmra.mxu2 %v893_v20  ;;  %v8648_v20 = vld [vmem:[#allocation9 + $0xf34] sm:$0xf0]  ;;  %v6249_v28 = vor.u32 %v8608_v26, %v6248_v25  ;;  %v8687_v25 = vld [vmem:[#allocation9 + $0x87c] sm:$0xf0] }
 0x15f   : > { %1599 = vmatpush.bf16.msra.mxu0 %v6313_v44  ;;  %1625 = vmatpush.bf16.msra.mxu2 %v6317_v48  ;;  %v6409_v22 = vor.u32 %v8648_v20, %v6408_v19  ;;  %v8640_v44 = vld [vmem:[#allocation9 + $0xcf4] sm:$0xf0] }
 0x160   : > { %v892_v40 = vmax.f32 %v886_v21, %v890_v32  ;;  %v8646_v21 = vld [vmem:[#allocation9 + $0xeac] sm:$0xf]  ;;  %v6253_v32 = vor.u32 %v8606_v27, %v6250_v29  ;;  %v6377_v45 = vor.u32 %v8640_v44, %v6376_v43  ;;  %v8685_v27 = vld [vmem:[#allocation9 + $0x7f4] sm:$0xf]  ;;  %v8719_v43 = vld [vmem:[#allocation9 + $0x117c] sm:$0xf0] }
 0x161   : > { %v6413_v24 = vor.u32 %v8646_v21, %v6410_v23 }
 0x162   : > { %v894_v47 = vpack.c.bf16 %v892_v40, %v892_v40  ;;  %v6233_v40 = vor.u32 %v8604_v38, %v6232_v37  ;;  %v8683_v37 = vld [vmem:[#allocation9 + $0x75c] sm:$0xf0]  ;;  %v8681_v38 = vld [vmem:[#allocation9 + $0x6d4] sm:$0xf] }
 0x163   : > { %v887_v53 = vpop.f32.mrf.mxu3  ;;  %1600 = vmatpush.bf16.msra.mxu0 %v6297_v61  ;;  %1626 = vmatpush.bf16.msra.mxu2 %v6301_v0  ;;  %v6200_v61 = vld [vmem:[#allocation9 + $0x8] sm:$0xf] }
 0x164   : > { %1116 = vmatmul.bf16.vlgmr.msra.gmra.mxu1 %v894_v47  ;;  %1142 = vmatmul.bf16.vlgmr.msra.gmra.mxu3 %v894_v47  ;;  %v6378_v47 = vld [vmem:[#allocation9 + $0xcf8] sm:$0xf0]  ;;  %v6201_v0 = vor.u32 %v8596_v62, %v6200_v61 }
 0x165   : > { %1612 = vmatpush.bf16.msra.mxu1 %v6441_v58  ;;  %1638 = vmatpush.bf16.msra.mxu3 %v6445_v4  ;;  %v6381_v48 = vor.u32 %v8638_v46, %v6378_v47  ;;  %v6218_v53 = vld [vmem:[#allocation9 + $0x1b8] sm:$0xf0]  ;;  %v6361_v58 = vor.u32 %v8636_v56, %v6360_v55  ;;  %v8632_v4 = vld [vmem:[#allocation9 + $0xab4] sm:$0xf0]  ;;  %v6690_v46 = vld [vmem:[#allocation9 + $0x1180] sm:$0xf0]  ;;  %v6545_v47 = vor.u32 %v8683_v37, %v6544_v34 }
 0x166   : > { %v6221_v54 = vor.u32 %v8598_v51, %v6218_v53  ;;  %v8679_v51 = vld [vmem:[#allocation9 + $0x63c] sm:$0xf0]  ;;  %v6530_v53 = vld [vmem:[#allocation9 + $0x640] sm:$0xf0]  ;;  %v6672_v56 = vld [vmem:[#allocation9 + $0xfd0] sm:$0xf] }
 0x167   : > { %1601 = vmatpush.bf16.msra.mxu0 %v6281_v10  ;;  %1627 = vmatpush.bf16.msra.mxu2 %v6285_v11  ;;  %v8628_v10 = vld [vmem:[#allocation9 + $0x994] sm:$0xf0]  ;;  %v6529_v62 = vor.u32 %v8679_v51, %v6528_v49  ;;  %v6464_v37 = vld [vmem:[#allocation9 + $0x130] sm:$0xf]  ;;  %v8657_v51 = vld [vmem:[#allocation9 + $0x14] sm:$0xf] }
 0x168   : > { %v6329_v11 = vor.u32 %v8628_v10, %v6328_v9  ;;  %v6658_v9 = vld [vmem:[#allocation9 + $0xf40] sm:$0xf0]  ;;  %v6448_v49 = vld [vmem:[#allocation9 + $0x10] sm:$0xf] }
 0x169   : > { %1613 = vmatpush.bf16.msra.mxu1 %v6425_v7  ;;  %1639 = vmatpush.bf16.msra.mxu3 %v6429_v14  ;;  %v6345_v7 = vor.u32 %v8632_v4, %v6344_v3  ;;  %v6333_v14 = vor.u32 %v8626_v12, %v6330_v13  ;;  %v6514_v3 = vld [vmem:[#allocation9 + $0x520] sm:$0xf0]  ;;  %v6496_v12 = vld [vmem:[#allocation9 + $0x370] sm:$0xf]  ;;  %v8671_v13 = vld [vmem:[#allocation9 + $0x3fc] sm:$0xf0] }
 0x16b   : > { %1602 = vmatpush.bf16.msra.mxu0 %v6265_v17  ;;  %1628 = vmatpush.bf16.msra.mxu2 %v6269_v18  ;;  %v931_v17 = vperm.slane %v929_v15, 0 }
 0x16d   : > { %1614 = vmatpush.bf16.msra.mxu1 %v6409_v22  ;;  %1640 = vmatpush.bf16.msra.mxu3 %v6413_v24  ;;  %v932_v22 = vperm.slane %v929_v15, 1  ;;  %v6560_v24 = vld [vmem:[#allocation9 + $0x7f0] sm:$0xf]  ;;  %v6498_v15 = vld [vmem:[#allocation9 + $0x400] sm:$0xf0] }
 0x16f   : > { %1603 = vmatpush.bf16.msra.mxu0 %v6249_v28  ;;  %1629 = vmatpush.bf16.msra.mxu2 %v6253_v32  ;;  %v6562_v28 = vld [vmem:[#allocation9 + $0x880] sm:$0xf0]  ;;  %v6561_v32 = vor.u32 %v8687_v25, %v6560_v24  ;;  %v6480_v24 = vld [vmem:[#allocation9 + $0x250] sm:$0xf]  ;;  %v8667_v25 = vld [vmem:[#allocation9 + $0x2dc] sm:$0xf0] }
 0x170   : > { %v6481_v34 = vor.u32 %v8667_v25, %v6480_v24  ;;  %v8678_v24 = vld [vmem:[#allocation9 + $0x5bc] sm:$0xf]  ;;  %v6538_v25 = vld [vmem:[#allocation9 + $0x648] sm:$0xf0] }
 0x171   : > { %1615 = vmatpush.bf16.msra.mxu1 %v6393_v33  ;;  %1641 = vmatpush.bf16.msra.mxu3 %v6397_v36  ;;  %v6565_v33 = vor.u32 %v8685_v27, %v6562_v28  ;;  %v6482_v27 = vld [vmem:[#allocation9 + $0x2e0] sm:$0xf0] }
 0x173   : > { %1604 = vmatpush.bf16.msra.mxu0 %v6233_v40  ;;  %1630 = vmatpush.bf16.msra.mxu2 %v6237_v42  ;;  %v6688_v42 = vld [vmem:[#allocation9 + $0x10f0] sm:$0xf] }
 0x175   : > { %1616 = vmatpush.bf16.msra.mxu1 %v6377_v45  ;;  %1642 = vmatpush.bf16.msra.mxu3 %v6381_v48  ;;  %v8717_v45 = vld [vmem:[#allocation9 + $0x10f4] sm:$0xf]  ;;  %v6549_v48 = vor.u32 %v8681_v38, %v6546_v39  ;;  %v8663_v38 = vld [vmem:[#allocation9 + $0x1bc] sm:$0xf0] }
 0x176   : > { %v6693_v55 = vor.u32 %v8717_v45, %v6690_v46  ;;  %v8661_v39 = vld [vmem:[#allocation9 + $0x134] sm:$0xf]  ;;  %v6610_v46 = vld [vmem:[#allocation9 + $0xbe0] sm:$0xf0] }
 0x177   : > { %1605 = vmatpush.bf16.msra.mxu0 %v6217_v52  ;;  %1631 = vmatpush.bf16.msra.mxu2 %v6221_v54  ;;  %v8677_v52 = vld [vmem:[#allocation9 + $0x5b4] sm:$0xf]  ;;  %v6689_v54 = vor.u32 %v8719_v43, %v6688_v42  ;;  %v6608_v43 = vld [vmem:[#allocation9 + $0xb50] sm:$0xf] }
 0x178   : > { %v6533_v63 = vor.u32 %v8677_v52, %v6530_v53  ;;  %v8697_v45 = vld [vmem:[#allocation9 + $0xb54] sm:$0xf]  ;;  %v6450_v52 = vld [vmem:[#allocation9 + $0xa0] sm:$0xf0]  ;;  %v6568_v53 = vld [vmem:[#allocation9 + $0x7f8] sm:$0xf] }
 0x179   : > { %1617 = vmatpush.bf16.msra.mxu1 %v6361_v58  ;;  %1643 = vmatpush.bf16.msra.mxu3 %v6365_v60  ;;  %v8715_v58 = vld [vmem:[#allocation9 + $0x105c] sm:$0xf0]  ;;  %v6674_v60 = vld [vmem:[#allocation9 + $0x1060] sm:$0xf0] }
 0x17a   : > { %v6673_v4 = vor.u32 %v8715_v58, %v6672_v56  ;;  %v6677_v5 = vor.u32 %v8713_v59, %v6674_v60  ;;  %v6613_v56 = vor.u32 %v8697_v45, %v6610_v46  ;;  %v8686_v58 = vld [vmem:[#allocation9 + $0x7fc] sm:$0xf]  ;;  %v6570_v59 = vld [vmem:[#allocation9 + $0x888] sm:$0xf0]  ;;  %v6592_v60 = vld [vmem:[#allocation9 + $0xa30] sm:$0xf] }
 0x17b   : > { %1606 = vmatpush.bf16.msra.mxu0 %v6201_v0  ;;  %1632 = vmatpush.bf16.msra.mxu2 %v6205_v2  ;;  %v6512_v0 = vld [vmem:[#allocation9 + $0x490] sm:$0xf]  ;;  %v8673_v2 = vld [vmem:[#allocation9 + $0x494] sm:$0xf] }
 0x17c   : > { %v6513_v10 = vor.u32 %v8675_v1, %v6512_v0  ;;  %v6453_v1 = vor.u32 %v8657_v51, %v6450_v52 }
 0x17d   : > { %1618 = vmatpush.bf16.msra.mxu1 %v6345_v7  ;;  %1644 = vmatpush.bf16.msra.mxu3 %v6349_v8  ;;  %v8711_v7 = vld [vmem:[#allocation9 + $0xf3c] sm:$0xf0]  ;;  %v8709_v8 = vld [vmem:[#allocation9 + $0xeb4] sm:$0xf] }
 0x181   : > { %1619 = vmatpush.bf16.msra.mxu1 %v6329_v11  ;;  %1645 = vmatpush.bf16.msra.mxu3 %v6333_v14  ;;  %v6517_v11 = vor.u32 %v8673_v2, %v6514_v3  ;;  %v8669_v14 = vld [vmem:[#allocation9 + $0x374] sm:$0xf]  ;;  %v6573_v3 = vor.u32 %v8686_v58, %v6570_v59 }
 0x1db   : > { %v1104_v16 = vpop.f32.mrf.mxu0 }
 0x1dc   : > { %v1105_v18 = vadd.f32 %v1104_v16, %v931_v17  ;;  %v6657_v16 = vor.u32 %v8711_v7, %v6656_v6  ;;  %v6661_v17 = vor.u32 %v8709_v8, %v6658_v9  ;;  %v8682_v6 = vld [vmem:[#allocation9 + $0x6dc] sm:$0xf]  ;;  %v6554_v9 = vld [vmem:[#allocation9 + $0x768] sm:$0xf0] }
 0x1e1   : > { %v1117_v19 = vpop.f32.mrf.mxu1  ;;  %v1130_v20 = vpop.f32.mrf.mxu2 }
 0x1e2   : > { %v1118_v21 = vadd.f32 %v1117_v19, %v1105_v18  ;;  %v1131_v30 = vadd.f32 %v1130_v20, %v932_v22  ;;  %v6640_v18 = vld [vmem:[#allocation9 + $0xd90] sm:$0xf]  ;;  %v8707_v19 = vld [vmem:[#allocation9 + $0xe1c] sm:$0xf0]  ;;  %v8705_v20 = vld [vmem:[#allocation9 + $0xd94] sm:$0xf]  ;;  %v6497_v22 = vor.u32 %v8671_v13, %v6496_v12 }
 0x1e3   : > { %v1106_v23 = vpop.f32.mrf.mxu0  ;;  %v6641_v28 = vor.u32 %v8707_v19, %v6640_v18  ;;  %v8689_v12 = vld [vmem:[#allocation9 + $0x914] sm:$0xf]  ;;  %v6578_v13 = vld [vmem:[#allocation9 + $0x9a0] sm:$0xf0]  ;;  %v6557_v19 = vor.u32 %v8682_v6, %v6554_v9  ;;  %v8664_v9 = vld [vmem:[#allocation9 + $0x1c4] sm:$0xf0] }
 0x1e4   : > { %v1147_v26 = vmul.f32 0.2, %v1118_v21  ;;  %v6501_v23 = vor.u32 %v8669_v14, %v6498_v15  ;;  %v6696_v14 = vld [vmem:[#allocation9 + $0x10f8] sm:$0xf]  ;;  %v8720_v15 = vld [vmem:[#allocation9 + $0x1184] sm:$0xf0] }
 0x1e6   : > { %v1149_v29 = vmax.f32 %v1118_v21, %v1147_v26  ;;  %v6642_v21 = vld [vmem:[#allocation9 + $0xe20] sm:$0xf0]  ;;  %v8665_v26 = vld [vmem:[#allocation9 + $0x254] sm:$0xf] }
 0x1e7   : > { %v1143_v31 = vpop.f32.mrf.mxu3 }
 0x1e8   : > { %v9586_v35 = vpack.c.bf16 %v1149_v29, %v1149_v29  ;;  %v1144_v36 = vadd.f32 %v1143_v31, %v1131_v30  ;;  %v6645_v29 = vor.u32 %v8705_v20, %v6642_v21  ;;  %v6624_v30 = vld [vmem:[#allocation9 + $0xc70] sm:$0xf]  ;;  %v8703_v31 = vld [vmem:[#allocation9 + $0xcfc] sm:$0xf0]  ;;  %v6536_v20 = vld [vmem:[#allocation9 + $0x5b8] sm:$0xf] }
 0x1e9   : > { %v1119_v40 = vpop.f32.mrf.mxu1  ;;  %v1132_v41 = vpop.f32.mrf.mxu2 }
 0x1ea   : > { %v1148_v44 = vmul.f32 0.2, %v1144_v36  ;;  %1555 = vmatmul.bf16.vlgmr.msrb.gmra.mxu0 %v9586_v35  ;;  %1581 = vmatmul.bf16.vlgmr.msrb.gmra.mxu2 %v9586_v35  ;;  %v6466_v40 = vld [vmem:[#allocation9 + $0x1c0] sm:$0xf0]  ;;  %v6625_v41 = vor.u32 %v8703_v31, %v6624_v30  ;;  %v8714_v30 = vld [vmem:[#allocation9 + $0xfdc] sm:$0xf] }
 0x1eb   : > { %2049 = vmatpush.bf16.msrb.mxu0 %v6561_v32  ;;  %2075 = vmatpush.bf16.msrb.mxu2 %v6565_v33  ;;  %v8701_v32 = vld [vmem:[#allocation9 + $0xc74] sm:$0xf]  ;;  %v6626_v33 = vld [vmem:[#allocation9 + $0xd00] sm:$0xf0]  ;;  %v6682_v31 = vld [vmem:[#allocation9 + $0x1068] sm:$0xf0] }
 0x1ec   : > { %v1150_v50 = vmax.f32 %v1144_v36, %v1148_v44  ;;  %v6485_v36 = vor.u32 %v8665_v26, %v6482_v27  ;;  %v6629_v42 = vor.u32 %v8701_v32, %v6626_v33  ;;  %v8699_v44 = vld [vmem:[#allocation9 + $0xbdc] sm:$0xf0]  ;;  %v6697_v26 = vor.u32 %v8720_v15, %v6696_v14  ;;  %v6616_v14 = vld [vmem:[#allocation9 + $0xb58] sm:$0xf]  ;;  %v8700_v15 = vld [vmem:[#allocation9 + $0xbe4] sm:$0xf0] }
 0x1ed   : > { %v6541_v33 = vor.u32 %v8678_v24, %v6538_v25  ;;  %v6816_v24 = vld [vmem:[#allocation9 + $0x800] sm:$0xf]  ;;  %v8751_v25 = vld [vmem:[#allocation9 + $0x88c] sm:$0xf0] }
 0x1ee   : > { %v9590_v57 = vpack.c.bf16 %v1150_v50, %v1150_v50  ;;  %v8659_v50 = vld [vmem:[#allocation9 + $0x9c] sm:$0xf0] }
 0x1ef   : > { %2050 = vmatpush.bf16.msrb.mxu0 %v6545_v47  ;;  %2076 = vmatpush.bf16.msrb.mxu2 %v6549_v48  ;;  %v1145_v61 = vpop.f32.mrf.mxu3  ;;  %v6465_v47 = vor.u32 %v8663_v38, %v6464_v37  ;;  %v6469_v48 = vor.u32 %v8661_v39, %v6466_v40  ;;  %v6449_v0 = vor.u32 %v8659_v50, %v6448_v49  ;;  %v8674_v37 = vld [vmem:[#allocation9 + $0x49c] sm:$0xf]  ;;  %v6522_v38 = vld [vmem:[#allocation9 + $0x528] sm:$0xf0] }
 0x1f0   : > { %1568 = vmatmul.bf16.vlgmr.msrb.gmra.mxu1 %v9590_v57  ;;  %1594 = vmatmul.bf16.vlgmr.msrb.gmra.mxu3 %v9590_v57  ;;  %v8695_v61 = vld [vmem:[#allocation9 + $0xabc] sm:$0xf0]  ;;  %v6685_v40 = vor.u32 %v8714_v30, %v6682_v31  ;;  %v6525_v46 = vor.u32 %v8674_v37, %v6522_v38  ;;  %v8670_v49 = vld [vmem:[#allocation9 + $0x37c] sm:$0xf]  ;;  %v6506_v50 = vld [vmem:[#allocation9 + $0x408] sm:$0xf0]  ;;  %v6817_v37 = vor.u32 %v8751_v25, %v6816_v24 }
 0x1f1   : > { %2062 = vmatpush.bf16.msrb.mxu1 %v6689_v54  ;;  %2088 = vmatpush.bf16.msrb.mxu3 %v6693_v55  ;;  %v8688_v54 = vld [vmem:[#allocation9 + $0x884] sm:$0xf0]  ;;  %v6609_v55 = vor.u32 %v8699_v44, %v6608_v43  ;;  %v6593_v7 = vor.u32 %v8695_v61, %v6592_v60  ;;  %v8710_v43 = vld [vmem:[#allocation9 + $0xebc] sm:$0xf]  ;;  %v6666_v44 = vld [vmem:[#allocation9 + $0xf48] sm:$0xf0]  ;;  %v6509_v59 = vor.u32 %v8670_v49, %v6506_v50 }
 0x1f2   : > { %v6569_v2 = vor.u32 %v8688_v54, %v6568_v53  ;;  %v6669_v52 = vor.u32 %v8710_v43, %v6666_v44  ;;  %v6648_v53 = vld [vmem:[#allocation9 + $0xd98] sm:$0xf]  ;;  %v8708_v54 = vld [vmem:[#allocation9 + $0xe24] sm:$0xf0]  ;;  %v6802_v44 = vld [vmem:[#allocation9 + $0x770] sm:$0xf0] }
 0x1f3   : > { %2051 = vmatpush.bf16.msrb.mxu0 %v6529_v62  ;;  %2077 = vmatpush.bf16.msrb.mxu2 %v6533_v63  ;;  %v8693_v62 = vld [vmem:[#allocation9 + $0xa34] sm:$0xf]  ;;  %v6594_v63 = vld [vmem:[#allocation9 + $0xac0] sm:$0xf0]  ;;  %v6488_v60 = vld [vmem:[#allocation9 + $0x258] sm:$0xf] }
 0x1f4   : > { %v6597_v8 = vor.u32 %v8693_v62, %v6594_v63  ;;  %v8668_v61 = vld [vmem:[#allocation9 + $0x2e4] sm:$0xf0]  ;;  %v8666_v62 = vld [vmem:[#allocation9 + $0x25c] sm:$0xf]  ;;  %v6490_v63 = vld [vmem:[#allocation9 + $0x2e8] sm:$0xf0] }
 0x1f5   : > { %2063 = vmatpush.bf16.msrb.mxu1 %v6673_v4  ;;  %2089 = vmatpush.bf16.msrb.mxu3 %v6677_v5  ;;  %v6552_v4 = vld [vmem:[#allocation9 + $0x6d8] sm:$0xf]  ;;  %v8684_v5 = vld [vmem:[#allocation9 + $0x764] sm:$0xf0]  ;;  %v6489_v6 = vor.u32 %v8668_v61, %v6488_v60  ;;  %v6944_v49 = vld [vmem:[#allocation9 + $0x1100] sm:$0xf] }
 0x1f6   : > { %v6553_v18 = vor.u32 %v8684_v5, %v6552_v4  ;;  %v8702_v4 = vld [vmem:[#allocation9 + $0xc7c] sm:$0xf]  ;;  %v6634_v5 = vld [vmem:[#allocation9 + $0xd08] sm:$0xf0]  ;;  %v6600_v30 = vld [vmem:[#allocation9 + $0xa38] sm:$0xf] }
 0x1f7   : > { %2052 = vmatpush.bf16.msrb.mxu0 %v6513_v10  ;;  %2078 = vmatpush.bf16.msrb.mxu2 %v6517_v11  ;;  %v6576_v10 = vld [vmem:[#allocation9 + $0x910] sm:$0xf]  ;;  %v8691_v11 = vld [vmem:[#allocation9 + $0x99c] sm:$0xf0]  ;;  %v8696_v31 = vld [vmem:[#allocation9 + $0xac4] sm:$0xf0] }
 0x1f8   : > { %v6577_v21 = vor.u32 %v8691_v11, %v6576_v10  ;;  %v8662_v10 = vld [vmem:[#allocation9 + $0x13c] sm:$0xf]  ;;  %v6474_v11 = vld [vmem:[#allocation9 + $0x1c8] sm:$0xf0]  ;;  %v8783_v50 = vld [vmem:[#allocation9 + $0x118c] sm:$0xf0] }
 0x1f9   : > { %2064 = vmatpush.bf16.msrb.mxu1 %v6657_v16  ;;  %2090 = vmatpush.bf16.msrb.mxu3 %v6661_v17  ;;  %v8718_v16 = vld [vmem:[#allocation9 + $0x10fc] sm:$0xf]  ;;  %v6698_v17 = vld [vmem:[#allocation9 + $0x1188] sm:$0xf0]  ;;  %v6945_v60 = vor.u32 %v8783_v50, %v6944_v49  ;;  %v6896_v24 = vld [vmem:[#allocation9 + $0xda0] sm:$0xf] }
 0x1fa   : > { %1607 = vmatmul.bf16.vlgmr.msra.gmra.mxu0 %v9586_v35  ;;  %1633 = vmatmul.bf16.vlgmr.msra.gmra.mxu2 %v9586_v35  ;;  %v6701_v27 = vor.u32 %v8718_v16, %v6698_v17  ;;  %v8698_v16 = vld [vmem:[#allocation9 + $0xb5c] sm:$0xf]  ;;  %v6618_v17 = vld [vmem:[#allocation9 + $0xbe8] sm:$0xf0]  ;;  %v8771_v25 = vld [vmem:[#allocation9 + $0xe2c] sm:$0xf0] }
 0x1fb   : > { %2053 = vmatpush.bf16.msrb.mxu0 %v6497_v22  ;;  %2079 = vmatpush.bf16.msrb.mxu2 %v6501_v23  ;;  %v6581_v22 = vor.u32 %v8689_v12, %v6578_v13  ;;  %v8680_v23 = vld [vmem:[#allocation9 + $0x644] sm:$0xf0]  ;;  %v6637_v13 = vor.u32 %v8702_v4, %v6634_v5  ;;  %v6864_v49 = vld [vmem:[#allocation9 + $0xb60] sm:$0xf]  ;;  %v8763_v50 = vld [vmem:[#allocation9 + $0xbec] sm:$0xf0] }
 0x1fc   : > { %v6537_v32 = vor.u32 %v8680_v23, %v6536_v20  ;;  %v6456_v20 = vld [vmem:[#allocation9 + $0x18] sm:$0xf]  ;;  %v6458_v23 = vld [vmem:[#allocation9 + $0xa8] sm:$0xf0] }
 0x1fd   : > { %2065 = vmatpush.bf16.msrb.mxu1 %v6641_v28  ;;  %2091 = vmatpush.bf16.msrb.mxu3 %v6645_v29  ;;  %v6680_v28 = vld [vmem:[#allocation9 + $0xfd8] sm:$0xf]  ;;  %v8716_v29 = vld [vmem:[#allocation9 + $0x1064] sm:$0xf0] }
 0x1fe   : > { %v6681_v39 = vor.u32 %v8716_v29, %v6680_v28  ;;  %v8749_v28 = vld [vmem:[#allocation9 + $0x804] sm:$0xf]  ;;  %v6818_v29 = vld [vmem:[#allocation9 + $0x890] sm:$0xf0] }
 0x1ff   : > { %2054 = vmatpush.bf16.msrb.mxu0 %v6481_v34  ;;  %2080 = vmatpush.bf16.msrb.mxu2 %v6485_v36  ;;  %v6520_v34 = vld [vmem:[#allocation9 + $0x498] sm:$0xf]  ;;  %v8676_v36 = vld [vmem:[#allocation9 + $0x524] sm:$0xf0]  ;;  %v6821_v38 = vor.u32 %v8749_v28, %v6818_v29 }
 0x200   : > { %1620 = vmatmul.bf16.vlgmr.msra.gmra.mxu1 %v9590_v57  ;;  %1646 = vmatmul.bf16.vlgmr.msra.gmra.mxu3 %v9590_v57  ;;  %v6521_v45 = vor.u32 %v8676_v36, %v6520_v34 }
 0x201   : > { %2066 = vmatpush.bf16.msrb.mxu1 %v6625_v41  ;;  %2092 = vmatpush.bf16.msrb.mxu3 %v6629_v42  ;;  %v6664_v41 = vld [vmem:[#allocation9 + $0xeb8] sm:$0xf]  ;;  %v8712_v42 = vld [vmem:[#allocation9 + $0xf44] sm:$0xf0] }
 0x202   : > { %v6665_v51 = vor.u32 %v8712_v42, %v6664_v41  ;;  %v8745_v41 = vld [vmem:[#allocation9 + $0x6e4] sm:$0xf]  ;;  %v6601_v42 = vor.u32 %v8696_v31, %v6600_v30  ;;  %v6736_v30 = vld [vmem:[#allocation9 + $0x260] sm:$0xf]  ;;  %v8731_v31 = vld [vmem:[#allocation9 + $0x2ec] sm:$0xf0] }
 0x203   : > { %2055 = vmatpush.bf16.msrb.mxu0 %v6465_v47  ;;  %2081 = vmatpush.bf16.msrb.mxu2 %v6469_v48  ;;  %v6504_v47 = vld [vmem:[#allocation9 + $0x378] sm:$0xf]  ;;  %v8672_v48 = vld [vmem:[#allocation9 + $0x404] sm:$0xf0] }
 0x204   : > { %v6505_v58 = vor.u32 %v8672_v48, %v6504_v47  ;;  %v8690_v47 = vld [vmem:[#allocation9 + $0x91c] sm:$0xf]  ;;  %v6586_v48 = vld [vmem:[#allocation9 + $0x9a8] sm:$0xf0] }
 0x205   : > { %2067 = vmatpush.bf16.msrb.mxu1 %v6609_v55  ;;  %2093 = vmatpush.bf16.msrb.mxu3 %v6613_v56  ;;  %v8706_v55 = vld [vmem:[#allocation9 + $0xd9c] sm:$0xf]  ;;  %v6650_v56 = vld [vmem:[#allocation9 + $0xe28] sm:$0xf0] }
 0x207   : > { %2056 = vmatpush.bf16.msrb.mxu0 %v6449_v0  ;;  %2082 = vmatpush.bf16.msrb.mxu2 %v6453_v1  ;;  %v6649_v0 = vor.u32 %v8708_v54, %v6648_v53  ;;  %v6653_v1 = vor.u32 %v8706_v55, %v6650_v56  ;;  %v6805_v54 = vor.u32 %v8745_v41, %v6802_v44  ;;  %v8727_v44 = vld [vmem:[#allocation9 + $0x1cc] sm:$0xf0] }
 0x208   : > { %v6589_v56 = vor.u32 %v8690_v47, %v6586_v48  ;;  %v6737_v41 = vor.u32 %v8731_v31, %v6736_v30  ;;  %v8725_v47 = vld [vmem:[#allocation9 + $0x144] sm:$0xf]  ;;  %v6722_v48 = vld [vmem:[#allocation9 + $0x1d0] sm:$0xf0] }
 0x209   : > { %2068 = vmatpush.bf16.msrb.mxu1 %v6593_v7  ;;  %2094 = vmatpush.bf16.msrb.mxu3 %v6597_v8  ;;  %v6493_v7 = vor.u32 %v8666_v62, %v6490_v63  ;;  %v6472_v8 = vld [vmem:[#allocation9 + $0x138] sm:$0xf]  ;;  %v8741_v62 = vld [vmem:[#allocation9 + $0x5c4] sm:$0xf]  ;;  %v6786_v63 = vld [vmem:[#allocation9 + $0x650] sm:$0xf0] }
 0x20a   : > { %2057 = vmatmul.bf16.vlgmr.msrb.gmra.mxu0 %v9586_v35  ;;  %2083 = vmatmul.bf16.vlgmr.msrb.gmra.mxu2 %v9586_v35  ;;  %v6789_v5 = vor.u32 %v8741_v62, %v6786_v63  ;;  %v6824_v62 = vld [vmem:[#allocation9 + $0x808] sm:$0xf]  ;;  %v8752_v63 = vld [vmem:[#allocation9 + $0x894] sm:$0xf0] }
 0x20b   : > { %2101 = vmatpush.bf16.msra.mxu0 %v6569_v2  ;;  %2127 = vmatpush.bf16.msra.mxu2 %v6573_v3  ;;  %v6632_v2 = vld [vmem:[#allocation9 + $0xc78] sm:$0xf]  ;;  %v8704_v3 = vld [vmem:[#allocation9 + $0xd04] sm:$0xf0] }
 0x20c   : > { %v6633_v12 = vor.u32 %v8704_v3, %v6632_v2  ;;  %v8777_v2 = vld [vmem:[#allocation9 + $0xfe4] sm:$0xf]  ;;  %v6930_v3 = vld [vmem:[#allocation9 + $0x1070] sm:$0xf0] }
 0x20d   : > { %2069 = vmatpush.bf16.msrb.mxu1 %v6577_v21  ;;  %2095 = vmatpush.bf16.msrb.mxu3 %v6581_v22  ;;  %v8660_v21 = vld [vmem:[#allocation9 + $0xa4] sm:$0xf0]  ;;  %v8658_v22 = vld [vmem:[#allocation9 + $0x1c] sm:$0xf] }
 0x20e   : > { %v6457_v34 = vor.u32 %v8660_v21, %v6456_v20  ;;  %v6461_v36 = vor.u32 %v8658_v22, %v6458_v23  ;;  %v8733_v22 = vld [vmem:[#allocation9 + $0x384] sm:$0xf]  ;;  %v6754_v23 = vld [vmem:[#allocation9 + $0x410] sm:$0xf0] }
 0x20f   : > { %2102 = vmatpush.bf16.msra.mxu0 %v6553_v18  ;;  %2128 = vmatpush.bf16.msra.mxu2 %v6557_v19  ;;  %v6473_v18 = vor.u32 %v8664_v9, %v6472_v8  ;;  %v6477_v19 = vor.u32 %v8662_v10, %v6474_v11  ;;  %v6933_v9 = vor.u32 %v8777_v2, %v6930_v3  ;;  %v8737_v10 = vld [vmem:[#allocation9 + $0x4a4] sm:$0xf]  ;;  %v6770_v11 = vld [vmem:[#allocation9 + $0x530] sm:$0xf0]  ;;  %v6848_v2 = vld [vmem:[#allocation9 + $0xa40] sm:$0xf] }
 0x210   : > { %2070 = vmatmul.bf16.vlgmr.msrb.gmra.mxu1 %v9590_v57  ;;  %2096 = vmatmul.bf16.vlgmr.msrb.gmra.mxu3 %v9590_v57  ;;  %v6757_v29 = vor.u32 %v8733_v22, %v6754_v23  ;;  %v8759_v3 = vld [vmem:[#allocation9 + $0xacc] sm:$0xf0]  ;;  %v8782_v22 = vld [vmem:[#allocation9 + $0x110c] sm:$0xf]  ;;  %v6954_v23 = vld [vmem:[#allocation9 + $0x1198] sm:$0xf0] }
 0x211   : > { %2114 = vmatpush.bf16.msra.mxu1 %v6697_v26  ;;  %2140 = vmatpush.bf16.msra.mxu3 %v6701_v27  ;;  %v6617_v26 = vor.u32 %v8700_v15, %v6616_v14  ;;  %v6621_v27 = vor.u32 %v8698_v16, %v6618_v17  ;;  %v8773_v14 = vld [vmem:[#allocation9 + $0xec4] sm:$0xf]  ;;  %v6914_v15 = vld [vmem:[#allocation9 + $0xf50] sm:$0xf0]  ;;  %v6773_v17 = vor.u32 %v8737_v10, %v6770_v11  ;;  %v6808_v10 = vld [vmem:[#allocation9 + $0x6e8] sm:$0xf] }
 0x212   : > { %v6917_v21 = vor.u32 %v8773_v14, %v6914_v15  ;;  %v8748_v11 = vld [vmem:[#allocation9 + $0x774] sm:$0xf0]  ;;  %v6810_v15 = vld [vmem:[#allocation9 + $0x778] sm:$0xf0]  ;;  %v6957_v31 = vor.u32 %v8782_v22, %v6954_v23  ;;  %v8762_v22 = vld [vmem:[#allocation9 + $0xb6c] sm:$0xf] }
 0x213   : > { %2103 = vmatpush.bf16.msra.mxu0 %v6537_v32  ;;  %2129 = vmatpush.bf16.msra.mxu2 %v6541_v33  ;;  %v8694_v32 = vld [vmem:[#allocation9 + $0xa3c] sm:$0xf]  ;;  %v6602_v33 = vld [vmem:[#allocation9 + $0xac8] sm:$0xf0] }
 0x214   : > { %v6605_v43 = vor.u32 %v8694_v32, %v6602_v33  ;;  %v6897_v32 = vor.u32 %v8771_v25, %v6896_v24  ;;  %v6809_v24 = vor.u32 %v8748_v11, %v6808_v10  ;;  %v8766_v10 = vld [vmem:[#allocation9 + $0xc8c] sm:$0xf]  ;;  %v6890_v11 = vld [vmem:[#allocation9 + $0xd18] sm:$0xf0] }
 0x215   : > { %2115 = vmatpush.bf16.msra.mxu1 %v6681_v39  ;;  %2141 = vmatpush.bf16.msra.mxu3 %v6685_v40  ;;  %v6800_v39 = vld [vmem:[#allocation9 + $0x6e0] sm:$0xf]  ;;  %v8747_v40 = vld [vmem:[#allocation9 + $0x76c] sm:$0xf0]  ;;  %v6874_v23 = vld [vmem:[#allocation9 + $0xbf8] sm:$0xf0] }
 0x216   : > { %v6801_v53 = vor.u32 %v8747_v40, %v6800_v39  ;;  %v8765_v39 = vld [vmem:[#allocation9 + $0xc84] sm:$0xf]  ;;  %v6882_v40 = vld [vmem:[#allocation9 + $0xd10] sm:$0xf0] }
 0x217   : > { %2104 = vmatpush.bf16.msra.mxu0 %v6521_v45  ;;  %2130 = vmatpush.bf16.msra.mxu2 %v6525_v46  ;;  %v6584_v45 = vld [vmem:[#allocation9 + $0x918] sm:$0xf]  ;;  %v8692_v46 = vld [vmem:[#allocation9 + $0x9a4] sm:$0xf0] }
 0x218   : > { %v6585_v55 = vor.u32 %v8692_v46, %v6584_v45  ;;  %v6885_v46 = vor.u32 %v8765_v39, %v6882_v40 }
 0x219   : > { %2116 = vmatpush.bf16.msra.mxu1 %v6665_v51  ;;  %2142 = vmatpush.bf16.msra.mxu3 %v6669_v52  ;;  %v8781_v51 = vld [vmem:[#allocation9 + $0x1104] sm:$0xf]  ;;  %v6946_v52 = vld [vmem:[#allocation9 + $0x1190] sm:$0xf0] }
 0x21a   : > { %v6949_v61 = vor.u32 %v8781_v51, %v6946_v52  ;;  %v8761_v51 = vld [vmem:[#allocation9 + $0xb64] sm:$0xf]  ;;  %v6866_v52 = vld [vmem:[#allocation9 + $0xbf0] sm:$0xf0] }
 0x21b   : > { %2105 = vmatpush.bf16.msra.mxu0 %v6505_v58  ;;  %2131 = vmatpush.bf16.msra.mxu2 %v6509_v59  ;;  %v6784_v58 = vld [vmem:[#allocation9 + $0x5c0] sm:$0xf]  ;;  %v8743_v59 = vld [vmem:[#allocation9 + $0x64c] sm:$0xf0] }
 0x21c   : > { %v6785_v4 = vor.u32 %v8743_v59, %v6784_v58  ;;  %v8721_v58 = vld [vmem:[#allocation9 + $0x24] sm:$0xf]  ;;  %v6865_v59 = vor.u32 %v8763_v50, %v6864_v49  ;;  %v8774_v49 = vld [vmem:[#allocation9 + $0xecc] sm:$0xf]  ;;  %v6922_v50 = vld [vmem:[#allocation9 + $0xf58] sm:$0xf0] }
 0x21d   : > { %2117 = vmatpush.bf16.msra.mxu1 %v6649_v0  ;;  %2143 = vmatpush.bf16.msra.mxu3 %v6653_v1  ;;  %v6928_v0 = vld [vmem:[#allocation9 + $0xfe0] sm:$0xf]  ;;  %v8779_v1 = vld [vmem:[#allocation9 + $0x106c] sm:$0xf0] }
 0x21e   : > { %v6929_v8 = vor.u32 %v8779_v1, %v6928_v0  ;;  %v8750_v0 = vld [vmem:[#allocation9 + $0x80c] sm:$0xf]  ;;  %v6826_v1 = vld [vmem:[#allocation9 + $0x898] sm:$0xf0] }
 0x21f   : > { %2106 = vmatpush.bf16.msra.mxu0 %v6489_v6  ;;  %2132 = vmatpush.bf16.msra.mxu2 %v6493_v7  ;;  %v6768_v6 = vld [vmem:[#allocation9 + $0x4a0] sm:$0xf]  ;;  %v8739_v7 = vld [vmem:[#allocation9 + $0x52c] sm:$0xf0] }
 0x220   : > { %v6769_v16 = vor.u32 %v8739_v7, %v6768_v6 }
 0x221   : > { %2118 = vmatpush.bf16.msra.mxu1 %v6633_v12  ;;  %2144 = vmatpush.bf16.msra.mxu3 %v6637_v13  ;;  %v6912_v12 = vld [vmem:[#allocation9 + $0xec0] sm:$0xf]  ;;  %v8775_v13 = vld [vmem:[#allocation9 + $0xf4c] sm:$0xf0] }
 0x222   : > { %v6913_v20 = vor.u32 %v8775_v13, %v6912_v12  ;;  %v8746_v12 = vld [vmem:[#allocation9 + $0x6ec] sm:$0xf]  ;;  %v6849_v13 = vor.u32 %v8759_v3, %v6848_v2  ;;  %v6744_v2 = vld [vmem:[#allocation9 + $0x268] sm:$0xf]  ;;  %v8732_v3 = vld [vmem:[#allocation9 + $0x2f4] sm:$0xf0] }
 0x223   : > { %2107 = vmatpush.bf16.msra.mxu0 %v6473_v18  ;;  %2133 = vmatpush.bf16.msra.mxu2 %v6477_v19  ;;  %v6752_v18 = vld [vmem:[#allocation9 + $0x380] sm:$0xf]  ;;  %v8735_v19 = vld [vmem:[#allocation9 + $0x40c] sm:$0xf0]  ;;  %v6813_v25 = vor.u32 %v8746_v12, %v6810_v15  ;;  %v6745_v12 = vor.u32 %v8732_v3, %v6744_v2  ;;  %v8728_v15 = vld [vmem:[#allocation9 + $0x1d4] sm:$0xf0] }
 0x224   : > { %v6753_v28 = vor.u32 %v8735_v19, %v6752_v18  ;;  %v8753_v18 = vld [vmem:[#allocation9 + $0x924] sm:$0xf]  ;;  %v6834_v19 = vld [vmem:[#allocation9 + $0x9b0] sm:$0xf0] }
 0x225   : > { %2119 = vmatpush.bf16.msra.mxu1 %v6617_v26  ;;  %2145 = vmatpush.bf16.msra.mxu3 %v6621_v27  ;;  %v8769_v26 = vld [vmem:[#allocation9 + $0xda4] sm:$0xf]  ;;  %v6898_v27 = vld [vmem:[#allocation9 + $0xe30] sm:$0xf0] }
 0x226   : > { %v6901_v33 = vor.u32 %v8769_v26, %v6898_v27  ;;  %v6837_v27 = vor.u32 %v8753_v18, %v6834_v19  ;;  %v8726_v18 = vld [vmem:[#allocation9 + $0x14c] sm:$0xf]  ;;  %v6730_v19 = vld [vmem:[#allocation9 + $0x1d8] sm:$0xf0]  ;;  %v8805_v2 = vld [vmem:[#allocation9 + $0x5d4] sm:$0xf] }
 0x227   : > { %2108 = vmatpush.bf16.msra.mxu0 %v6457_v34  ;;  %2134 = vmatpush.bf16.msra.mxu2 %v6461_v36  ;;  %v8729_v34 = vld [vmem:[#allocation9 + $0x264] sm:$0xf]  ;;  %v6738_v36 = vld [vmem:[#allocation9 + $0x2f0] sm:$0xf0] }
 0x229   : > { %2120 = vmatpush.bf16.msra.mxu1 %v6601_v42  ;;  %2146 = vmatpush.bf16.msra.mxu3 %v6605_v43  ;;  %v6741_v42 = vor.u32 %v8729_v34, %v6738_v36  ;;  %v6720_v43 = vld [vmem:[#allocation9 + $0x140] sm:$0xf]  ;;  %v6936_v34 = vld [vmem:[#allocation9 + $0xfe8] sm:$0xf]  ;;  %v8780_v36 = vld [vmem:[#allocation9 + $0x1074] sm:$0xf0] }
 0x22a   : > { %2109 = vmatmul.bf16.vlgmr.msra.gmra.mxu0 %v9586_v35  ;;  %2135 = vmatmul.bf16.vlgmr.msra.gmra.mxu2 %v9586_v35 }
 0x22b   : > { %2551 = vmatpush.bf16.msrb.mxu0 %v6817_v37  ;;  %2577 = vmatpush.bf16.msrb.mxu2 %v6821_v38  ;;  %v6880_v37 = vld [vmem:[#allocation9 + $0xc80] sm:$0xf]  ;;  %v8767_v38 = vld [vmem:[#allocation9 + $0xd0c] sm:$0xf0] }
 0x22c   : > { %v6881_v45 = vor.u32 %v8767_v38, %v6880_v37  ;;  %v8778_v37 = vld [vmem:[#allocation9 + $0xfec] sm:$0xf]  ;;  %v6938_v38 = vld [vmem:[#allocation9 + $0x1078] sm:$0xf0] }
 0x22d   : > { %2121 = vmatpush.bf16.msra.mxu1 %v6585_v55  ;;  %2147 = vmatpush.bf16.msra.mxu3 %v6589_v56  ;;  %v6704_v55 = vld [vmem:[#allocation9 + $0x20] sm:$0xf]  ;;  %v8723_v56 = vld [vmem:[#allocation9 + $0xac] sm:$0xf0] }
 0x22e   : > { %v6705_v6 = vor.u32 %v8723_v56, %v6704_v55  ;;  %v6925_v56 = vor.u32 %v8774_v49, %v6922_v50  ;;  %v7058_v50 = vld [vmem:[#allocation9 + $0x780] sm:$0xf0] }
 0x22f   : > { %2552 = vmatpush.bf16.msrb.mxu0 %v6801_v53  ;;  %2578 = vmatpush.bf16.msrb.mxu2 %v6805_v54  ;;  %v6721_v53 = vor.u32 %v8727_v44, %v6720_v43  ;;  %v6725_v54 = vor.u32 %v8725_v47, %v6722_v48  ;;  %v6937_v43 = vor.u32 %v8780_v36, %v6936_v34  ;;  %v6920_v47 = vld [vmem:[#allocation9 + $0xec8] sm:$0xf]  ;;  %v8776_v48 = vld [vmem:[#allocation9 + $0xf54] sm:$0xf0]  ;;  %v8813_v34 = vld [vmem:[#allocation9 + $0x814] sm:$0xf] }
 0x230   : > { %2122 = vmatmul.bf16.vlgmr.msra.gmra.mxu1 %v9590_v57  ;;  %2148 = vmatmul.bf16.vlgmr.msra.gmra.mxu3 %v9590_v57  ;;  %v6941_v44 = vor.u32 %v8778_v37, %v6938_v38  ;;  %v6921_v55 = vor.u32 %v8776_v48, %v6920_v47  ;;  %v7074_v36 = vld [vmem:[#allocation9 + $0x8a0] sm:$0xf0]  ;;  %v6856_v37 = vld [vmem:[#allocation9 + $0xa48] sm:$0xf]  ;;  %v8760_v38 = vld [vmem:[#allocation9 + $0xad4] sm:$0xf0] }
 0x231   : > { %2564 = vmatpush.bf16.msrb.mxu1 %v6945_v60  ;;  %2590 = vmatpush.bf16.msrb.mxu3 %v6949_v61  ;;  %v6869_v60 = vor.u32 %v8761_v51, %v6866_v52  ;;  %v6706_v61 = vld [vmem:[#allocation9 + $0xb0] sm:$0xf0]  ;;  %v6857_v48 = vor.u32 %v8760_v38, %v6856_v37  ;;  %v7154_v38 = vld [vmem:[#allocation9 + $0xe40] sm:$0xf0] }
 0x232   : > { %v6709_v7 = vor.u32 %v8721_v58, %v6706_v61  ;;  %v8734_v58 = vld [vmem:[#allocation9 + $0x38c] sm:$0xf]  ;;  %v8772_v61 = vld [vmem:[#allocation9 + $0xe34] sm:$0xf0]  ;;  %v8809_v47 = vld [vmem:[#allocation9 + $0x6f4] sm:$0xf] }
 0x233   : > { %2553 = vmatpush.bf16.msrb.mxu0 %v6785_v4  ;;  %2579 = vmatpush.bf16.msrb.mxu2 %v6789_v5  ;;  %v8757_v4 = vld [vmem:[#allocation9 + $0xa44] sm:$0xf]  ;;  %v6850_v5 = vld [vmem:[#allocation9 + $0xad0] sm:$0xf0] }
 0x234   : > { %v6853_v14 = vor.u32 %v8757_v4, %v6850_v5  ;;  %v8833_v37 = vld [vmem:[#allocation9 + $0xdb4] sm:$0xf] }
 0x235   : > { %2565 = vmatpush.bf16.msrb.mxu1 %v6929_v8  ;;  %2591 = vmatpush.bf16.msrb.mxu3 %v6933_v9  ;;  %v6825_v8 = vor.u32 %v8752_v63, %v6824_v62  ;;  %v6829_v9 = vor.u32 %v8750_v0, %v6826_v1  ;;  %v8770_v62 = vld [vmem:[#allocation9 + $0xdac] sm:$0xf]  ;;  %v6906_v63 = vld [vmem:[#allocation9 + $0xe38] sm:$0xf0] }
 0x236   : > { %v6909_v5 = vor.u32 %v8770_v62, %v6906_v63 }
 0x237   : > { %2554 = vmatpush.bf16.msrb.mxu0 %v6769_v16  ;;  %2580 = vmatpush.bf16.msrb.mxu2 %v6773_v17  ;;  %v6832_v16 = vld [vmem:[#allocation9 + $0x920] sm:$0xf]  ;;  %v8755_v17 = vld [vmem:[#allocation9 + $0x9ac] sm:$0xf0] }
 0x238   : > { %v6833_v26 = vor.u32 %v8755_v17, %v6832_v16  ;;  %v6893_v17 = vor.u32 %v8766_v10, %v6890_v11  ;;  %v7186_v10 = vld [vmem:[#allocation9 + $0x1080] sm:$0xf0] }
 0x239   : > { %2566 = vmatpush.bf16.msrb.mxu1 %v6913_v20  ;;  %2592 = vmatpush.bf16.msrb.mxu3 %v6917_v21  ;;  %v6952_v20 = vld [vmem:[#allocation9 + $0x1108] sm:$0xf]  ;;  %v8784_v21 = vld [vmem:[#allocation9 + $0x1194] sm:$0xf0] }
 0x23a   : > { %v6953_v30 = vor.u32 %v8784_v21, %v6952_v20  ;;  %v6872_v20 = vld [vmem:[#allocation9 + $0xb68] sm:$0xf]  ;;  %v8764_v21 = vld [vmem:[#allocation9 + $0xbf4] sm:$0xf0] }
 0x23b   : > { %2555 = vmatpush.bf16.msrb.mxu0 %v6753_v28  ;;  %2581 = vmatpush.bf16.msrb.mxu2 %v6757_v29  ;;  %v6792_v28 = vld [vmem:[#allocation9 + $0x5c8] sm:$0xf]  ;;  %v8744_v29 = vld [vmem:[#allocation9 + $0x654] sm:$0xf0] }
 0x23c   : > { %v6793_v39 = vor.u32 %v8744_v29, %v6792_v28  ;;  %v8722_v28 = vld [vmem:[#allocation9 + $0x2c] sm:$0xf]  ;;  %v6873_v29 = vor.u32 %v8764_v21, %v6872_v20  ;;  %v7026_v20 = vld [vmem:[#allocation9 + $0x540] sm:$0xf0]  ;;  %v7168_v21 = vld [vmem:[#allocation9 + $0xed0] sm:$0xf] }
 0x23d   : > { %2567 = vmatpush.bf16.msrb.mxu1 %v6897_v32  ;;  %2593 = vmatpush.bf16.msrb.mxu3 %v6901_v33  ;;  %v8742_v32 = vld [vmem:[#allocation9 + $0x5cc] sm:$0xf]  ;;  %v6794_v33 = vld [vmem:[#allocation9 + $0x658] sm:$0xf0] }
 0x23e   : > { %v6797_v40 = vor.u32 %v8742_v32, %v6794_v33  ;;  %v7072_v32 = vld [vmem:[#allocation9 + $0x810] sm:$0xf]  ;;  %v8815_v33 = vld [vmem:[#allocation9 + $0x89c] sm:$0xf0] }
 0x23f   : > { %2556 = vmatpush.bf16.msrb.mxu0 %v6737_v41  ;;  %2582 = vmatpush.bf16.msrb.mxu2 %v6741_v42  ;;  %v6776_v41 = vld [vmem:[#allocation9 + $0x4a8] sm:$0xf]  ;;  %v8740_v42 = vld [vmem:[#allocation9 + $0x534] sm:$0xf0] }
 0x240   : > { %v6777_v51 = vor.u32 %v8740_v42, %v6776_v41 }
 0x241   : > { %2568 = vmatpush.bf16.msrb.mxu1 %v6881_v45  ;;  %2594 = vmatpush.bf16.msrb.mxu3 %v6885_v46  ;;  %v8738_v45 = vld [vmem:[#allocation9 + $0x4ac] sm:$0xf]  ;;  %v6778_v46 = vld [vmem:[#allocation9 + $0x538] sm:$0xf0] }
 0x242   : > { %v6781_v52 = vor.u32 %v8738_v45, %v6778_v46  ;;  %v7056_v45 = vld [vmem:[#allocation9 + $0x6f0] sm:$0xf]  ;;  %v8811_v46 = vld [vmem:[#allocation9 + $0x77c] sm:$0xf0] }
 0x243   : > { %2557 = vmatpush.bf16.msrb.mxu0 %v6721_v53  ;;  %2583 = vmatpush.bf16.msrb.mxu2 %v6725_v54  ;;  %v6760_v53 = vld [vmem:[#allocation9 + $0x388] sm:$0xf]  ;;  %v8736_v54 = vld [vmem:[#allocation9 + $0x414] sm:$0xf0] }
 0x244   : > { %v6761_v0 = vor.u32 %v8736_v54, %v6760_v53  ;;  %v8754_v53 = vld [vmem:[#allocation9 + $0x92c] sm:$0xf]  ;;  %v6842_v54 = vld [vmem:[#allocation9 + $0x9b8] sm:$0xf0] }
 0x245   : > { %2569 = vmatpush.bf16.msrb.mxu1 %v6865_v59  ;;  %2595 = vmatpush.bf16.msrb.mxu3 %v6869_v60  ;;  %v6762_v59 = vld [vmem:[#allocation9 + $0x418] sm:$0xf0]  ;;  %v6904_v60 = vld [vmem:[#allocation9 + $0xda8] sm:$0xf]  ;;  %v6845_v63 = vor.u32 %v8754_v53, %v6842_v54  ;;  %v8831_v53 = vld [vmem:[#allocation9 + $0xd1c] sm:$0xf0] }
 0x246   : > { %v6765_v1 = vor.u32 %v8734_v58, %v6762_v59  ;;  %v6905_v4 = vor.u32 %v8772_v61, %v6904_v60  ;;  %v8845_v58 = vld [vmem:[#allocation9 + $0x1114] sm:$0xf]  ;;  %v7202_v59 = vld [vmem:[#allocation9 + $0x11a0] sm:$0xf0]  ;;  %v7057_v60 = vor.u32 %v8811_v46, %v7056_v45  ;;  %v7061_v61 = vor.u32 %v8809_v47, %v7058_v50  ;;  %v6992_v45 = vld [vmem:[#allocation9 + $0x270] sm:$0xf] }
 0x247   : > { %2558 = vmatpush.bf16.msrb.mxu0 %v6705_v6  ;;  %2584 = vmatpush.bf16.msrb.mxu2 %v6709_v7  ;;  %v8730_v6 = vld [vmem:[#allocation9 + $0x26c] sm:$0xf]  ;;  %v6746_v7 = vld [vmem:[#allocation9 + $0x2f8] sm:$0xf0]  ;;  %v8795_v46 = vld [vmem:[#allocation9 + $0x2fc] sm:$0xf0] }
 0x248   : > { %v8793_v50 = vld [vmem:[#allocation9 + $0x274] sm:$0xf] }
 0x249   : > { %2570 = vmatpush.bf16.msrb.mxu1 %v6849_v13  ;;  %2596 = vmatpush.bf16.msrb.mxu3 %v6853_v14  ;;  %v6749_v13 = vor.u32 %v8730_v6, %v6746_v7  ;;  %v6728_v14 = vld [vmem:[#allocation9 + $0x148] sm:$0xf]  ;;  %v9612_v6 = vld [vmem:[#allocation10] sm:$0xf]  ;;  %v7184_v7 = vld [vmem:[#allocation9 + $0xff0] sm:$0xf] }
 0x24a   : > { %2559 = vmatmul.bf16.vlgmr.msrb.gmra.mxu0 %v9586_v35  ;;  %2585 = vmatmul.bf16.vlgmr.msrb.gmra.mxu2 %v9586_v35  ;;  %v8829_v54 = vld [vmem:[#allocation9 + $0xc94] sm:$0xf] }
 0x24b   : > { %2603 = vmatpush.bf16.msra.mxu0 %v6825_v8  ;;  %2629 = vmatpush.bf16.msra.mxu2 %v6829_v9  ;;  %v6888_v8 = vld [vmem:[#allocation9 + $0xc88] sm:$0xf]  ;;  %v8768_v9 = vld [vmem:[#allocation9 + $0xd14] sm:$0xf0] }
 0x24c   : > { %v6889_v16 = vor.u32 %v8768_v9, %v6888_v8  ;;  %v8843_v8 = vld [vmem:[#allocation9 + $0x107c] sm:$0xf0]  ;;  %v8841_v9 = vld [vmem:[#allocation9 + $0xff4] sm:$0xf] }
 0x24d   : > { %2571 = vmatpush.bf16.msrb.mxu1 %v6833_v26  ;;  %2597 = vmatpush.bf16.msrb.mxu3 %v6837_v27  ;;  %v6712_v26 = vld [vmem:[#allocation9 + $0x28] sm:$0xf]  ;;  %v8724_v27 = vld [vmem:[#allocation9 + $0xb4] sm:$0xf0] }
 0x24e   : > { %v6713_v41 = vor.u32 %v8724_v27, %v6712_v26  ;;  %v7008_v27 = vld [vmem:[#allocation9 + $0x390] sm:$0xf] }
 0x24f   : > { %2604 = vmatpush.bf16.msra.mxu0 %v6809_v24  ;;  %2630 = vmatpush.bf16.msra.mxu2 %v6813_v25  ;;  %v6729_v24 = vor.u32 %v8728_v15, %v6728_v14  ;;  %v6733_v25 = vor.u32 %v8726_v18, %v6730_v19  ;;  %v7024_v14 = vld [vmem:[#allocation9 + $0x4b0] sm:$0xf]  ;;  %v8803_v15 = vld [vmem:[#allocation9 + $0x53c] sm:$0xf0]  ;;  %v7189_v18 = vor.u32 %v8841_v9, %v7186_v10  ;;  %v8801_v19 = vld [vmem:[#allocation9 + $0x4b4] sm:$0xf] }
 0x250   : > { %2572 = vmatmul.bf16.vlgmr.msrb.gmra.mxu1 %v9590_v57  ;;  %2598 = vmatmul.bf16.vlgmr.msrb.gmra.mxu3 %v9590_v57  ;;  %v7029_v26 = vor.u32 %v8801_v19, %v7026_v20  ;;  %v6962_v20 = vld [vmem:[#allocation9 + $0xc0] sm:$0xf0] }
 0x251   : > { %2616 = vmatpush.bf16.msra.mxu1 %v6953_v30  ;;  %2642 = vmatpush.bf16.msra.mxu3 %v6957_v31  ;;  %v6877_v30 = vor.u32 %v8762_v22, %v6874_v23  ;;  %v6714_v31 = vld [vmem:[#allocation9 + $0xb8] sm:$0xf0]  ;;  %v8839_v22 = vld [vmem:[#allocation9 + $0xf5c] sm:$0xf0]  ;;  %v8837_v23 = vld [vmem:[#allocation9 + $0xed4] sm:$0xf] }
 0x252   : > { %v6717_v42 = vor.u32 %v8722_v28, %v6714_v31  ;;  %v8799_v28 = vld [vmem:[#allocation9 + $0x41c] sm:$0xf0]  ;;  %v8797_v31 = vld [vmem:[#allocation9 + $0x394] sm:$0xf] }
 0x253   : > { %2605 = vmatpush.bf16.msra.mxu0 %v6793_v39  ;;  %2631 = vmatpush.bf16.msra.mxu2 %v6797_v40  ;;  %v8758_v39 = vld [vmem:[#allocation9 + $0xa4c] sm:$0xf]  ;;  %v6858_v40 = vld [vmem:[#allocation9 + $0xad8] sm:$0xf0] }
 0x254   : > { %v6861_v49 = vor.u32 %v8758_v39, %v6858_v40 }
 0x255   : > { %2617 = vmatpush.bf16.msra.mxu1 %v6937_v43  ;;  %2643 = vmatpush.bf16.msra.mxu3 %v6941_v44  ;;  %v7073_v43 = vor.u32 %v8815_v33, %v7072_v32  ;;  %v7077_v44 = vor.u32 %v8813_v34, %v7074_v36  ;;  %v7010_v32 = vld [vmem:[#allocation9 + $0x420] sm:$0xf0]  ;;  %v7152_v33 = vld [vmem:[#allocation9 + $0xdb0] sm:$0xf]  ;;  %v8835_v36 = vld [vmem:[#allocation9 + $0xe3c] sm:$0xf0] }
 0x257   : > { %2606 = vmatpush.bf16.msra.mxu0 %v6777_v51  ;;  %2632 = vmatpush.bf16.msra.mxu2 %v6781_v52  ;;  %v6840_v51 = vld [vmem:[#allocation9 + $0x928] sm:$0xf]  ;;  %v8756_v52 = vld [vmem:[#allocation9 + $0x9b4] sm:$0xf0] }
 0x258   : > { %v6841_v62 = vor.u32 %v8756_v52, %v6840_v51  ;;  %v6994_v51 = vld [vmem:[#allocation9 + $0x300] sm:$0xf0]  ;;  %v7136_v52 = vld [vmem:[#allocation9 + $0xc90] sm:$0xf] }
 0x259   : > { %2618 = vmatpush.bf16.msra.mxu1 %v6921_v55  ;;  %2644 = vmatpush.bf16.msra.mxu3 %v6925_v56  ;;  %v7200_v55 = vld [vmem:[#allocation9 + $0x1110] sm:$0xf]  ;;  %v8847_v56 = vld [vmem:[#allocation9 + $0x119c] sm:$0xf0] }
 0x25a   : > { %v7201_v3 = vor.u32 %v8847_v56, %v7200_v55  ;;  %v7138_v55 = vld [vmem:[#allocation9 + $0xd20] sm:$0xf0] }
 0x25b   : > { %2607 = vmatpush.bf16.msra.mxu0 %v6761_v0  ;;  %2633 = vmatpush.bf16.msra.mxu2 %v6765_v1  ;;  %v7040_v0 = vld [vmem:[#allocation9 + $0x5d0] sm:$0xf]  ;;  %v8807_v1 = vld [vmem:[#allocation9 + $0x65c] sm:$0xf0] }
 0x25c   : > { %v7041_v11 = vor.u32 %v8807_v1, %v7040_v0  ;;  %v7141_v0 = vor.u32 %v8829_v54, %v7138_v55  ;;  %v8789_v1 = vld [vmem:[#allocation9 + $0x154] sm:$0xf] }
 0x25d   : > { %2619 = vmatpush.bf16.msra.mxu1 %v6905_v4  ;;  %2645 = vmatpush.bf16.msra.mxu3 %v6909_v5  ;;  %v7205_v4 = vor.u32 %v8845_v58, %v7202_v59  ;;  %v7042_v5 = vld [vmem:[#allocation9 + $0x660] sm:$0xf0]  ;;  %v6993_v58 = vor.u32 %v8795_v46, %v6992_v45  ;;  %v6997_v59 = vor.u32 %v8793_v50, %v6994_v51  ;;  %v8848_v50 = vld [vmem:[#allocation9 + $0x11a4] sm:$0xf0]  ;;  %v8846_v51 = vld [vmem:[#allocation9 + $0x111c] sm:$0xf] }
 0x25f   : > { %2608 = vmatpush.bf16.msra.mxu0 %v6745_v12  ;;  %2634 = vmatpush.bf16.msra.mxu2 %v6749_v13  ;;  %v7045_v12 = vor.u32 %v8805_v2, %v7042_v5  ;;  %v1219_v13 = vperm.slane %v9612_v6, 0  ;;  %v6978_v2 = vld [vmem:[#allocation9 + $0x1e0] sm:$0xf0]  ;;  %v8827_v5 = vld [vmem:[#allocation9 + $0xbfc] sm:$0xf0] }
 0x261   : > { %2620 = vmatpush.bf16.msra.mxu1 %v6889_v16  ;;  %2646 = vmatpush.bf16.msra.mxu3 %v6893_v17  ;;  %v7185_v17 = vor.u32 %v8843_v8, %v7184_v7  ;;  %v8825_v7 = vld [vmem:[#allocation9 + $0xb74] sm:$0xf]  ;;  %v7122_v8 = vld [vmem:[#allocation9 + $0xc00] sm:$0xf0] }
 0x262   : > { %v7125_v19 = vor.u32 %v8825_v7, %v7122_v8  ;;  %v9631_v8 = vld [vmem:[#allocation10 + $0x4] sm:$0xf] }
 0x263   : > { %2609 = vmatpush.bf16.msra.mxu0 %v6729_v24  ;;  %2635 = vmatpush.bf16.msra.mxu2 %v6733_v25  ;;  %v7170_v24 = vld [vmem:[#allocation9 + $0xf60] sm:$0xf0]  ;;  %v7025_v25 = vor.u32 %v8803_v15, %v7024_v14  ;;  %v1221_v14 = vperm.slane %v9612_v6, 2  ;;  %v8787_v15 = vld [vmem:[#allocation9 + $0xbc] sm:$0xf0] }
 0x265   : > { %2621 = vmatpush.bf16.msra.mxu1 %v6873_v29  ;;  %2647 = vmatpush.bf16.msra.mxu3 %v6877_v30  ;;  %v7169_v29 = vor.u32 %v8839_v22, %v7168_v21  ;;  %v7173_v30 = vor.u32 %v8837_v23, %v7170_v24  ;;  %v7080_v21 = vld [vmem:[#allocation9 + $0x818] sm:$0xf]  ;;  %v8816_v22 = vld [vmem:[#allocation9 + $0x8a4] sm:$0xf0]  ;;  %v8814_v23 = vld [vmem:[#allocation9 + $0x81c] sm:$0xf] }
 0x266   : > { %v7082_v24 = vld [vmem:[#allocation9 + $0x8a8] sm:$0xf0] }
 0x267   : > { %2610 = vmatpush.bf16.msra.mxu0 %v6713_v41  ;;  %2636 = vmatpush.bf16.msra.mxu2 %v6717_v42  ;;  %v1556_v16 = vpop.f32.mrf.mxu0  ;;  %v1220_v42 = vperm.slane %v9612_v6, 1 }
 0x268   : > { %v1557_v34 = vadd.f32 %v1556_v16, %v1219_v13  ;;  %v6981_v13 = vor.u32 %v8789_v1, %v6978_v2  ;;  %v8785_v16 = vld [vmem:[#allocation9 + $0x34] sm:$0xf]  ;;  %v7192_v1 = vld [vmem:[#allocation9 + $0xff8] sm:$0xf] }
 0x269   : > { %2622 = vmatpush.bf16.msra.mxu1 %v6857_v48  ;;  %2648 = vmatpush.bf16.msra.mxu3 %v6861_v49  ;;  %v7153_v48 = vor.u32 %v8835_v36, %v7152_v33  ;;  %v7157_v49 = vor.u32 %v8833_v37, %v7154_v38  ;;  %v7081_v33 = vor.u32 %v8816_v22, %v7080_v21  ;;  %v7064_v36 = vld [vmem:[#allocation9 + $0x6f8] sm:$0xf]  ;;  %v8812_v37 = vld [vmem:[#allocation9 + $0x784] sm:$0xf0]  ;;  %v8810_v38 = vld [vmem:[#allocation9 + $0x6fc] sm:$0xf] }
 0x26a   : > { %2611 = vmatmul.bf16.vlgmr.msra.gmra.mxu0 %v9586_v35  ;;  %2637 = vmatmul.bf16.vlgmr.msra.gmra.mxu2 %v9586_v35  ;;  %v7065_v54 = vor.u32 %v8812_v37, %v7064_v36  ;;  %v8840_v21 = vld [vmem:[#allocation9 + $0xf64] sm:$0xf0]  ;;  %v8838_v22 = vld [vmem:[#allocation9 + $0xedc] sm:$0xf] }
 0x26b   : > { %3053 = vmatpush.bf16.msrb.mxu0 %v7073_v43  ;;  %3079 = vmatpush.bf16.msrb.mxu2 %v7077_v44  ;;  %v7009_v43 = vor.u32 %v8799_v28, %v7008_v27  ;;  %v7013_v44 = vor.u32 %v8797_v31, %v7010_v32  ;;  %v8821_v27 = vld [vmem:[#allocation9 + $0xa54] sm:$0xf]  ;;  %v7106_v28 = vld [vmem:[#allocation9 + $0xae0] sm:$0xf0]  ;;  %v1222_v31 = vperm.slane %v9612_v6, 3 }
 0x26c   : > { %v7208_v6 = vld [vmem:[#allocation9 + $0x1118] sm:$0xf]  ;;  %v8836_v36 = vld [vmem:[#allocation9 + $0xe44] sm:$0xf0]  ;;  %v8834_v37 = vld [vmem:[#allocation9 + $0xdbc] sm:$0xf] }
 0x26d   : > { %2623 = vmatpush.bf16.msra.mxu1 %v6841_v62  ;;  %2649 = vmatpush.bf16.msra.mxu3 %v6845_v63  ;;  %v1569_v39 = vpop.f32.mrf.mxu1  ;;  %v1582_v40 = vpop.f32.mrf.mxu2  ;;  %v7137_v63 = vor.u32 %v8831_v53, %v7136_v52  ;;  %v7210_v52 = vld [vmem:[#allocation9 + $0x11a8] sm:$0xf0] }
 0x26e   : > { %v1570_v41 = vadd.f32 %v1569_v39, %v1557_v34  ;;  %v1583_v56 = vadd.f32 %v1582_v40, %v1220_v42  ;;  %v7085_v34 = vor.u32 %v8814_v23, %v7082_v24  ;;  %v7066_v42 = vld [vmem:[#allocation9 + $0x788] sm:$0xf0] }
 0x26f   : > { %3054 = vmatpush.bf16.msrb.mxu0 %v7057_v60  ;;  %3080 = vmatpush.bf16.msrb.mxu2 %v7061_v61  ;;  %v1558_v47 = vpop.f32.mrf.mxu0  ;;  %v6976_v60 = vld [vmem:[#allocation9 + $0x150] sm:$0xf]  ;;  %v8791_v61 = vld [vmem:[#allocation9 + $0x1dc] sm:$0xf0]  ;;  %v7069_v55 = vor.u32 %v8810_v38, %v7066_v42  ;;  %v7178_v23 = vld [vmem:[#allocation9 + $0xf68] sm:$0xf0] }
 0x270   : > { %2624 = vmatmul.bf16.vlgmr.msra.gmra.mxu1 %v9590_v57  ;;  %2650 = vmatmul.bf16.vlgmr.msra.gmra.mxu3 %v9590_v57  ;;  %1651 = vst [vmem:[%s9621_s28] sm:$0xff] %v1570_v41  ;;  %v7109_v41 = vor.u32 %v8821_v27, %v7106_v28  ;;  %v8817_v47 = vld [vmem:[#allocation9 + $0x934] sm:$0xf]  ;;  %v7016_v28 = vld [vmem:[#allocation9 + $0x398] sm:$0xf]  ;;  %v7162_v38 = vld [vmem:[#allocation9 + $0xe48] sm:$0xf0] }
 0x271   : > { %3066 = vmatpush.bf16.msrb.mxu1 %v7201_v3  ;;  %3092 = vmatpush.bf16.msrb.mxu3 %v7205_v4  ;;  %v7120_v3 = vld [vmem:[#allocation9 + $0xb70] sm:$0xf]  ;;  %v7000_v42 = vld [vmem:[#allocation9 + $0x278] sm:$0xf] }
 0x273   : > { %3055 = vmatpush.bf16.msrb.mxu0 %v7041_v11  ;;  %3081 = vmatpush.bf16.msrb.mxu2 %v7045_v12  ;;  %v1595_v62 = vpop.f32.mrf.mxu3  ;;  %v6960_v11 = vld [vmem:[#allocation9 + $0x30] sm:$0xf]  ;;  %v6977_v12 = vor.u32 %v8791_v61, %v6976_v60  ;;  %v8808_v60 = vld [vmem:[#allocation9 + $0x664] sm:$0xf0]  ;;  %v7209_v61 = vor.u32 %v8848_v50, %v7208_v6  ;;  %v7002_v6 = vld [vmem:[#allocation9 + $0x308] sm:$0xf0] }
 0x274   : > { %v1596_v4 = vadd.f32 %v1595_v62, %v1583_v56  ;;  %v7213_v62 = vor.u32 %v8846_v51, %v7210_v52  ;;  %v8832_v51 = vld [vmem:[#allocation9 + $0xd24] sm:$0xf0]  ;;  %v8830_v52 = vld [vmem:[#allocation9 + $0xc9c] sm:$0xf] }
 0x275   : > { %3067 = vmatpush.bf16.msrb.mxu1 %v7185_v17  ;;  %3093 = vmatpush.bf16.msrb.mxu3 %v7189_v18  ;;  %v1571_v9 = vpop.f32.mrf.mxu1  ;;  %v1584_v10 = vpop.f32.mrf.mxu2  ;;  %v7121_v18 = vor.u32 %v8827_v5, %v7120_v3  ;;  %v8844_v3 = vld [vmem:[#allocation9 + $0x1084] sm:$0xf0]  ;;  %v7194_v5 = vld [vmem:[#allocation9 + $0x1088] sm:$0xf0] }
 0x276   : > { %1652 = vst [vmem:[%s9621_s28 + $0x8] sm:$0xff] %v1596_v4  ;;  %v8842_v4 = vld [vmem:[#allocation9 + $0xffc] sm:$0xf] }
 0x277   : > { %3056 = vmatpush.bf16.msrb.mxu0 %v7025_v25  ;;  %3082 = vmatpush.bf16.msrb.mxu2 %v7029_v26  ;;  %v1608_v17 = vpop.f32.mrf.mxu0  ;;  %v7104_v25 = vld [vmem:[#allocation9 + $0xa50] sm:$0xf]  ;;  %v8823_v26 = vld [vmem:[#allocation9 + $0xadc] sm:$0xf0] }
 0x278   : > { %v1609_v39 = vadd.f32 %v1608_v17, %v1221_v14  ;;  %v7105_v40 = vor.u32 %v8823_v26, %v7104_v25  ;;  %v8802_v14 = vld [vmem:[#allocation9 + $0x4bc] sm:$0xf]  ;;  %v7193_v17 = vor.u32 %v8844_v3, %v7192_v1  ;;  %v1721_v25 = vperm.slane %v9631_v8, 0  ;;  %v6986_v1 = vld [vmem:[#allocation9 + $0x1e8] sm:$0xf0] }
 0x279   : > { %3068 = vmatpush.bf16.msrb.mxu1 %v7169_v29  ;;  %3094 = vmatpush.bf16.msrb.mxu3 %v7173_v30  ;;  %v6961_v29 = vor.u32 %v8787_v15, %v6960_v11  ;;  %v6965_v30 = vor.u32 %v8785_v16, %v6962_v20  ;;  %v7176_v20 = vld [vmem:[#allocation9 + $0xed8] sm:$0xf]  ;;  %v8828_v3 = vld [vmem:[#allocation9 + $0xc04] sm:$0xf0] }
 0x27b   : > { %3057 = vmatpush.bf16.msrb.mxu0 %v7009_v43  ;;  %3083 = vmatpush.bf16.msrb.mxu2 %v7013_v44  ;;  %v1597_v32 = vpop.f32.mrf.mxu3  ;;  %v7088_v43 = vld [vmem:[#allocation9 + $0x930] sm:$0xf]  ;;  %v8819_v44 = vld [vmem:[#allocation9 + $0x9bc] sm:$0xf0] }
 0x27c   : > { %v7089_v56 = vor.u32 %v8819_v44, %v7088_v43  ;;  %v8798_v32 = vld [vmem:[#allocation9 + $0x39c] sm:$0xf]  ;;  %v8796_v43 = vld [vmem:[#allocation9 + $0x304] sm:$0xf0] }
 0x27d   : > { %3069 = vmatpush.bf16.msrb.mxu1 %v7153_v48  ;;  %3095 = vmatpush.bf16.msrb.mxu3 %v7157_v49  ;;  %v1621_v45 = vpop.f32.mrf.mxu1  ;;  %v1634_v46 = vpop.f32.mrf.mxu2  ;;  %v7090_v48 = vld [vmem:[#allocation9 + $0x9c0] sm:$0xf0] }
 0x27e   : > { %v1622_v49 = vadd.f32 %v1621_v45, %v1609_v39  ;;  %v1635_v2 = vadd.f32 %v1634_v46, %v1222_v31  ;;  %v7181_v31 = vor.u32 %v8838_v22, %v7178_v23  ;;  %v8877_v22 = vld [vmem:[#allocation9 + $0x824] sm:$0xf] }
 0x27f   : > { %3058 = vmatpush.bf16.msrb.mxu0 %v6993_v58  ;;  %3084 = vmatpush.bf16.msrb.mxu2 %v6997_v59  ;;  %v1610_v53 = vpop.f32.mrf.mxu0  ;;  %v7093_v58 = vor.u32 %v8817_v47, %v7090_v48  ;;  %v7048_v59 = vld [vmem:[#allocation9 + $0x5d8] sm:$0xf]  ;;  %v7165_v47 = vor.u32 %v8834_v37, %v7162_v38  ;;  %v8794_v48 = vld [vmem:[#allocation9 + $0x27c] sm:$0xf] }
 0x280   : > { %1653 = vst [vmem:[%s9621_s28 + $0x10] sm:$0xff] %v1622_v49  ;;  %v7049_v10 = vor.u32 %v8808_v60, %v7048_v59  ;;  %v7144_v49 = vld [vmem:[#allocation9 + $0xc98] sm:$0xf]  ;;  %v7146_v53 = vld [vmem:[#allocation9 + $0xd28] sm:$0xf0]  ;;  %v7005_v59 = vor.u32 %v8794_v48, %v7002_v6 }
 0x281   : > { %3070 = vmatpush.bf16.msrb.mxu1 %v7137_v63  ;;  %3096 = vmatpush.bf16.msrb.mxu3 %v7141_v0  ;;  %v8806_v63 = vld [vmem:[#allocation9 + $0x5dc] sm:$0xf]  ;;  %v7050_v0 = vld [vmem:[#allocation9 + $0x668] sm:$0xf0]  ;;  %v6984_v60 = vld [vmem:[#allocation9 + $0x158] sm:$0xf] }
 0x282   : > { %v7053_v11 = vor.u32 %v8806_v63, %v7050_v0  ;;  %v7145_v63 = vor.u32 %v8832_v51, %v7144_v49  ;;  %v7149_v0 = vor.u32 %v8830_v52, %v7146_v53  ;;  %v7458_v48 = vld [vmem:[#allocation9 + $0x11b0] sm:$0xf0]  ;;  %v7296_v52 = vld [vmem:[#allocation9 + $0x5e0] sm:$0xf]  ;;  %v8871_v53 = vld [vmem:[#allocation9 + $0x66c] sm:$0xf0] }
 0x283   : > { %3059 = vmatpush.bf16.msrb.mxu0 %v6977_v12  ;;  %3085 = vmatpush.bf16.msrb.mxu2 %v6981_v13  ;;  %v1647_v7 = vpop.f32.mrf.mxu3  ;;  %v7032_v12 = vld [vmem:[#allocation9 + $0x4b8] sm:$0xf]  ;;  %v8804_v13 = vld [vmem:[#allocation9 + $0x544] sm:$0xf0] }
 0x284   : > { %v1648_v9 = vadd.f32 %v1647_v7, %v1635_v2  ;;  %v7033_v26 = vor.u32 %v8804_v13, %v7032_v12  ;;  %v7128_v2 = vld [vmem:[#allocation9 + $0xb78] sm:$0xf]  ;;  %v8788_v13 = vld [vmem:[#allocation9 + $0xc4] sm:$0xf0] }
 0x285   : > { %3071 = vmatpush.bf16.msrb.mxu1 %v7121_v18  ;;  %3097 = vmatpush.bf16.msrb.mxu3 %v7125_v19  ;;  %v1623_v15 = vpop.f32.mrf.mxu1  ;;  %v1636_v16 = vpop.f32.mrf.mxu2  ;;  %v7197_v18 = vor.u32 %v8842_v4, %v7194_v5  ;;  %v7034_v19 = vld [vmem:[#allocation9 + $0x548] sm:$0xf0]  ;;  %v8826_v4 = vld [vmem:[#allocation9 + $0xb7c] sm:$0xf] }
 0x286   : > { %1654 = vst [vmem:[%s9621_s28 + $0x18] sm:$0xff] %v1648_v9  ;;  %v7037_v27 = vor.u32 %v8802_v14, %v7034_v19  ;;  %v7130_v5 = vld [vmem:[#allocation9 + $0xc08] sm:$0xf0]  ;;  %v6968_v9 = vld [vmem:[#allocation9 + $0x38] sm:$0xf] }
 0x287   : > { %3060 = vmatpush.bf16.msrb.mxu0 %v6961_v29  ;;  %3086 = vmatpush.bf16.msrb.mxu2 %v6965_v30  ;;  %v2058_v24 = vpop.f32.mrf.mxu0  ;;  %v8800_v29 = vld [vmem:[#allocation9 + $0x424] sm:$0xf0]  ;;  %v7177_v30 = vor.u32 %v8840_v21, %v7176_v20  ;;  %v8786_v14 = vld [vmem:[#allocation9 + $0x3c] sm:$0xf]  ;;  %v6970_v15 = vld [vmem:[#allocation9 + $0xc8] sm:$0xf0]  ;;  %v7133_v19 = vor.u32 %v8826_v4, %v7130_v5 }
 0x288   : > { %v2059_v44 = vadd.f32 %v2058_v24, %v1721_v25  ;;  %v7328_v20 = vld [vmem:[#allocation9 + $0x820] sm:$0xf]  ;;  %v8879_v21 = vld [vmem:[#allocation9 + $0x8ac] sm:$0xf0]  ;;  %v7330_v24 = vld [vmem:[#allocation9 + $0x8b0] sm:$0xf0] }
 0x289   : > { %3072 = vmatpush.bf16.msrb.mxu1 %v7105_v40  ;;  %3098 = vmatpush.bf16.msrb.mxu3 %v7109_v41  ;;  %v7017_v40 = vor.u32 %v8800_v29, %v7016_v28  ;;  %v7112_v25 = vld [vmem:[#allocation9 + $0xa58] sm:$0xf]  ;;  %v7114_v28 = vld [vmem:[#allocation9 + $0xae8] sm:$0xf0]  ;;  %v6969_v29 = vor.u32 %v8788_v13, %v6968_v9  ;;  %v8865_v5 = vld [vmem:[#allocation9 + $0x4c4] sm:$0xf] }
 0x28a   : > { %3061 = vmatmul.bf16.vlgmr.msrb.gmra.mxu0 %v9586_v35  ;;  %3087 = vmatmul.bf16.vlgmr.msrb.gmra.mxu2 %v9586_v35  ;;  %v7424_v9 = vld [vmem:[#allocation9 + $0xee0] sm:$0xf]  ;;  %v7426_v13 = vld [vmem:[#allocation9 + $0xf70] sm:$0xf0] }
 0x28b   : > { %3105 = vmatpush.bf16.msra.mxu0 %v7081_v33  ;;  %3131 = vmatpush.bf16.msra.mxu2 %v7085_v34  ;;  %v7018_v33 = vld [vmem:[#allocation9 + $0x428] sm:$0xf0]  ;;  %v7160_v34 = vld [vmem:[#allocation9 + $0xdb8] sm:$0xf]  ;;  %v1649_v39 = vpop.f32.mrf.mxu3 }
 0x28c   : > { %v7021_v41 = vor.u32 %v8798_v32, %v7018_v33  ;;  %v7161_v46 = vor.u32 %v8836_v36, %v7160_v34  ;;  %v7333_v32 = vor.u32 %v8877_v22, %v7330_v24  ;;  %v7312_v33 = vld [vmem:[#allocation9 + $0x700] sm:$0xf]  ;;  %v8875_v34 = vld [vmem:[#allocation9 + $0x78c] sm:$0xf0]  ;;  %v8873_v36 = vld [vmem:[#allocation9 + $0x704] sm:$0xf] }
 0x28d   : > { %3073 = vmatpush.bf16.msrb.mxu1 %v7089_v56  ;;  %3099 = vmatpush.bf16.msrb.mxu3 %v7093_v58  ;;  %v2084_v45 = vpop.f32.mrf.mxu2  ;;  %v2071_v50 = vpop.f32.mrf.mxu1  ;;  %v7001_v58 = vor.u32 %v8796_v43, %v7000_v42  ;;  %v7314_v39 = vld [vmem:[#allocation9 + $0x790] sm:$0xf0]  ;;  %v8818_v42 = vld [vmem:[#allocation9 + $0x93c] sm:$0xf]  ;;  %v7098_v43 = vld [vmem:[#allocation9 + $0x9c8] sm:$0xf0]  ;;  %v7313_v6 = vor.u32 %v8875_v34, %v7312_v33 }
 0x28e   : > { %v7317_v49 = vor.u32 %v8873_v36, %v7314_v39  ;;  %v7101_v51 = vor.u32 %v8818_v42, %v7098_v43  ;;  %v7266_v22 = vld [vmem:[#allocation9 + $0x430] sm:$0xf0]  ;;  %v8899_v24 = vld [vmem:[#allocation9 + $0xe4c] sm:$0xf0]  ;;  %v7248_v33 = vld [vmem:[#allocation9 + $0x280] sm:$0xf] }
 0x28f   : > { %3106 = vmatpush.bf16.msra.mxu0 %v7065_v54  ;;  %3132 = vmatpush.bf16.msra.mxu2 %v7069_v55  ;;  %v2072_v54 = vadd.f32 %v2071_v50, %v2059_v44  ;;  %v1722_v55 = vperm.slane %v9631_v8, 1  ;;  %v2060_v56 = vpop.f32.mrf.mxu0  ;;  %v7456_v44 = vld [vmem:[#allocation9 + $0x1120] sm:$0xf]  ;;  %v8859_v34 = vld [vmem:[#allocation9 + $0x30c] sm:$0xf0] }
 0x290   : > { %3074 = vmatmul.bf16.vlgmr.msrb.gmra.mxu1 %v9590_v57  ;;  %3100 = vmatmul.bf16.vlgmr.msrb.gmra.mxu3 %v9590_v57  ;;  %v8869_v56 = vld [vmem:[#allocation9 + $0x5e4] sm:$0xf]  ;;  %v8895_v43 = vld [vmem:[#allocation9 + $0xd2c] sm:$0xf0] }
 0x291   : > { %3118 = vmatpush.bf16.msra.mxu1 %v7209_v61  ;;  %3144 = vmatpush.bf16.msra.mxu3 %v7213_v62  ;;  %v8792_v61 = vld [vmem:[#allocation9 + $0x1e4] sm:$0xf0]  ;;  %v8790_v62 = vld [vmem:[#allocation9 + $0x15c] sm:$0xf]  ;;  %2153 = vst [vmem:[%s9621_s28 + $0x20] sm:$0xff] %v2072_v54  ;;  %v2085_v7 = vadd.f32 %v2084_v45, %v1722_v55 }
 0x292   : > { %v6989_v12 = vor.u32 %v8790_v62, %v6986_v1  ;;  %v7442_v62 = vld [vmem:[#allocation9 + $0x1090] sm:$0xf0]  ;;  %v7280_v1 = vld [vmem:[#allocation9 + $0x4c0] sm:$0xf]  ;;  %v8857_v39 = vld [vmem:[#allocation9 + $0x284] sm:$0xf] }
 0x293   : > { %3107 = vmatpush.bf16.msra.mxu0 %v7049_v10  ;;  %3133 = vmatpush.bf16.msra.mxu2 %v7053_v11  ;;  %v2097_v10 = vpop.f32.mrf.mxu3  ;;  %v6985_v11 = vor.u32 %v8792_v61, %v6984_v60  ;;  %v8907_v60 = vld [vmem:[#allocation9 + $0x108c] sm:$0xf0]  ;;  %v8905_v61 = vld [vmem:[#allocation9 + $0x1004] sm:$0xf] }
 0x294   : > { %v2098_v16 = vadd.f32 %v2097_v10, %v2085_v7  ;;  %v7445_v4 = vor.u32 %v8905_v61, %v7442_v62  ;;  %v7282_v7 = vld [vmem:[#allocation9 + $0x550] sm:$0xf0] }
 0x295   : > { %3119 = vmatpush.bf16.msra.mxu1 %v7193_v17  ;;  %3145 = vmatpush.bf16.msra.mxu3 %v7197_v18  ;;  %v2086_v17 = vpop.f32.mrf.mxu2  ;;  %v7129_v18 = vor.u32 %v8828_v3, %v7128_v2  ;;  %v2073_v23 = vpop.f32.mrf.mxu1  ;;  %v8867_v2 = vld [vmem:[#allocation9 + $0x54c] sm:$0xf0] }
 0x296   : > { %2154 = vst [vmem:[%s9621_s28 + $0x28] sm:$0xff] %v2098_v16  ;;  %v7285_v16 = vor.u32 %v8865_v5, %v7282_v7  ;;  %v7264_v17 = vld [vmem:[#allocation9 + $0x3a0] sm:$0xf]  ;;  %v7336_v7 = vld [vmem:[#allocation9 + $0x828] sm:$0xf] }
 0x297   : > { %3108 = vmatpush.bf16.msra.mxu0 %v7033_v26  ;;  %3134 = vmatpush.bf16.msra.mxu2 %v7037_v27  ;;  %v8824_v26 = vld [vmem:[#allocation9 + $0xae4] sm:$0xf0]  ;;  %v8822_v27 = vld [vmem:[#allocation9 + $0xa5c] sm:$0xf]  ;;  %v7408_v23 = vld [vmem:[#allocation9 + $0xdc0] sm:$0xf] }
 0x298   : > { %v7113_v37 = vor.u32 %v8824_v26, %v7112_v25  ;;  %v7117_v38 = vor.u32 %v8822_v27, %v7114_v28  ;;  %v8897_v25 = vld [vmem:[#allocation9 + $0xdc4] sm:$0xf]  ;;  %v7410_v26 = vld [vmem:[#allocation9 + $0xe50] sm:$0xf0] }
 0x299   : > { %3120 = vmatpush.bf16.msra.mxu1 %v7177_v30  ;;  %3146 = vmatpush.bf16.msra.mxu3 %v7181_v31  ;;  %v6973_v30 = vor.u32 %v8786_v14, %v6970_v15  ;;  %v7329_v31 = vor.u32 %v8879_v21, %v7328_v20  ;;  %v1723_v14 = vperm.slane %v9631_v8, 2  ;;  %v7281_v15 = vor.u32 %v8867_v2, %v7280_v1  ;;  %v8861_v21 = vld [vmem:[#allocation9 + $0x3a4] sm:$0xf]  ;;  %v8851_v1 = vld [vmem:[#allocation9 + $0xcc] sm:$0xf0] }
 0x29a   : > { %v8849_v2 = vld [vmem:[#allocation9 + $0x44] sm:$0xf] }
 0x29b   : > { %3109 = vmatpush.bf16.msra.mxu0 %v7017_v40  ;;  %3135 = vmatpush.bf16.msra.mxu2 %v7021_v41  ;;  %v7096_v40 = vld [vmem:[#allocation9 + $0x938] sm:$0xf]  ;;  %v8820_v41 = vld [vmem:[#allocation9 + $0x9c4] sm:$0xf0]  ;;  %v2099_v45 = vpop.f32.mrf.mxu3 }
 0x29c   : > { %v7097_v50 = vor.u32 %v8820_v41, %v7096_v40  ;;  %v7250_v40 = vld [vmem:[#allocation9 + $0x310] sm:$0xf0]  ;;  %v7392_v41 = vld [vmem:[#allocation9 + $0xca0] sm:$0xf] }
 0x29d   : > { %3121 = vmatpush.bf16.msra.mxu1 %v7161_v46  ;;  %3147 = vmatpush.bf16.msra.mxu3 %v7165_v47  ;;  %v8911_v46 = vld [vmem:[#allocation9 + $0x11ac] sm:$0xf0]  ;;  %v8909_v47 = vld [vmem:[#allocation9 + $0x1124] sm:$0xf]  ;;  %v7394_v45 = vld [vmem:[#allocation9 + $0xd30] sm:$0xf0] }
 0x29e   : > { %v7457_v54 = vor.u32 %v8911_v46, %v7456_v44  ;;  %v7461_v55 = vor.u32 %v8909_v47, %v7458_v48  ;;  %v8893_v44 = vld [vmem:[#allocation9 + $0xca4] sm:$0xf]  ;;  %v7253_v46 = vor.u32 %v8857_v39, %v7250_v40  ;;  %v7232_v47 = vld [vmem:[#allocation9 + $0x160] sm:$0xf]  ;;  %v8855_v48 = vld [vmem:[#allocation9 + $0x1ec] sm:$0xf0] }
 0x29f   : > { %3110 = vmatpush.bf16.msra.mxu0 %v7001_v58  ;;  %3136 = vmatpush.bf16.msra.mxu2 %v7005_v59  ;;  %v7298_v58 = vld [vmem:[#allocation9 + $0x670] sm:$0xf0]  ;;  %v7440_v59 = vld [vmem:[#allocation9 + $0x1000] sm:$0xf]  ;;  %v7233_v61 = vor.u32 %v8855_v48, %v7232_v47  ;;  %v7304_v40 = vld [vmem:[#allocation9 + $0x5e8] sm:$0xf] }
 0x2a0   : > { %v7441_v3 = vor.u32 %v8907_v60, %v7440_v59  ;;  %v7216_v60 = vld [vmem:[#allocation9 + $0x40] sm:$0xf]  ;;  %v8906_v47 = vld [vmem:[#allocation9 + $0x100c] sm:$0xf]  ;;  %v7450_v48 = vld [vmem:[#allocation9 + $0x1098] sm:$0xf0] }
 0x2a1   : > { %3122 = vmatpush.bf16.msra.mxu1 %v7145_v63  ;;  %3148 = vmatpush.bf16.msra.mxu3 %v7149_v0  ;;  %v7297_v63 = vor.u32 %v8871_v53, %v7296_v52  ;;  %v7301_v0 = vor.u32 %v8869_v56, %v7298_v58  ;;  %v7234_v52 = vld [vmem:[#allocation9 + $0x1f0] sm:$0xf0]  ;;  %v7376_v53 = vld [vmem:[#allocation9 + $0xb80] sm:$0xf]  ;;  %v8889_v56 = vld [vmem:[#allocation9 + $0xb84] sm:$0xf] }
 0x2a2   : > { %v7378_v58 = vld [vmem:[#allocation9 + $0xc10] sm:$0xf0] }
 0x2a3   : > { %3111 = vmatpush.bf16.msra.mxu0 %v6985_v11  ;;  %3137 = vmatpush.bf16.msra.mxu2 %v6989_v12  ;;  %v8903_v11 = vld [vmem:[#allocation9 + $0xf6c] sm:$0xf0]  ;;  %v8901_v12 = vld [vmem:[#allocation9 + $0xee4] sm:$0xf]  ;;  %v7381_v5 = vor.u32 %v8889_v56, %v7378_v58  ;;  %v7290_v56 = vld [vmem:[#allocation9 + $0x558] sm:$0xf0] }
 0x2a4   : > { %v7429_v20 = vor.u32 %v8901_v12, %v7426_v13  ;;  %v7360_v12 = vld [vmem:[#allocation9 + $0xa60] sm:$0xf]  ;;  %v8887_v13 = vld [vmem:[#allocation9 + $0xaec] sm:$0xf0]  ;;  %v7432_v58 = vld [vmem:[#allocation9 + $0xee8] sm:$0xf] }
 0x2a5   : > { %3123 = vmatpush.bf16.msra.mxu1 %v7129_v18  ;;  %3149 = vmatpush.bf16.msra.mxu3 %v7133_v19  ;;  %v8863_v18 = vld [vmem:[#allocation9 + $0x42c] sm:$0xf0]  ;;  %v7425_v19 = vor.u32 %v8903_v11, %v7424_v9  ;;  %v8880_v9 = vld [vmem:[#allocation9 + $0x8b4] sm:$0xf0]  ;;  %v7338_v11 = vld [vmem:[#allocation9 + $0x8b8] sm:$0xf0] }
 0x2a6   : > { %v7265_v28 = vor.u32 %v8863_v18, %v7264_v17  ;;  %v7337_v18 = vor.u32 %v8880_v9, %v7336_v7  ;;  %v8862_v7 = vld [vmem:[#allocation9 + $0x3ac] sm:$0xf]  ;;  %v7274_v9 = vld [vmem:[#allocation9 + $0x438] sm:$0xf0] }
 0x2a7   : > { %3112 = vmatpush.bf16.msra.mxu0 %v6969_v29  ;;  %3138 = vmatpush.bf16.msra.mxu2 %v6973_v30  ;;  %v2110_v10 = vpop.f32.mrf.mxu0  ;;  %v7269_v29 = vor.u32 %v8861_v21, %v7266_v22  ;;  %v8876_v21 = vld [vmem:[#allocation9 + $0x794] sm:$0xf0]  ;;  %v8874_v22 = vld [vmem:[#allocation9 + $0x70c] sm:$0xf] }
 0x2a8   : > { %v2111_v27 = vadd.f32 %v2110_v10, %v1723_v14  ;;  %v8878_v10 = vld [vmem:[#allocation9 + $0x82c] sm:$0xf]  ;;  %v8885_v14 = vld [vmem:[#allocation9 + $0xa64] sm:$0xf] }
 0x2a9   : > { %3124 = vmatpush.bf16.msra.mxu1 %v7113_v37  ;;  %3150 = vmatpush.bf16.msra.mxu3 %v7117_v38  ;;  %v7409_v37 = vor.u32 %v8899_v24, %v7408_v23  ;;  %v7413_v38 = vor.u32 %v8897_v25, %v7410_v26  ;;  %v7361_v23 = vor.u32 %v8887_v13, %v7360_v12  ;;  %v7322_v26 = vld [vmem:[#allocation9 + $0x798] sm:$0xf0]  ;;  %v8898_v12 = vld [vmem:[#allocation9 + $0xdcc] sm:$0xf] }
 0x2aa   : > { %3113 = vmatmul.bf16.vlgmr.msra.gmra.mxu0 %v9586_v35  ;;  %3139 = vmatmul.bf16.vlgmr.msra.gmra.mxu2 %v9586_v35  ;;  %v7418_v13 = vld [vmem:[#allocation9 + $0xe58] sm:$0xf0] }
 0x2ab   : > { %3555 = vmatpush.bf16.msrb.mxu0 %v7329_v31  ;;  %3581 = vmatpush.bf16.msrb.mxu2 %v7333_v32  ;;  %v1724_v31 = vperm.slane %v9631_v8, 3  ;;  %v7249_v8 = vor.u32 %v8859_v34, %v7248_v33  ;;  %v8910_v33 = vld [vmem:[#allocation9 + $0x112c] sm:$0xf]  ;;  %v7466_v34 = vld [vmem:[#allocation9 + $0x11b8] sm:$0xf0] }
 0x2ad   : > { %3125 = vmatpush.bf16.msra.mxu1 %v7097_v50  ;;  %3151 = vmatpush.bf16.msra.mxu3 %v7101_v51  ;;  %v2123_v30 = vpop.f32.mrf.mxu1  ;;  %v2136_v32 = vpop.f32.mrf.mxu2  ;;  %v7397_v50 = vor.u32 %v8893_v44, %v7394_v45  ;;  %v8853_v51 = vld [vmem:[#allocation9 + $0x164] sm:$0xf]  ;;  %v8870_v44 = vld [vmem:[#allocation9 + $0x5ec] sm:$0xf]  ;;  %v7306_v45 = vld [vmem:[#allocation9 + $0x678] sm:$0xf0] }
 0x2ae   : > { %v2124_v36 = vadd.f32 %v2123_v30, %v2111_v27  ;;  %v7237_v62 = vor.u32 %v8853_v51, %v7234_v52  ;;  %v7344_v27 = vld [vmem:[#allocation9 + $0x940] sm:$0xf]  ;;  %v7346_v30 = vld [vmem:[#allocation9 + $0x9d0] sm:$0xf0]  ;;  %v7288_v51 = vld [vmem:[#allocation9 + $0x4c8] sm:$0xf] }
 0x2af   : > { %3556 = vmatpush.bf16.msrb.mxu0 %v7313_v6  ;;  %3582 = vmatpush.bf16.msrb.mxu2 %v7317_v49  ;;  %v2112_v42 = vpop.f32.mrf.mxu0  ;;  %v2137_v6 = vadd.f32 %v2136_v32, %v1724_v31  ;;  %v7393_v49 = vor.u32 %v8895_v43, %v7392_v41  ;;  %v7464_v31 = vld [vmem:[#allocation9 + $0x1128] sm:$0xf]  ;;  %v8912_v32 = vld [vmem:[#allocation9 + $0x11b4] sm:$0xf0]  ;;  %v7469_v43 = vor.u32 %v8910_v33, %v7466_v34 }
 0x2b0   : > { %3126 = vmatmul.bf16.vlgmr.msra.gmra.mxu1 %v9590_v57  ;;  %3152 = vmatmul.bf16.vlgmr.msra.gmra.mxu3 %v9590_v57  ;;  %2155 = vst [vmem:[%s9621_s28 + $0x30] sm:$0xff] %v2124_v36  ;;  %v8872_v41 = vld [vmem:[#allocation9 + $0x674] sm:$0xf0]  ;;  %v7465_v42 = vor.u32 %v8912_v32, %v7464_v31  ;;  %v7402_v31 = vld [vmem:[#allocation9 + $0xd38] sm:$0xf0] }
 0x2b1   : > { %3568 = vmatpush.bf16.msrb.mxu1 %v7457_v54  ;;  %3594 = vmatpush.bf16.msrb.mxu3 %v7461_v55  ;;  %v8891_v55 = vld [vmem:[#allocation9 + $0xc0c] sm:$0xf0]  ;;  %v8868_v52 = vld [vmem:[#allocation9 + $0x554] sm:$0xf0]  ;;  %v7240_v34 = vld [vmem:[#allocation9 + $0x168] sm:$0xf] }
 0x2b3   : > { %3557 = vmatpush.bf16.msrb.mxu0 %v7297_v63  ;;  %3583 = vmatpush.bf16.msrb.mxu2 %v7301_v0  ;;  %v2149_v54 = vpop.f32.mrf.mxu3 }
 0x2b4   : > { %v2150_v59 = vadd.f32 %v2149_v54, %v2137_v6  ;;  %v7305_v6 = vor.u32 %v8872_v41, %v7304_v40  ;;  %v7453_v54 = vor.u32 %v8906_v47, %v7450_v48  ;;  %v8854_v40 = vld [vmem:[#allocation9 + $0x16c] sm:$0xf]  ;;  %v7242_v41 = vld [vmem:[#allocation9 + $0x1f8] sm:$0xf0]  ;;  %v7224_v47 = vld [vmem:[#allocation9 + $0x48] sm:$0xf] }
 0x2b5   : > { %3569 = vmatpush.bf16.msrb.mxu1 %v7441_v3  ;;  %3595 = vmatpush.bf16.msrb.mxu3 %v7445_v4  ;;  %v2125_v63 = vpop.f32.mrf.mxu1  ;;  %v2138_v0 = vpop.f32.mrf.mxu2  ;;  %v7218_v3 = vld [vmem:[#allocation9 + $0xd0] sm:$0xf0]  ;;  %v7377_v4 = vor.u32 %v8891_v55, %v7376_v53  ;;  %v8866_v55 = vld [vmem:[#allocation9 + $0x4cc] sm:$0xf] }
 0x2b6   : > { %2156 = vst [vmem:[%s9621_s28 + $0x38] sm:$0xff] %v2150_v59  ;;  %v7221_v17 = vor.u32 %v8849_v2, %v7218_v3  ;;  %v7289_v0 = vor.u32 %v8868_v52, %v7288_v51  ;;  %v7272_v2 = vld [vmem:[#allocation9 + $0x3a8] sm:$0xf]  ;;  %v8864_v3 = vld [vmem:[#allocation9 + $0x434] sm:$0xf0] }
 0x2b7   : > { %3558 = vmatpush.bf16.msrb.mxu0 %v7281_v15  ;;  %3584 = vmatpush.bf16.msrb.mxu2 %v7285_v16  ;;  %v7362_v15 = vld [vmem:[#allocation9 + $0xaf0] sm:$0xf0]  ;;  %v7217_v16 = vor.u32 %v8851_v1, %v7216_v60  ;;  %v8904_v60 = vld [vmem:[#allocation9 + $0xf74] sm:$0xf0]  ;;  %v7293_v1 = vor.u32 %v8866_v55, %v7290_v56 }
 0x2b8   : > { %v7365_v24 = vor.u32 %v8885_v14, %v7362_v15  ;;  %v7273_v15 = vor.u32 %v8864_v3, %v7272_v2  ;;  %v8852_v52 = vld [vmem:[#allocation9 + $0xd4] sm:$0xf0] }
 0x2b9   : > { %3570 = vmatpush.bf16.msrb.mxu1 %v7425_v19  ;;  %3596 = vmatpush.bf16.msrb.mxu3 %v7429_v20  ;;  %v7341_v19 = vor.u32 %v8878_v10, %v7338_v11  ;;  %v7320_v20 = vld [vmem:[#allocation9 + $0x708] sm:$0xf]  ;;  %v8900_v11 = vld [vmem:[#allocation9 + $0xe54] sm:$0xf0]  ;;  %v7225_v2 = vor.u32 %v8852_v52, %v7224_v47  ;;  %v8967_v47 = vld [vmem:[#allocation9 + $0xf7c] sm:$0xf0] }
 0x2ba   : > { %v7321_v36 = vor.u32 %v8876_v21, %v7320_v20  ;;  %v7416_v10 = vld [vmem:[#allocation9 + $0xdc8] sm:$0xf]  ;;  %v8860_v21 = vld [vmem:[#allocation9 + $0x314] sm:$0xf0] }
 0x2bb   : > { %3559 = vmatpush.bf16.msrb.mxu0 %v7265_v28  ;;  %3585 = vmatpush.bf16.msrb.mxu2 %v7269_v29  ;;  %v2151_v25 = vpop.f32.mrf.mxu3  ;;  %v8883_v28 = vld [vmem:[#allocation9 + $0x9cc] sm:$0xf0]  ;;  %v8881_v29 = vld [vmem:[#allocation9 + $0x944] sm:$0xf]  ;;  %v7256_v20 = vld [vmem:[#allocation9 + $0x288] sm:$0xf] }
 0x2bc   : > { %v7349_v39 = vor.u32 %v8881_v29, %v7346_v30  ;;  %v8858_v25 = vld [vmem:[#allocation9 + $0x28c] sm:$0xf]  ;;  %v8896_v29 = vld [vmem:[#allocation9 + $0xd34] sm:$0xf0]  ;;  %v7257_v32 = vor.u32 %v8860_v21, %v7256_v20  ;;  %v8975_v20 = vld [vmem:[#allocation9 + $0x11bc] sm:$0xf0] }
 0x2bd   : > { %3571 = vmatpush.bf16.msrb.mxu1 %v7409_v37  ;;  %3597 = vmatpush.bf16.msrb.mxu3 %v7413_v38  ;;  %v7325_v37 = vor.u32 %v8874_v22, %v7322_v26  ;;  %v7345_v38 = vor.u32 %v8883_v28, %v7344_v27  ;;  %v7258_v26 = vld [vmem:[#allocation9 + $0x318] sm:$0xf0]  ;;  %v7400_v27 = vld [vmem:[#allocation9 + $0xca8] sm:$0xf]  ;;  %v8894_v30 = vld [vmem:[#allocation9 + $0xcac] sm:$0xf] }
 0x2be   : > { %v7261_v33 = vor.u32 %v8858_v25, %v7258_v26  ;;  %v8973_v21 = vld [vmem:[#allocation9 + $0x1134] sm:$0xf] }
 0x2bf   : > { %3560 = vmatpush.bf16.msrb.mxu0 %v7249_v8  ;;  %3586 = vmatpush.bf16.msrb.mxu2 %v7253_v46  ;;  %v7448_v8 = vld [vmem:[#allocation9 + $0x1008] sm:$0xf]  ;;  %v8908_v46 = vld [vmem:[#allocation9 + $0x1094] sm:$0xf0] }
 0x2c0   : > { %v7449_v53 = vor.u32 %v8908_v46, %v7448_v8  ;;  %v7386_v8 = vld [vmem:[#allocation9 + $0xc18] sm:$0xf0] }
 0x2c1   : > { %3572 = vmatpush.bf16.msrb.mxu1 %v7393_v49  ;;  %3598 = vmatpush.bf16.msrb.mxu3 %v7397_v50  ;;  %v7309_v49 = vor.u32 %v8870_v44, %v7306_v45  ;;  %v9650_v50 = vld [vmem:[#allocation10 + $0x8] sm:$0xf]  ;;  %v8892_v44 = vld [vmem:[#allocation9 + $0xc14] sm:$0xf0]  ;;  %v8890_v45 = vld [vmem:[#allocation9 + $0xb8c] sm:$0xf] }
 0x2c2   : > { %v2223_v63 = vperm.slane %v9650_v50, 0  ;;  %v7389_v56 = vor.u32 %v8890_v45, %v7386_v8  ;;  %v7538_v45 = vld [vmem:[#allocation9 + $0x560] sm:$0xf0]  ;;  %v7680_v8 = vld [vmem:[#allocation9 + $0xef0] sm:$0xf] }
 0x2c3   : > { %3561 = vmatpush.bf16.msrb.mxu0 %v7233_v61  ;;  %3587 = vmatpush.bf16.msrb.mxu2 %v7237_v62  ;;  %v8902_v61 = vld [vmem:[#allocation9 + $0xeec] sm:$0xf]  ;;  %v7434_v62 = vld [vmem:[#allocation9 + $0xf78] sm:$0xf0] }
 0x2c5   : > { %3573 = vmatpush.bf16.msrb.mxu1 %v7377_v4  ;;  %3599 = vmatpush.bf16.msrb.mxu3 %v7381_v5  ;;  %v7433_v4 = vor.u32 %v8904_v60, %v7432_v58  ;;  %v7437_v5 = vor.u32 %v8902_v61, %v7434_v62  ;;  %v7584_v58 = vld [vmem:[#allocation9 + $0x830] sm:$0xf]  ;;  %v8941_v60 = vld [vmem:[#allocation9 + $0x834] sm:$0xf]  ;;  %v7586_v61 = vld [vmem:[#allocation9 + $0x8c0] sm:$0xf0] }
 0x2c6   : > { %v7368_v62 = vld [vmem:[#allocation9 + $0xa68] sm:$0xf] }
 0x2c7   : > { %3562 = vmatpush.bf16.msrb.mxu0 %v7217_v16  ;;  %3588 = vmatpush.bf16.msrb.mxu2 %v7221_v17  ;;  %v2560_v59 = vpop.f32.mrf.mxu0  ;;  %v7277_v16 = vor.u32 %v8862_v7, %v7274_v9  ;;  %v7568_v7 = vld [vmem:[#allocation9 + $0x710] sm:$0xf]  ;;  %v8939_v9 = vld [vmem:[#allocation9 + $0x79c] sm:$0xf0] }
 0x2c8   : > { %v2561_v14 = vadd.f32 %v2560_v59, %v2223_v63  ;;  %v8943_v59 = vld [vmem:[#allocation9 + $0x8bc] sm:$0xf0]  ;;  %v8888_v63 = vld [vmem:[#allocation9 + $0xaf4] sm:$0xf0] }
 0x2c9   : > { %3574 = vmatpush.bf16.msrb.mxu1 %v7361_v23  ;;  %3600 = vmatpush.bf16.msrb.mxu3 %v7365_v24  ;;  %v7417_v23 = vor.u32 %v8900_v11, %v7416_v10  ;;  %v7421_v24 = vor.u32 %v8898_v12, %v7418_v13  ;;  %v8937_v10 = vld [vmem:[#allocation9 + $0x714] sm:$0xf]  ;;  %v7369_v11 = vor.u32 %v8888_v63, %v7368_v62  ;;  %v7666_v63 = vld [vmem:[#allocation9 + $0xe60] sm:$0xf0] }
 0x2ca   : > { %3563 = vmatmul.bf16.vlgmr.msrb.gmra.mxu0 %v9586_v35  ;;  %3589 = vmatmul.bf16.vlgmr.msrb.gmra.mxu2 %v9586_v35  ;;  %v8961_v62 = vld [vmem:[#allocation9 + $0xdd4] sm:$0xf] }
 0x2cb   : > { %3607 = vmatpush.bf16.msra.mxu0 %v7337_v18  ;;  %3633 = vmatpush.bf16.msra.mxu2 %v7341_v19  ;;  %v2224_v18 = vperm.slane %v9650_v50, 1 }
 0x2cd   : > { %3575 = vmatpush.bf16.msrb.mxu1 %v7345_v38  ;;  %3601 = vmatpush.bf16.msrb.mxu3 %v7349_v39  ;;  %v2573_v17 = vpop.f32.mrf.mxu1  ;;  %v2586_v19 = vpop.f32.mrf.mxu2  ;;  %v7401_v38 = vor.u32 %v8896_v29, %v7400_v27  ;;  %v7405_v39 = vor.u32 %v8894_v30, %v7402_v31  ;;  %v7552_v27 = vld [vmem:[#allocation9 + $0x5f0] sm:$0xf]  ;;  %v8933_v31 = vld [vmem:[#allocation9 + $0x5f4] sm:$0xf] }
 0x2ce   : > { %v2574_v22 = vadd.f32 %v2573_v17, %v2561_v14  ;;  %v7570_v14 = vld [vmem:[#allocation9 + $0x7a0] sm:$0xf0]  ;;  %v8882_v17 = vld [vmem:[#allocation9 + $0x94c] sm:$0xf] }
 0x2cf   : > { %3608 = vmatpush.bf16.msra.mxu0 %v7321_v36  ;;  %3634 = vmatpush.bf16.msra.mxu2 %v7325_v37  ;;  %v2562_v28 = vpop.f32.mrf.mxu0  ;;  %v8856_v36 = vld [vmem:[#allocation9 + $0x1f4] sm:$0xf0]  ;;  %v2587_v37 = vadd.f32 %v2586_v19, %v2224_v18  ;;  %v7354_v18 = vld [vmem:[#allocation9 + $0x9d8] sm:$0xf0]  ;;  %v7712_v19 = vld [vmem:[#allocation9 + $0x1130] sm:$0xf] }
 0x2d0   : > { %3576 = vmatmul.bf16.vlgmr.msrb.gmra.mxu1 %v9590_v57  ;;  %3602 = vmatmul.bf16.vlgmr.msrb.gmra.mxu3 %v9590_v57  ;;  %2655 = vst [vmem:[%s9621_s28 + $0x40] sm:$0xff] %v2574_v22  ;;  %v7241_v48 = vor.u32 %v8856_v36, %v7240_v34  ;;  %v7714_v22 = vld [vmem:[#allocation9 + $0x11c0] sm:$0xf0]  ;;  %v7357_v26 = vor.u32 %v8882_v17, %v7354_v18  ;;  %v8935_v28 = vld [vmem:[#allocation9 + $0x67c] sm:$0xf0] }
 0x2d1   : > { %3620 = vmatpush.bf16.msra.mxu1 %v7465_v42  ;;  %3646 = vmatpush.bf16.msra.mxu3 %v7469_v43  ;;  %v7384_v42 = vld [vmem:[#allocation9 + $0xb88] sm:$0xf]  ;;  %v7713_v29 = vor.u32 %v8975_v20, %v7712_v19  ;;  %v7717_v30 = vor.u32 %v8973_v21, %v7714_v22  ;;  %v8971_v34 = vld [vmem:[#allocation9 + $0x109c] sm:$0xf0]  ;;  %v8969_v36 = vld [vmem:[#allocation9 + $0x1014] sm:$0xf] }
 0x2d2   : > { %v7385_v55 = vor.u32 %v8892_v44, %v7384_v42  ;;  %v8929_v44 = vld [vmem:[#allocation9 + $0x4d4] sm:$0xf]  ;;  %v8959_v17 = vld [vmem:[#allocation9 + $0xd3c] sm:$0xf0]  ;;  %v7650_v19 = vld [vmem:[#allocation9 + $0xd40] sm:$0xf0] }
 0x2d3   : > { %3609 = vmatpush.bf16.msra.mxu0 %v7305_v6  ;;  %3635 = vmatpush.bf16.msra.mxu2 %v7309_v49  ;;  %v2599_v43 = vpop.f32.mrf.mxu3  ;;  %v7245_v6 = vor.u32 %v8854_v40, %v7242_v41  ;;  %v7536_v40 = vld [vmem:[#allocation9 + $0x4d0] sm:$0xf]  ;;  %v8931_v41 = vld [vmem:[#allocation9 + $0x55c] sm:$0xf0]  ;;  %v7541_v52 = vor.u32 %v8929_v44, %v7538_v45  ;;  %v8957_v18 = vld [vmem:[#allocation9 + $0xcb4] sm:$0xf] }
 0x2d4   : > { %v2600_v46 = vadd.f32 %v2599_v43, %v2587_v37  ;;  %v7698_v37 = vld [vmem:[#allocation9 + $0x10a0] sm:$0xf0]  ;;  %v7488_v21 = vld [vmem:[#allocation9 + $0x170] sm:$0xf]  ;;  %v8919_v22 = vld [vmem:[#allocation9 + $0x1fc] sm:$0xf0] }
 0x2d5   : > { %3621 = vmatpush.bf16.msra.mxu1 %v7449_v53  ;;  %3647 = vmatpush.bf16.msra.mxu3 %v7453_v54  ;;  %v2575_v49 = vpop.f32.mrf.mxu1  ;;  %v2588_v51 = vpop.f32.mrf.mxu2  ;;  %v8850_v53 = vld [vmem:[#allocation9 + $0x4c] sm:$0xf]  ;;  %v7226_v54 = vld [vmem:[#allocation9 + $0xd8] sm:$0xf0]  ;;  %v7701_v43 = vor.u32 %v8969_v36, %v7698_v37  ;;  %v7489_v36 = vor.u32 %v8919_v22, %v7488_v21  ;;  %v7592_v45 = vld [vmem:[#allocation9 + $0x838] sm:$0xf] }
 0x2d6   : > { %2656 = vst [vmem:[%s9621_s28 + $0x48] sm:$0xff] %v2600_v46  ;;  %v7229_v3 = vor.u32 %v8850_v53, %v7226_v54  ;;  %v2225_v49 = vperm.slane %v9650_v50, 2  ;;  %v7537_v51 = vor.u32 %v8931_v41, %v7536_v40  ;;  %v7520_v53 = vld [vmem:[#allocation9 + $0x3b0] sm:$0xf]  ;;  %v8927_v54 = vld [vmem:[#allocation9 + $0x43c] sm:$0xf0] }
 0x2d7   : > { %3610 = vmatpush.bf16.msra.mxu0 %v7289_v0  ;;  %3636 = vmatpush.bf16.msra.mxu2 %v7293_v1  ;;  %v8886_v0 = vld [vmem:[#allocation9 + $0xa6c] sm:$0xf]  ;;  %v7370_v1 = vld [vmem:[#allocation9 + $0xaf8] sm:$0xf0]  ;;  %v8915_v40 = vld [vmem:[#allocation9 + $0xdc] sm:$0xf0] }
 0x2d8   : > { %v7373_v12 = vor.u32 %v8886_v0, %v7370_v1  ;;  %v7521_v1 = vor.u32 %v8927_v54, %v7520_v53  ;;  %v8913_v41 = vld [vmem:[#allocation9 + $0x54] sm:$0xf]  ;;  %v8970_v21 = vld [vmem:[#allocation9 + $0x101c] sm:$0xf]  ;;  %v7706_v22 = vld [vmem:[#allocation9 + $0x10a8] sm:$0xf0] }
 0x2d9   : > { %3622 = vmatpush.bf16.msra.mxu1 %v7433_v4  ;;  %3648 = vmatpush.bf16.msra.mxu3 %v7437_v5  ;;  %v7585_v4 = vor.u32 %v8943_v59, %v7584_v58  ;;  %v7589_v5 = vor.u32 %v8941_v60, %v7586_v61  ;;  %v8925_v58 = vld [vmem:[#allocation9 + $0x3b4] sm:$0xf]  ;;  %v7522_v59 = vld [vmem:[#allocation9 + $0x440] sm:$0xf0]  ;;  %v7664_v60 = vld [vmem:[#allocation9 + $0xdd0] sm:$0xf] }
 0x2da   : > { %v8963_v61 = vld [vmem:[#allocation9 + $0xe5c] sm:$0xf0] }
 0x2db   : > { %3611 = vmatpush.bf16.msra.mxu0 %v7273_v15  ;;  %3637 = vmatpush.bf16.msra.mxu2 %v7277_v16  ;;  %v2601_v13 = vpop.f32.mrf.mxu3  ;;  %v7352_v15 = vld [vmem:[#allocation9 + $0x948] sm:$0xf]  ;;  %v8884_v16 = vld [vmem:[#allocation9 + $0x9d4] sm:$0xf0] }
 0x2dc   : > { %v7353_v25 = vor.u32 %v8884_v16, %v7352_v15  ;;  %v8921_v13 = vld [vmem:[#allocation9 + $0x294] sm:$0xf]  ;;  %v7648_v15 = vld [vmem:[#allocation9 + $0xcb0] sm:$0xf] }
 0x2dd   : > { %3623 = vmatpush.bf16.msra.mxu1 %v7417_v23  ;;  %3649 = vmatpush.bf16.msra.mxu3 %v7421_v24  ;;  %v7569_v23 = vor.u32 %v8939_v9, %v7568_v7  ;;  %v7573_v24 = vor.u32 %v8937_v10, %v7570_v14  ;;  %v7504_v7 = vld [vmem:[#allocation9 + $0x290] sm:$0xf]  ;;  %v8923_v9 = vld [vmem:[#allocation9 + $0x31c] sm:$0xf0]  ;;  %v7506_v14 = vld [vmem:[#allocation9 + $0x320] sm:$0xf0] }
 0x2de   : > { %v7509_v20 = vor.u32 %v8921_v13, %v7506_v14  ;;  %v7560_v14 = vld [vmem:[#allocation9 + $0x5f8] sm:$0xf] }
 0x2df   : > { %3612 = vmatpush.bf16.msra.mxu0 %v7257_v32  ;;  %3638 = vmatpush.bf16.msra.mxu2 %v7261_v33  ;;  %v7554_v32 = vld [vmem:[#allocation9 + $0x680] sm:$0xf0]  ;;  %v7696_v33 = vld [vmem:[#allocation9 + $0x1010] sm:$0xf] }
 0x2e0   : > { %v7697_v42 = vor.u32 %v8971_v34, %v7696_v33  ;;  %v7472_v34 = vld [vmem:[#allocation9 + $0x50] sm:$0xf] }
 0x2e1   : > { %3624 = vmatpush.bf16.msra.mxu1 %v7401_v38  ;;  %3650 = vmatpush.bf16.msra.mxu3 %v7405_v39  ;;  %v7553_v38 = vor.u32 %v8935_v28, %v7552_v27  ;;  %v7557_v39 = vor.u32 %v8933_v31, %v7554_v32  ;;  %v7490_v27 = vld [vmem:[#allocation9 + $0x200] sm:$0xf0]  ;;  %v7632_v28 = vld [vmem:[#allocation9 + $0xb90] sm:$0xf]  ;;  %v8953_v31 = vld [vmem:[#allocation9 + $0xb94] sm:$0xf] }
 0x2e2   : > { %v7634_v32 = vld [vmem:[#allocation9 + $0xc20] sm:$0xf0] }
 0x2e3   : > { %3613 = vmatpush.bf16.msra.mxu0 %v7241_v48  ;;  %3639 = vmatpush.bf16.msra.mxu2 %v7245_v6  ;;  %v8965_v48 = vld [vmem:[#allocation9 + $0xef4] sm:$0xf]  ;;  %v7682_v6 = vld [vmem:[#allocation9 + $0xf80] sm:$0xf0]  ;;  %v7637_v44 = vor.u32 %v8953_v31, %v7634_v32  ;;  %v7546_v31 = vld [vmem:[#allocation9 + $0x568] sm:$0xf0] }
 0x2e4   : > { %v7688_v32 = vld [vmem:[#allocation9 + $0xef8] sm:$0xf] }
 0x2e5   : > { %3625 = vmatpush.bf16.msra.mxu1 %v7385_v55  ;;  %3651 = vmatpush.bf16.msra.mxu3 %v7389_v56  ;;  %v7681_v55 = vor.u32 %v8967_v47, %v7680_v8  ;;  %v7685_v56 = vor.u32 %v8965_v48, %v7682_v6  ;;  %v8944_v8 = vld [vmem:[#allocation9 + $0x8c4] sm:$0xf0]  ;;  %v7594_v47 = vld [vmem:[#allocation9 + $0x8c8] sm:$0xf0]  ;;  %v7616_v48 = vld [vmem:[#allocation9 + $0xa70] sm:$0xf] }
 0x2e6   : > { %v8951_v6 = vld [vmem:[#allocation9 + $0xafc] sm:$0xf0]  ;;  %v7593_v54 = vor.u32 %v8944_v8, %v7592_v45  ;;  %v8926_v45 = vld [vmem:[#allocation9 + $0x3bc] sm:$0xf]  ;;  %v7530_v8 = vld [vmem:[#allocation9 + $0x448] sm:$0xf0] }
 0x2e7   : > { %3614 = vmatpush.bf16.msra.mxu0 %v7225_v2  ;;  %3640 = vmatpush.bf16.msra.mxu2 %v7229_v3  ;;  %v2612_v46 = vpop.f32.mrf.mxu0  ;;  %v7525_v2 = vor.u32 %v8925_v58, %v7522_v59  ;;  %v8940_v58 = vld [vmem:[#allocation9 + $0x7a4] sm:$0xf0]  ;;  %v8938_v59 = vld [vmem:[#allocation9 + $0x71c] sm:$0xf] }
 0x2e8   : > { %v2613_v0 = vadd.f32 %v2612_v46, %v2225_v49  ;;  %v8942_v46 = vld [vmem:[#allocation9 + $0x83c] sm:$0xf]  ;;  %v8949_v49 = vld [vmem:[#allocation9 + $0xa74] sm:$0xf] }
 0x2e9   : > { %3626 = vmatpush.bf16.msra.mxu1 %v7369_v11  ;;  %3652 = vmatpush.bf16.msra.mxu3 %v7373_v12  ;;  %v7665_v11 = vor.u32 %v8963_v61, %v7664_v60  ;;  %v7669_v12 = vor.u32 %v8961_v62, %v7666_v63  ;;  %v7617_v60 = vor.u32 %v8951_v6, %v7616_v48  ;;  %v7578_v63 = vld [vmem:[#allocation9 + $0x7a8] sm:$0xf0]  ;;  %v8962_v48 = vld [vmem:[#allocation9 + $0xddc] sm:$0xf] }
 0x2ea   : > { %3615 = vmatmul.bf16.vlgmr.msra.gmra.mxu0 %v9586_v35  ;;  %3641 = vmatmul.bf16.vlgmr.msra.gmra.mxu2 %v9586_v35  ;;  %v7674_v6 = vld [vmem:[#allocation9 + $0xe68] sm:$0xf0] }
 0x2eb   : > { %4057 = vmatpush.bf16.msrb.mxu0 %v7585_v4  ;;  %4083 = vmatpush.bf16.msrb.mxu2 %v7589_v5  ;;  %v2226_v4 = vperm.slane %v9650_v50, 3  ;;  %v7505_v50 = vor.u32 %v8923_v9, %v7504_v7  ;;  %v8974_v7 = vld [vmem:[#allocation9 + $0x113c] sm:$0xf]  ;;  %v7722_v9 = vld [vmem:[#allocation9 + $0x11c8] sm:$0xf0] }
 0x2ed   : > { %3627 = vmatpush.bf16.msra.mxu1 %v7353_v25  ;;  %3653 = vmatpush.bf16.msra.mxu3 %v7357_v26  ;;  %v2625_v3 = vpop.f32.mrf.mxu1  ;;  %v2638_v5 = vpop.f32.mrf.mxu2  ;;  %v7653_v25 = vor.u32 %v8957_v18, %v7650_v19  ;;  %v8917_v26 = vld [vmem:[#allocation9 + $0x174] sm:$0xf]  ;;  %v8934_v18 = vld [vmem:[#allocation9 + $0x5fc] sm:$0xf]  ;;  %v7562_v19 = vld [vmem:[#allocation9 + $0x688] sm:$0xf0] }
 0x2ee   : > { %v2626_v10 = vadd.f32 %v2625_v3, %v2613_v0  ;;  %v7493_v37 = vor.u32 %v8917_v26, %v7490_v27  ;;  %v7600_v0 = vld [vmem:[#allocation9 + $0x950] sm:$0xf]  ;;  %v7602_v3 = vld [vmem:[#allocation9 + $0x9e0] sm:$0xf0]  ;;  %v7544_v26 = vld [vmem:[#allocation9 + $0x4d8] sm:$0xf] }
 0x2ef   : > { %4058 = vmatpush.bf16.msrb.mxu0 %v7569_v23  ;;  %4084 = vmatpush.bf16.msrb.mxu2 %v7573_v24  ;;  %v2614_v16 = vpop.f32.mrf.mxu0  ;;  %v2639_v23 = vadd.f32 %v2638_v5, %v2226_v4  ;;  %v7649_v24 = vor.u32 %v8959_v17, %v7648_v15  ;;  %v7720_v4 = vld [vmem:[#allocation9 + $0x1138] sm:$0xf]  ;;  %v8976_v5 = vld [vmem:[#allocation9 + $0x11c4] sm:$0xf0]  ;;  %v7725_v17 = vor.u32 %v8974_v7, %v7722_v9 }
 0x2f0   : > { %3628 = vmatmul.bf16.vlgmr.msra.gmra.mxu1 %v9590_v57  ;;  %3654 = vmatmul.bf16.vlgmr.msra.gmra.mxu3 %v9590_v57  ;;  %2657 = vst [vmem:[%s9621_s28 + $0x50] sm:$0xff] %v2626_v10  ;;  %v8936_v15 = vld [vmem:[#allocation9 + $0x684] sm:$0xf0]  ;;  %v7721_v16 = vor.u32 %v8976_v5, %v7720_v4  ;;  %v7658_v4 = vld [vmem:[#allocation9 + $0xd48] sm:$0xf0] }
 0x2f1   : > { %4070 = vmatpush.bf16.msrb.mxu1 %v7713_v29  ;;  %4096 = vmatpush.bf16.msrb.mxu3 %v7717_v30  ;;  %v8955_v30 = vld [vmem:[#allocation9 + $0xc1c] sm:$0xf0]  ;;  %v8932_v27 = vld [vmem:[#allocation9 + $0x564] sm:$0xf0]  ;;  %v7496_v9 = vld [vmem:[#allocation9 + $0x178] sm:$0xf] }
 0x2f3   : > { %4059 = vmatpush.bf16.msrb.mxu0 %v7553_v38  ;;  %4085 = vmatpush.bf16.msrb.mxu2 %v7557_v39  ;;  %v2651_v29 = vpop.f32.mrf.mxu3 }
 0x2f4   : > { %v2652_v33 = vadd.f32 %v2651_v29, %v2639_v23  ;;  %v7561_v23 = vor.u32 %v8936_v15, %v7560_v14  ;;  %v7709_v29 = vor.u32 %v8970_v21, %v7706_v22  ;;  %v8918_v14 = vld [vmem:[#allocation9 + $0x17c] sm:$0xf]  ;;  %v7498_v15 = vld [vmem:[#allocation9 + $0x208] sm:$0xf0]  ;;  %v7480_v21 = vld [vmem:[#allocation9 + $0x58] sm:$0xf] }
 0x2f5   : > { %4071 = vmatpush.bf16.msrb.mxu1 %v7697_v42  ;;  %4097 = vmatpush.bf16.msrb.mxu3 %v7701_v43  ;;  %v2627_v38 = vpop.f32.mrf.mxu1  ;;  %v2640_v39 = vpop.f32.mrf.mxu2  ;;  %v7474_v42 = vld [vmem:[#allocation9 + $0xe0] sm:$0xf0]  ;;  %v7633_v43 = vor.u32 %v8955_v30, %v7632_v28  ;;  %v8930_v30 = vld [vmem:[#allocation9 + $0x4dc] sm:$0xf] }
 0x2f6   : > { %2658 = vst [vmem:[%s9621_s28 + $0x58] sm:$0xff] %v2652_v33  ;;  %v7477_v53 = vor.u32 %v8913_v41, %v7474_v42  ;;  %v7545_v39 = vor.u32 %v8932_v27, %v7544_v26  ;;  %v7528_v41 = vld [vmem:[#allocation9 + $0x3b8] sm:$0xf]  ;;  %v8928_v42 = vld [vmem:[#allocation9 + $0x444] sm:$0xf0] }
 0x2f7   : > { %4060 = vmatpush.bf16.msrb.mxu0 %v7537_v51  ;;  %4086 = vmatpush.bf16.msrb.mxu2 %v7541_v52  ;;  %v7618_v51 = vld [vmem:[#allocation9 + $0xb00] sm:$0xf0]  ;;  %v7473_v52 = vor.u32 %v8915_v40, %v7472_v34  ;;  %v8968_v34 = vld [vmem:[#allocation9 + $0xf84] sm:$0xf0]  ;;  %v7549_v40 = vor.u32 %v8930_v30, %v7546_v31 }
 0x2f8   : > { %v7621_v61 = vor.u32 %v8949_v49, %v7618_v51  ;;  %v7529_v51 = vor.u32 %v8928_v42, %v7528_v41  ;;  %v8916_v27 = vld [vmem:[#allocation9 + $0xe4] sm:$0xf0] }
 0x2f9   : > { %4072 = vmatpush.bf16.msrb.mxu1 %v7681_v55  ;;  %4098 = vmatpush.bf16.msrb.mxu3 %v7685_v56  ;;  %v7597_v55 = vor.u32 %v8942_v46, %v7594_v47  ;;  %v7576_v56 = vld [vmem:[#allocation9 + $0x718] sm:$0xf]  ;;  %v8964_v47 = vld [vmem:[#allocation9 + $0xe64] sm:$0xf0]  ;;  %v7481_v41 = vor.u32 %v8916_v27, %v7480_v21  ;;  %v9031_v21 = vld [vmem:[#allocation9 + $0xf8c] sm:$0xf0] }
 0x2fa   : > { %v7577_v10 = vor.u32 %v8940_v58, %v7576_v56  ;;  %v7672_v46 = vld [vmem:[#allocation9 + $0xdd8] sm:$0xf]  ;;  %v8924_v58 = vld [vmem:[#allocation9 + $0x324] sm:$0xf0] }
 0x2fb   : > { %4061 = vmatpush.bf16.msrb.mxu0 %v7521_v1  ;;  %4087 = vmatpush.bf16.msrb.mxu2 %v7525_v2  ;;  %v2653_v62 = vpop.f32.mrf.mxu3  ;;  %v8947_v1 = vld [vmem:[#allocation9 + $0x9dc] sm:$0xf0]  ;;  %v8945_v2 = vld [vmem:[#allocation9 + $0x954] sm:$0xf]  ;;  %v7512_v56 = vld [vmem:[#allocation9 + $0x298] sm:$0xf] }
 0x2fc   : > { %v7605_v13 = vor.u32 %v8945_v2, %v7602_v3  ;;  %v8922_v62 = vld [vmem:[#allocation9 + $0x29c] sm:$0xf]  ;;  %v8960_v2 = vld [vmem:[#allocation9 + $0xd44] sm:$0xf0]  ;;  %v7513_v5 = vor.u32 %v8924_v58, %v7512_v56  ;;  %v9039_v56 = vld [vmem:[#allocation9 + $0x11cc] sm:$0xf0] }
 0x2fd   : > { %4073 = vmatpush.bf16.msrb.mxu1 %v7665_v11  ;;  %4099 = vmatpush.bf16.msrb.mxu3 %v7669_v12  ;;  %v7581_v11 = vor.u32 %v8938_v59, %v7578_v63  ;;  %v7601_v12 = vor.u32 %v8947_v1, %v7600_v0  ;;  %v7514_v63 = vld [vmem:[#allocation9 + $0x328] sm:$0xf0]  ;;  %v7656_v0 = vld [vmem:[#allocation9 + $0xcb8] sm:$0xf]  ;;  %v8958_v3 = vld [vmem:[#allocation9 + $0xcbc] sm:$0xf] }
 0x2fe   : > { %v7517_v7 = vor.u32 %v8922_v62, %v7514_v63  ;;  %v9037_v58 = vld [vmem:[#allocation9 + $0x1144] sm:$0xf] }
 0x2ff   : > { %4062 = vmatpush.bf16.msrb.mxu0 %v7505_v50  ;;  %4088 = vmatpush.bf16.msrb.mxu2 %v7509_v20  ;;  %v7704_v50 = vld [vmem:[#allocation9 + $0x1018] sm:$0xf]  ;;  %v8972_v20 = vld [vmem:[#allocation9 + $0x10a4] sm:$0xf0] }
 0x300   : > { %v7705_v28 = vor.u32 %v8972_v20, %v7704_v50  ;;  %v7642_v50 = vld [vmem:[#allocation9 + $0xc28] sm:$0xf0] }
 0x301   : > { %4074 = vmatpush.bf16.msrb.mxu1 %v7649_v24  ;;  %4100 = vmatpush.bf16.msrb.mxu3 %v7653_v25  ;;  %v7565_v24 = vor.u32 %v8934_v18, %v7562_v19  ;;  %v9668_v25 = vld [vmem:[#allocation10 + $0xc] sm:$0xf]  ;;  %v8956_v18 = vld [vmem:[#allocation9 + $0xc24] sm:$0xf0]  ;;  %v8954_v19 = vld [vmem:[#allocation9 + $0xb9c] sm:$0xf] }
 0x302   : > { %v2725_v38 = vperm.slane %v9668_v25, 0  ;;  %v7645_v31 = vor.u32 %v8954_v19, %v7642_v50  ;;  %v7794_v19 = vld [vmem:[#allocation9 + $0x570] sm:$0xf0]  ;;  %v7936_v50 = vld [vmem:[#allocation9 + $0xf00] sm:$0xf] }
 0x303   : > { %4063 = vmatpush.bf16.msrb.mxu0 %v7489_v36  ;;  %4089 = vmatpush.bf16.msrb.mxu2 %v7493_v37  ;;  %v8966_v36 = vld [vmem:[#allocation9 + $0xefc] sm:$0xf]  ;;  %v7690_v37 = vld [vmem:[#allocation9 + $0xf88] sm:$0xf0] }
 0x305   : > { %4075 = vmatpush.bf16.msrb.mxu1 %v7633_v43  ;;  %4101 = vmatpush.bf16.msrb.mxu3 %v7637_v44  ;;  %v7689_v43 = vor.u32 %v8968_v34, %v7688_v32  ;;  %v7693_v44 = vor.u32 %v8966_v36, %v7690_v37  ;;  %v7840_v32 = vld [vmem:[#allocation9 + $0x840] sm:$0xf]  ;;  %v9005_v34 = vld [vmem:[#allocation9 + $0x844] sm:$0xf]  ;;  %v7842_v36 = vld [vmem:[#allocation9 + $0x8d0] sm:$0xf0] }
 0x306   : > { %v7624_v37 = vld [vmem:[#allocation9 + $0xa78] sm:$0xf] }
 0x307   : > { %4064 = vmatpush.bf16.msrb.mxu0 %v7473_v52  ;;  %4090 = vmatpush.bf16.msrb.mxu2 %v7477_v53  ;;  %v3062_v33 = vpop.f32.mrf.mxu0  ;;  %v7533_v52 = vor.u32 %v8926_v45, %v7530_v8  ;;  %v7824_v45 = vld [vmem:[#allocation9 + $0x720] sm:$0xf]  ;;  %v9003_v8 = vld [vmem:[#allocation9 + $0x7ac] sm:$0xf0] }
 0x308   : > { %v3063_v49 = vadd.f32 %v3062_v33, %v2725_v38  ;;  %v9007_v33 = vld [vmem:[#allocation9 + $0x8cc] sm:$0xf0]  ;;  %v8952_v38 = vld [vmem:[#allocation9 + $0xb04] sm:$0xf0] }
 0x309   : > { %4076 = vmatpush.bf16.msrb.mxu1 %v7617_v60  ;;  %4102 = vmatpush.bf16.msrb.mxu3 %v7621_v61  ;;  %v7673_v60 = vor.u32 %v8964_v47, %v7672_v46  ;;  %v7677_v61 = vor.u32 %v8962_v48, %v7674_v6  ;;  %v9001_v46 = vld [vmem:[#allocation9 + $0x724] sm:$0xf]  ;;  %v7625_v47 = vor.u32 %v8952_v38, %v7624_v37  ;;  %v7922_v38 = vld [vmem:[#allocation9 + $0xe70] sm:$0xf0] }
 0x30a   : > { %4065 = vmatmul.bf16.vlgmr.msrb.gmra.mxu0 %v9586_v35  ;;  %4091 = vmatmul.bf16.vlgmr.msrb.gmra.mxu2 %v9586_v35  ;;  %v9025_v37 = vld [vmem:[#allocation9 + $0xde4] sm:$0xf] }
 0x30b   : > { %4109 = vmatpush.bf16.msra.mxu0 %v7593_v54  ;;  %4135 = vmatpush.bf16.msra.mxu2 %v7597_v55  ;;  %v2726_v54 = vperm.slane %v9668_v25, 1 }
 0x30d   : > { %4077 = vmatpush.bf16.msrb.mxu1 %v7601_v12  ;;  %4103 = vmatpush.bf16.msrb.mxu3 %v7605_v13  ;;  %v3075_v53 = vpop.f32.mrf.mxu1  ;;  %v3088_v55 = vpop.f32.mrf.mxu2  ;;  %v7657_v12 = vor.u32 %v8960_v2, %v7656_v0  ;;  %v7661_v13 = vor.u32 %v8958_v3, %v7658_v4  ;;  %v7808_v0 = vld [vmem:[#allocation9 + $0x600] sm:$0xf]  ;;  %v8997_v4 = vld [vmem:[#allocation9 + $0x604] sm:$0xf] }
 0x30e   : > { %v3076_v59 = vadd.f32 %v3075_v53, %v3063_v49  ;;  %v7826_v49 = vld [vmem:[#allocation9 + $0x7b0] sm:$0xf0]  ;;  %v8946_v53 = vld [vmem:[#allocation9 + $0x95c] sm:$0xf] }
 0x30f   : > { %4110 = vmatpush.bf16.msra.mxu0 %v7577_v10  ;;  %4136 = vmatpush.bf16.msra.mxu2 %v7581_v11  ;;  %v3064_v1 = vpop.f32.mrf.mxu0  ;;  %v8920_v10 = vld [vmem:[#allocation9 + $0x204] sm:$0xf0]  ;;  %v3089_v11 = vadd.f32 %v3088_v55, %v2726_v54  ;;  %v7610_v54 = vld [vmem:[#allocation9 + $0x9e8] sm:$0xf0]  ;;  %v7968_v55 = vld [vmem:[#allocation9 + $0x1140] sm:$0xf] }
 0x310   : > { %4078 = vmatmul.bf16.vlgmr.msrb.gmra.mxu1 %v9590_v57  ;;  %4104 = vmatmul.bf16.vlgmr.msrb.gmra.mxu3 %v9590_v57  ;;  %3157 = vst [vmem:[%s9621_s28 + $0x60] sm:$0xff] %v3076_v59  ;;  %v7497_v22 = vor.u32 %v8920_v10, %v7496_v9  ;;  %v7970_v59 = vld [vmem:[#allocation9 + $0x11d0] sm:$0xf0]  ;;  %v7613_v63 = vor.u32 %v8946_v53, %v7610_v54  ;;  %v8999_v1 = vld [vmem:[#allocation9 + $0x68c] sm:$0xf0] }
 0x311   : > { %4122 = vmatpush.bf16.msra.mxu1 %v7721_v16  ;;  %4148 = vmatpush.bf16.msra.mxu3 %v7725_v17  ;;  %v7640_v16 = vld [vmem:[#allocation9 + $0xb98] sm:$0xf]  ;;  %v7969_v2 = vor.u32 %v9039_v56, %v7968_v55  ;;  %v7973_v3 = vor.u32 %v9037_v58, %v7970_v59  ;;  %v9035_v9 = vld [vmem:[#allocation9 + $0x10ac] sm:$0xf0]  ;;  %v9033_v10 = vld [vmem:[#allocation9 + $0x1024] sm:$0xf] }
 0x312   : > { %v7641_v30 = vor.u32 %v8956_v18, %v7640_v16  ;;  %v8993_v18 = vld [vmem:[#allocation9 + $0x4e4] sm:$0xf]  ;;  %v9023_v53 = vld [vmem:[#allocation9 + $0xd4c] sm:$0xf0]  ;;  %v7906_v55 = vld [vmem:[#allocation9 + $0xd50] sm:$0xf0] }
 0x313   : > { %4111 = vmatpush.bf16.msra.mxu0 %v7561_v23  ;;  %4137 = vmatpush.bf16.msra.mxu2 %v7565_v24  ;;  %v3101_v17 = vpop.f32.mrf.mxu3  ;;  %v7501_v23 = vor.u32 %v8918_v14, %v7498_v15  ;;  %v7792_v14 = vld [vmem:[#allocation9 + $0x4e0] sm:$0xf]  ;;  %v8995_v15 = vld [vmem:[#allocation9 + $0x56c] sm:$0xf0]  ;;  %v7797_v27 = vor.u32 %v8993_v18, %v7794_v19  ;;  %v9021_v54 = vld [vmem:[#allocation9 + $0xcc4] sm:$0xf] }
 0x314   : > { %v3102_v20 = vadd.f32 %v3101_v17, %v3089_v11  ;;  %v7954_v11 = vld [vmem:[#allocation9 + $0x10b0] sm:$0xf0]  ;;  %v7744_v58 = vld [vmem:[#allocation9 + $0x180] sm:$0xf]  ;;  %v8983_v59 = vld [vmem:[#allocation9 + $0x20c] sm:$0xf0] }
 0x315   : > { %4123 = vmatpush.bf16.msra.mxu1 %v7705_v28  ;;  %4149 = vmatpush.bf16.msra.mxu3 %v7709_v29  ;;  %v3077_v24 = vpop.f32.mrf.mxu1  ;;  %v3090_v26 = vpop.f32.mrf.mxu2  ;;  %v8914_v28 = vld [vmem:[#allocation9 + $0x5c] sm:$0xf]  ;;  %v7482_v29 = vld [vmem:[#allocation9 + $0xe8] sm:$0xf0]  ;;  %v7957_v17 = vor.u32 %v9033_v10, %v7954_v11  ;;  %v7745_v10 = vor.u32 %v8983_v59, %v7744_v58  ;;  %v7848_v19 = vld [vmem:[#allocation9 + $0x848] sm:$0xf] }
 0x316   : > { %3158 = vst [vmem:[%s9621_s28 + $0x68] sm:$0xff] %v3102_v20  ;;  %v7485_v42 = vor.u32 %v8914_v28, %v7482_v29  ;;  %v2727_v24 = vperm.slane %v9668_v25, 2  ;;  %v7793_v26 = vor.u32 %v8995_v15, %v7792_v14  ;;  %v7776_v28 = vld [vmem:[#allocation9 + $0x3c0] sm:$0xf]  ;;  %v8991_v29 = vld [vmem:[#allocation9 + $0x44c] sm:$0xf0] }
 0x317   : > { %4112 = vmatpush.bf16.msra.mxu0 %v7545_v39  ;;  %4138 = vmatpush.bf16.msra.mxu2 %v7549_v40  ;;  %v8950_v39 = vld [vmem:[#allocation9 + $0xa7c] sm:$0xf]  ;;  %v7626_v40 = vld [vmem:[#allocation9 + $0xb08] sm:$0xf0]  ;;  %v8979_v14 = vld [vmem:[#allocation9 + $0xec] sm:$0xf0] }
 0x318   : > { %v7629_v48 = vor.u32 %v8950_v39, %v7626_v40  ;;  %v7777_v40 = vor.u32 %v8991_v29, %v7776_v28  ;;  %v8977_v15 = vld [vmem:[#allocation9 + $0x64] sm:$0xf]  ;;  %v9034_v58 = vld [vmem:[#allocation9 + $0x102c] sm:$0xf]  ;;  %v7962_v59 = vld [vmem:[#allocation9 + $0x10b8] sm:$0xf0] }
 0x319   : > { %4124 = vmatpush.bf16.msra.mxu1 %v7689_v43  ;;  %4150 = vmatpush.bf16.msra.mxu3 %v7693_v44  ;;  %v7841_v43 = vor.u32 %v9007_v33, %v7840_v32  ;;  %v7845_v44 = vor.u32 %v9005_v34, %v7842_v36  ;;  %v8989_v32 = vld [vmem:[#allocation9 + $0x3c4] sm:$0xf]  ;;  %v7778_v33 = vld [vmem:[#allocation9 + $0x450] sm:$0xf0]  ;;  %v7920_v34 = vld [vmem:[#allocation9 + $0xde0] sm:$0xf] }
 0x31a   : > { %v9027_v36 = vld [vmem:[#allocation9 + $0xe6c] sm:$0xf0] }
 0x31b   : > { %4113 = vmatpush.bf16.msra.mxu0 %v7529_v51  ;;  %4139 = vmatpush.bf16.msra.mxu2 %v7533_v52  ;;  %v3103_v6 = vpop.f32.mrf.mxu3  ;;  %v7608_v51 = vld [vmem:[#allocation9 + $0x958] sm:$0xf]  ;;  %v8948_v52 = vld [vmem:[#allocation9 + $0x9e4] sm:$0xf0] }
 0x31c   : > { %v7609_v62 = vor.u32 %v8948_v52, %v7608_v51  ;;  %v8985_v6 = vld [vmem:[#allocation9 + $0x2a4] sm:$0xf]  ;;  %v7904_v51 = vld [vmem:[#allocation9 + $0xcc0] sm:$0xf] }
 0x31d   : > { %4125 = vmatpush.bf16.msra.mxu1 %v7673_v60  ;;  %4151 = vmatpush.bf16.msra.mxu3 %v7677_v61  ;;  %v7825_v60 = vor.u32 %v9003_v8, %v7824_v45  ;;  %v7829_v61 = vor.u32 %v9001_v46, %v7826_v49  ;;  %v7760_v45 = vld [vmem:[#allocation9 + $0x2a0] sm:$0xf]  ;;  %v8987_v8 = vld [vmem:[#allocation9 + $0x32c] sm:$0xf0]  ;;  %v7762_v49 = vld [vmem:[#allocation9 + $0x330] sm:$0xf0] }
 0x31e   : > { %v7765_v56 = vor.u32 %v8985_v6, %v7762_v49  ;;  %v7816_v49 = vld [vmem:[#allocation9 + $0x608] sm:$0xf] }
 0x31f   : > { %4114 = vmatpush.bf16.msra.mxu0 %v7513_v5  ;;  %4140 = vmatpush.bf16.msra.mxu2 %v7517_v7  ;;  %v7810_v5 = vld [vmem:[#allocation9 + $0x690] sm:$0xf0]  ;;  %v7952_v7 = vld [vmem:[#allocation9 + $0x1020] sm:$0xf] }
 0x320   : > { %v7953_v16 = vor.u32 %v9035_v9, %v7952_v7  ;;  %v7728_v9 = vld [vmem:[#allocation9 + $0x60] sm:$0xf] }
 0x321   : > { %4126 = vmatpush.bf16.msra.mxu1 %v7657_v12  ;;  %4152 = vmatpush.bf16.msra.mxu3 %v7661_v13  ;;  %v7809_v12 = vor.u32 %v8999_v1, %v7808_v0  ;;  %v7813_v13 = vor.u32 %v8997_v4, %v7810_v5  ;;  %v7746_v0 = vld [vmem:[#allocation9 + $0x210] sm:$0xf0]  ;;  %v7888_v1 = vld [vmem:[#allocation9 + $0xba0] sm:$0xf]  ;;  %v9017_v4 = vld [vmem:[#allocation9 + $0xba4] sm:$0xf] }
 0x322   : > { %v7890_v5 = vld [vmem:[#allocation9 + $0xc30] sm:$0xf0] }
 0x323   : > { %4115 = vmatpush.bf16.msra.mxu0 %v7497_v22  ;;  %4141 = vmatpush.bf16.msra.mxu2 %v7501_v23  ;;  %v9029_v22 = vld [vmem:[#allocation9 + $0xf04] sm:$0xf]  ;;  %v7938_v23 = vld [vmem:[#allocation9 + $0xf90] sm:$0xf0]  ;;  %v7893_v18 = vor.u32 %v9017_v4, %v7890_v5  ;;  %v7802_v4 = vld [vmem:[#allocation9 + $0x578] sm:$0xf0] }
 0x324   : > { %v7944_v5 = vld [vmem:[#allocation9 + $0xf08] sm:$0xf] }
 0x325   : > { %4127 = vmatpush.bf16.msra.mxu1 %v7641_v30  ;;  %4153 = vmatpush.bf16.msra.mxu3 %v7645_v31  ;;  %v7937_v30 = vor.u32 %v9031_v21, %v7936_v50  ;;  %v7941_v31 = vor.u32 %v9029_v22, %v7938_v23  ;;  %v9008_v50 = vld [vmem:[#allocation9 + $0x8d4] sm:$0xf0]  ;;  %v7850_v21 = vld [vmem:[#allocation9 + $0x8d8] sm:$0xf0]  ;;  %v7872_v22 = vld [vmem:[#allocation9 + $0xa80] sm:$0xf] }
 0x326   : > { %v9015_v23 = vld [vmem:[#allocation9 + $0xb0c] sm:$0xf0]  ;;  %v7849_v29 = vor.u32 %v9008_v50, %v7848_v19  ;;  %v8990_v19 = vld [vmem:[#allocation9 + $0x3cc] sm:$0xf]  ;;  %v7786_v50 = vld [vmem:[#allocation9 + $0x458] sm:$0xf0] }
 0x327   : > { %4116 = vmatpush.bf16.msra.mxu0 %v7481_v41  ;;  %4142 = vmatpush.bf16.msra.mxu2 %v7485_v42  ;;  %v3114_v20 = vpop.f32.mrf.mxu0  ;;  %v7781_v41 = vor.u32 %v8989_v32, %v7778_v33  ;;  %v9004_v32 = vld [vmem:[#allocation9 + $0x7b4] sm:$0xf0]  ;;  %v9002_v33 = vld [vmem:[#allocation9 + $0x72c] sm:$0xf] }
 0x328   : > { %v3115_v39 = vadd.f32 %v3114_v20, %v2727_v24  ;;  %v9006_v20 = vld [vmem:[#allocation9 + $0x84c] sm:$0xf]  ;;  %v9013_v24 = vld [vmem:[#allocation9 + $0xa84] sm:$0xf] }
 0x329   : > { %4128 = vmatpush.bf16.msra.mxu1 %v7625_v47  ;;  %4154 = vmatpush.bf16.msra.mxu3 %v7629_v48  ;;  %v7921_v47 = vor.u32 %v9027_v36, %v7920_v34  ;;  %v7925_v48 = vor.u32 %v9025_v37, %v7922_v38  ;;  %v7873_v34 = vor.u32 %v9015_v23, %v7872_v22  ;;  %v7834_v38 = vld [vmem:[#allocation9 + $0x7b8] sm:$0xf0]  ;;  %v9026_v22 = vld [vmem:[#allocation9 + $0xdec] sm:$0xf] }
 0x32a   : > { %4117 = vmatmul.bf16.vlgmr.msra.gmra.mxu0 %v9586_v35  ;;  %4143 = vmatmul.bf16.vlgmr.msra.gmra.mxu2 %v9586_v35  ;;  %v7930_v23 = vld [vmem:[#allocation9 + $0xe78] sm:$0xf0] }
 0x32b   : > { %4559 = vmatpush.bf16.msrb.mxu0 %v7841_v43  ;;  %4585 = vmatpush.bf16.msrb.mxu2 %v7845_v44  ;;  %v2728_v43 = vperm.slane %v9668_v25, 3  ;;  %v7761_v25 = vor.u32 %v8987_v8, %v7760_v45  ;;  %v9038_v45 = vld [vmem:[#allocation9 + $0x114c] sm:$0xf]  ;;  %v7978_v8 = vld [vmem:[#allocation9 + $0x11d8] sm:$0xf0] }
 0x32d   : > { %4129 = vmatpush.bf16.msra.mxu1 %v7609_v62  ;;  %4155 = vmatpush.bf16.msra.mxu3 %v7613_v63  ;;  %v3127_v42 = vpop.f32.mrf.mxu1  ;;  %v3140_v44 = vpop.f32.mrf.mxu2  ;;  %v7909_v62 = vor.u32 %v9021_v54, %v7906_v55  ;;  %v8981_v63 = vld [vmem:[#allocation9 + $0x184] sm:$0xf]  ;;  %v8998_v54 = vld [vmem:[#allocation9 + $0x60c] sm:$0xf]  ;;  %v7818_v55 = vld [vmem:[#allocation9 + $0x698] sm:$0xf0] }
 0x32e   : > { %v3128_v46 = vadd.f32 %v3127_v42, %v3115_v39  ;;  %v7749_v11 = vor.u32 %v8981_v63, %v7746_v0  ;;  %v7856_v39 = vld [vmem:[#allocation9 + $0x960] sm:$0xf]  ;;  %v7858_v42 = vld [vmem:[#allocation9 + $0x9f0] sm:$0xf0]  ;;  %v7800_v63 = vld [vmem:[#allocation9 + $0x4e8] sm:$0xf] }
 0x32f   : > { %4560 = vmatpush.bf16.msrb.mxu0 %v7825_v60  ;;  %4586 = vmatpush.bf16.msrb.mxu2 %v7829_v61  ;;  %v3116_v52 = vpop.f32.mrf.mxu0  ;;  %v3141_v60 = vadd.f32 %v3140_v44, %v2728_v43  ;;  %v7905_v61 = vor.u32 %v9023_v53, %v7904_v51  ;;  %v7976_v43 = vld [vmem:[#allocation9 + $0x1148] sm:$0xf]  ;;  %v9040_v44 = vld [vmem:[#allocation9 + $0x11d4] sm:$0xf0]  ;;  %v7981_v53 = vor.u32 %v9038_v45, %v7978_v8 }
 0x330   : > { %4130 = vmatmul.bf16.vlgmr.msra.gmra.mxu1 %v9590_v57  ;;  %4156 = vmatmul.bf16.vlgmr.msra.gmra.mxu3 %v9590_v57  ;;  %3159 = vst [vmem:[%s9621_s28 + $0x70] sm:$0xff] %v3128_v46  ;;  %v9000_v51 = vld [vmem:[#allocation9 + $0x694] sm:$0xf0]  ;;  %v7977_v52 = vor.u32 %v9040_v44, %v7976_v43  ;;  %v7914_v43 = vld [vmem:[#allocation9 + $0xd58] sm:$0xf0] }
 0x331   : > { %4572 = vmatpush.bf16.msrb.mxu1 %v7969_v2  ;;  %4598 = vmatpush.bf16.msrb.mxu3 %v7973_v3  ;;  %v9019_v3 = vld [vmem:[#allocation9 + $0xc2c] sm:$0xf0]  ;;  %v8996_v0 = vld [vmem:[#allocation9 + $0x574] sm:$0xf0]  ;;  %v7752_v8 = vld [vmem:[#allocation9 + $0x188] sm:$0xf] }
 0x333   : > { %4561 = vmatpush.bf16.msrb.mxu0 %v7809_v12  ;;  %4587 = vmatpush.bf16.msrb.mxu2 %v7813_v13  ;;  %v3153_v2 = vpop.f32.mrf.mxu3 }
 0x334   : > { %v3154_v7 = vadd.f32 %v3153_v2, %v3141_v60  ;;  %v7817_v60 = vor.u32 %v9000_v51, %v7816_v49  ;;  %v7965_v2 = vor.u32 %v9034_v58, %v7962_v59  ;;  %v8982_v49 = vld [vmem:[#allocation9 + $0x18c] sm:$0xf]  ;;  %v7754_v51 = vld [vmem:[#allocation9 + $0x218] sm:$0xf0]  ;;  %v7736_v58 = vld [vmem:[#allocation9 + $0x68] sm:$0xf] }
 0x335   : > { %4573 = vmatpush.bf16.msrb.mxu1 %v7953_v16  ;;  %4599 = vmatpush.bf16.msrb.mxu3 %v7957_v17  ;;  %v3129_v12 = vpop.f32.mrf.mxu1  ;;  %v3142_v13 = vpop.f32.mrf.mxu2  ;;  %v7730_v16 = vld [vmem:[#allocation9 + $0xf0] sm:$0xf0]  ;;  %v7889_v17 = vor.u32 %v9019_v3, %v7888_v1  ;;  %v8994_v3 = vld [vmem:[#allocation9 + $0x4ec] sm:$0xf] }
 0x336   : > { %3160 = vst [vmem:[%s9621_s28 + $0x78] sm:$0xff] %v3154_v7  ;;  %v7733_v28 = vor.u32 %v8977_v15, %v7730_v16  ;;  %v7801_v13 = vor.u32 %v8996_v0, %v7800_v63  ;;  %v7784_v15 = vld [vmem:[#allocation9 + $0x3c8] sm:$0xf]  ;;  %v8992_v16 = vld [vmem:[#allocation9 + $0x454] sm:$0xf0] }
 0x337   : > { %4562 = vmatpush.bf16.msrb.mxu0 %v7793_v26  ;;  %4588 = vmatpush.bf16.msrb.mxu2 %v7797_v27  ;;  %v7874_v26 = vld [vmem:[#allocation9 + $0xb10] sm:$0xf0]  ;;  %v7729_v27 = vor.u32 %v8979_v14, %v7728_v9  ;;  %v9032_v9 = vld [vmem:[#allocation9 + $0xf94] sm:$0xf0]  ;;  %v7805_v14 = vor.u32 %v8994_v3, %v7802_v4 }
 0x338   : > { %v7877_v36 = vor.u32 %v9013_v24, %v7874_v26  ;;  %v7785_v26 = vor.u32 %v8992_v16, %v7784_v15  ;;  %v8980_v0 = vld [vmem:[#allocation9 + $0xf4] sm:$0xf0] }
 0x339   : > { %4574 = vmatpush.bf16.msrb.mxu1 %v7937_v30  ;;  %4600 = vmatpush.bf16.msrb.mxu3 %v7941_v31  ;;  %v7853_v30 = vor.u32 %v9006_v20, %v7850_v21  ;;  %v7832_v31 = vld [vmem:[#allocation9 + $0x728] sm:$0xf]  ;;  %v9028_v21 = vld [vmem:[#allocation9 + $0xe74] sm:$0xf0]  ;;  %v7737_v15 = vor.u32 %v8980_v0, %v7736_v58  ;;  %v9095_v58 = vld [vmem:[#allocation9 + $0xf9c] sm:$0xf0] }
 0x33a   : > { %v7833_v46 = vor.u32 %v9004_v32, %v7832_v31  ;;  %v7928_v20 = vld [vmem:[#allocation9 + $0xde8] sm:$0xf]  ;;  %v8988_v32 = vld [vmem:[#allocation9 + $0x334] sm:$0xf0] }
 0x33b   : > { %4563 = vmatpush.bf16.msrb.mxu0 %v7777_v40  ;;  %4589 = vmatpush.bf16.msrb.mxu2 %v7781_v41  ;;  %v3155_v37 = vpop.f32.mrf.mxu3  ;;  %v9011_v40 = vld [vmem:[#allocation9 + $0x9ec] sm:$0xf0]  ;;  %v9009_v41 = vld [vmem:[#allocation9 + $0x964] sm:$0xf]  ;;  %v7768_v31 = vld [vmem:[#allocation9 + $0x2a8] sm:$0xf] }
 0x33c   : > { %v7861_v6 = vor.u32 %v9009_v41, %v7858_v42  ;;  %v8986_v37 = vld [vmem:[#allocation9 + $0x2ac] sm:$0xf]  ;;  %v9024_v41 = vld [vmem:[#allocation9 + $0xd54] sm:$0xf0]  ;;  %v7769_v44 = vor.u32 %v8988_v32, %v7768_v31  ;;  %v9103_v31 = vld [vmem:[#allocation9 + $0x11dc] sm:$0xf0] }
 0x33d   : > { %4575 = vmatpush.bf16.msrb.mxu1 %v7921_v47  ;;  %4601 = vmatpush.bf16.msrb.mxu3 %v7925_v48  ;;  %v7837_v47 = vor.u32 %v9002_v33, %v7834_v38  ;;  %v7857_v48 = vor.u32 %v9011_v40, %v7856_v39  ;;  %v7770_v38 = vld [vmem:[#allocation9 + $0x338] sm:$0xf0]  ;;  %v7912_v39 = vld [vmem:[#allocation9 + $0xcc8] sm:$0xf]  ;;  %v9022_v42 = vld [vmem:[#allocation9 + $0xccc] sm:$0xf] }
 0x33e   : > { %v7773_v45 = vor.u32 %v8986_v37, %v7770_v38  ;;  %v9101_v32 = vld [vmem:[#allocation9 + $0x1154] sm:$0xf] }
 0x33f   : > { %4564 = vmatpush.bf16.msrb.mxu0 %v7761_v25  ;;  %4590 = vmatpush.bf16.msrb.mxu2 %v7765_v56  ;;  %v7960_v25 = vld [vmem:[#allocation9 + $0x1028] sm:$0xf]  ;;  %v9036_v56 = vld [vmem:[#allocation9 + $0x10b4] sm:$0xf0] }
 0x340   : > { %v7961_v1 = vor.u32 %v9036_v56, %v7960_v25  ;;  %v7898_v25 = vld [vmem:[#allocation9 + $0xc38] sm:$0xf0] }
 0x341   : > { %4576 = vmatpush.bf16.msrb.mxu1 %v7905_v61  ;;  %4602 = vmatpush.bf16.msrb.mxu3 %v7909_v62  ;;  %v7821_v61 = vor.u32 %v8998_v54, %v7818_v55  ;;  %v9686_v62 = vld [vmem:[#allocation10 + $0x10] sm:$0xf]  ;;  %v9020_v54 = vld [vmem:[#allocation9 + $0xc34] sm:$0xf0]  ;;  %v9018_v55 = vld [vmem:[#allocation9 + $0xbac] sm:$0xf] }
 0x342   : > { %v3227_v12 = vperm.slane %v9686_v62, 0  ;;  %v7901_v4 = vor.u32 %v9018_v55, %v7898_v25  ;;  %v8050_v55 = vld [vmem:[#allocation9 + $0x580] sm:$0xf0]  ;;  %v8192_v25 = vld [vmem:[#allocation9 + $0xf10] sm:$0xf] }
 0x343   : > { %4565 = vmatpush.bf16.msrb.mxu0 %v7745_v10  ;;  %4591 = vmatpush.bf16.msrb.mxu2 %v7749_v11  ;;  %v9030_v10 = vld [vmem:[#allocation9 + $0xf0c] sm:$0xf]  ;;  %v7946_v11 = vld [vmem:[#allocation9 + $0xf98] sm:$0xf0] }
 0x345   : > { %4577 = vmatpush.bf16.msrb.mxu1 %v7889_v17  ;;  %4603 = vmatpush.bf16.msrb.mxu3 %v7893_v18  ;;  %v7945_v17 = vor.u32 %v9032_v9, %v7944_v5  ;;  %v7949_v18 = vor.u32 %v9030_v10, %v7946_v11  ;;  %v8096_v5 = vld [vmem:[#allocation9 + $0x850] sm:$0xf]  ;;  %v9069_v9 = vld [vmem:[#allocation9 + $0x854] sm:$0xf]  ;;  %v8098_v10 = vld [vmem:[#allocation9 + $0x8e0] sm:$0xf0] }
 0x346   : > { %v7880_v11 = vld [vmem:[#allocation9 + $0xa88] sm:$0xf] }
 0x347   : > { %4566 = vmatpush.bf16.msrb.mxu0 %v7729_v27  ;;  %4592 = vmatpush.bf16.msrb.mxu2 %v7733_v28  ;;  %v3564_v7 = vpop.f32.mrf.mxu0  ;;  %v7789_v27 = vor.u32 %v8990_v19, %v7786_v50  ;;  %v8080_v19 = vld [vmem:[#allocation9 + $0x730] sm:$0xf]  ;;  %v9067_v50 = vld [vmem:[#allocation9 + $0x7bc] sm:$0xf0] }
 0x348   : > { %v3565_v24 = vadd.f32 %v3564_v7, %v3227_v12  ;;  %v9071_v7 = vld [vmem:[#allocation9 + $0x8dc] sm:$0xf0]  ;;  %v9016_v12 = vld [vmem:[#allocation9 + $0xb14] sm:$0xf0] }
 0x349   : > { %4578 = vmatpush.bf16.msrb.mxu1 %v7873_v34  ;;  %4604 = vmatpush.bf16.msrb.mxu3 %v7877_v36  ;;  %v7929_v34 = vor.u32 %v9028_v21, %v7928_v20  ;;  %v7933_v36 = vor.u32 %v9026_v22, %v7930_v23  ;;  %v9065_v20 = vld [vmem:[#allocation9 + $0x734] sm:$0xf]  ;;  %v7881_v21 = vor.u32 %v9016_v12, %v7880_v11  ;;  %v8178_v12 = vld [vmem:[#allocation9 + $0xe80] sm:$0xf0] }
 0x34a   : > { %4567 = vmatmul.bf16.vlgmr.msrb.gmra.mxu0 %v9586_v35  ;;  %4593 = vmatmul.bf16.vlgmr.msrb.gmra.mxu2 %v9586_v35  ;;  %v9089_v11 = vld [vmem:[#allocation9 + $0xdf4] sm:$0xf] }
 0x34b   : > { %4611 = vmatpush.bf16.msra.mxu0 %v7849_v29  ;;  %4637 = vmatpush.bf16.msra.mxu2 %v7853_v30  ;;  %v3228_v29 = vperm.slane %v9686_v62, 1 }
 0x34d   : > { %4579 = vmatpush.bf16.msrb.mxu1 %v7857_v48  ;;  %4605 = vmatpush.bf16.msrb.mxu3 %v7861_v6  ;;  %v3577_v28 = vpop.f32.mrf.mxu1  ;;  %v3590_v30 = vpop.f32.mrf.mxu2  ;;  %v7913_v48 = vor.u32 %v9024_v41, %v7912_v39  ;;  %v7917_v6 = vor.u32 %v9022_v42, %v7914_v43  ;;  %v8064_v39 = vld [vmem:[#allocation9 + $0x610] sm:$0xf]  ;;  %v9061_v43 = vld [vmem:[#allocation9 + $0x614] sm:$0xf] }
 0x34e   : > { %v3578_v33 = vadd.f32 %v3577_v28, %v3565_v24  ;;  %v8082_v24 = vld [vmem:[#allocation9 + $0x7c0] sm:$0xf0]  ;;  %v9010_v28 = vld [vmem:[#allocation9 + $0x96c] sm:$0xf] }
 0x34f   : > { %4612 = vmatpush.bf16.msra.mxu0 %v7833_v46  ;;  %4638 = vmatpush.bf16.msra.mxu2 %v7837_v47  ;;  %v3566_v40 = vpop.f32.mrf.mxu0  ;;  %v8984_v46 = vld [vmem:[#allocation9 + $0x214] sm:$0xf0]  ;;  %v3591_v47 = vadd.f32 %v3590_v30, %v3228_v29  ;;  %v7866_v29 = vld [vmem:[#allocation9 + $0x9f8] sm:$0xf0]  ;;  %v8224_v30 = vld [vmem:[#allocation9 + $0x1150] sm:$0xf] }
 0x350   : > { %4580 = vmatmul.bf16.vlgmr.msrb.gmra.mxu1 %v9590_v57  ;;  %4606 = vmatmul.bf16.vlgmr.msrb.gmra.mxu3 %v9590_v57  ;;  %3659 = vst [vmem:[%s9621_s28 + $0x80] sm:$0xff] %v3578_v33  ;;  %v7753_v59 = vor.u32 %v8984_v46, %v7752_v8  ;;  %v8226_v33 = vld [vmem:[#allocation9 + $0x11e0] sm:$0xf0]  ;;  %v7869_v38 = vor.u32 %v9010_v28, %v7866_v29  ;;  %v9063_v40 = vld [vmem:[#allocation9 + $0x69c] sm:$0xf0] }
 0x351   : > { %4624 = vmatpush.bf16.msra.mxu1 %v7977_v52  ;;  %4650 = vmatpush.bf16.msra.mxu3 %v7981_v53  ;;  %v7896_v52 = vld [vmem:[#allocation9 + $0xba8] sm:$0xf]  ;;  %v8225_v41 = vor.u32 %v9103_v31, %v8224_v30  ;;  %v8229_v42 = vor.u32 %v9101_v32, %v8226_v33  ;;  %v9099_v8 = vld [vmem:[#allocation9 + $0x10bc] sm:$0xf0]  ;;  %v9097_v46 = vld [vmem:[#allocation9 + $0x1034] sm:$0xf] }
 0x352   : > { %v7897_v3 = vor.u32 %v9020_v54, %v7896_v52  ;;  %v9057_v54 = vld [vmem:[#allocation9 + $0x4f4] sm:$0xf]  ;;  %v9087_v28 = vld [vmem:[#allocation9 + $0xd5c] sm:$0xf0]  ;;  %v8162_v30 = vld [vmem:[#allocation9 + $0xd60] sm:$0xf0] }
 0x353   : > { %4613 = vmatpush.bf16.msra.mxu0 %v7817_v60  ;;  %4639 = vmatpush.bf16.msra.mxu2 %v7821_v61  ;;  %v3603_v53 = vpop.f32.mrf.mxu3  ;;  %v7757_v60 = vor.u32 %v8982_v49, %v7754_v51  ;;  %v8048_v49 = vld [vmem:[#allocation9 + $0x4f0] sm:$0xf]  ;;  %v9059_v51 = vld [vmem:[#allocation9 + $0x57c] sm:$0xf0]  ;;  %v8053_v0 = vor.u32 %v9057_v54, %v8050_v55  ;;  %v9085_v29 = vld [vmem:[#allocation9 + $0xcd4] sm:$0xf] }
 0x354   : > { %v3604_v56 = vadd.f32 %v3603_v53, %v3591_v47  ;;  %v8210_v47 = vld [vmem:[#allocation9 + $0x10c0] sm:$0xf0]  ;;  %v8000_v32 = vld [vmem:[#allocation9 + $0x190] sm:$0xf]  ;;  %v9047_v33 = vld [vmem:[#allocation9 + $0x21c] sm:$0xf0] }
 0x355   : > { %4625 = vmatpush.bf16.msra.mxu1 %v7961_v1  ;;  %4651 = vmatpush.bf16.msra.mxu3 %v7965_v2  ;;  %v3579_v61 = vpop.f32.mrf.mxu1  ;;  %v3592_v63 = vpop.f32.mrf.mxu2  ;;  %v8978_v1 = vld [vmem:[#allocation9 + $0x6c] sm:$0xf]  ;;  %v7738_v2 = vld [vmem:[#allocation9 + $0xf8] sm:$0xf0]  ;;  %v8213_v53 = vor.u32 %v9097_v46, %v8210_v47  ;;  %v8001_v46 = vor.u32 %v9047_v33, %v8000_v32  ;;  %v8104_v55 = vld [vmem:[#allocation9 + $0x858] sm:$0xf] }
 0x356   : > { %3660 = vst [vmem:[%s9621_s28 + $0x88] sm:$0xff] %v3604_v56  ;;  %v7741_v16 = vor.u32 %v8978_v1, %v7738_v2  ;;  %v3229_v61 = vperm.slane %v9686_v62, 2  ;;  %v8049_v63 = vor.u32 %v9059_v51, %v8048_v49  ;;  %v8032_v1 = vld [vmem:[#allocation9 + $0x3d0] sm:$0xf]  ;;  %v9055_v2 = vld [vmem:[#allocation9 + $0x45c] sm:$0xf0] }
 0x357   : > { %4614 = vmatpush.bf16.msra.mxu0 %v7801_v13  ;;  %4640 = vmatpush.bf16.msra.mxu2 %v7805_v14  ;;  %v9014_v13 = vld [vmem:[#allocation9 + $0xa8c] sm:$0xf]  ;;  %v7882_v14 = vld [vmem:[#allocation9 + $0xb18] sm:$0xf0]  ;;  %v9043_v49 = vld [vmem:[#allocation9 + $0xfc] sm:$0xf0] }
 0x358   : > { %v7885_v22 = vor.u32 %v9014_v13, %v7882_v14  ;;  %v8033_v14 = vor.u32 %v9055_v2, %v8032_v1  ;;  %v9041_v51 = vld [vmem:[#allocation9 + $0x74] sm:$0xf]  ;;  %v9098_v32 = vld [vmem:[#allocation9 + $0x103c] sm:$0xf]  ;;  %v8218_v33 = vld [vmem:[#allocation9 + $0x10c8] sm:$0xf0] }
 0x359   : > { %4626 = vmatpush.bf16.msra.mxu1 %v7945_v17  ;;  %4652 = vmatpush.bf16.msra.mxu3 %v7949_v18  ;;  %v8097_v17 = vor.u32 %v9071_v7, %v8096_v5  ;;  %v8101_v18 = vor.u32 %v9069_v9, %v8098_v10  ;;  %v9053_v5 = vld [vmem:[#allocation9 + $0x3d4] sm:$0xf]  ;;  %v8034_v7 = vld [vmem:[#allocation9 + $0x460] sm:$0xf0]  ;;  %v8176_v9 = vld [vmem:[#allocation9 + $0xdf0] sm:$0xf] }
 0x35a   : > { %v9091_v10 = vld [vmem:[#allocation9 + $0xe7c] sm:$0xf0] }
 0x35b   : > { %4615 = vmatpush.bf16.msra.mxu0 %v7785_v26  ;;  %4641 = vmatpush.bf16.msra.mxu2 %v7789_v27  ;;  %v3605_v23 = vpop.f32.mrf.mxu3  ;;  %v7864_v26 = vld [vmem:[#allocation9 + $0x968] sm:$0xf]  ;;  %v9012_v27 = vld [vmem:[#allocation9 + $0x9f4] sm:$0xf0] }
 0x35c   : > { %v7865_v37 = vor.u32 %v9012_v27, %v7864_v26  ;;  %v9049_v23 = vld [vmem:[#allocation9 + $0x2b4] sm:$0xf]  ;;  %v8160_v26 = vld [vmem:[#allocation9 + $0xcd0] sm:$0xf] }
 0x35d   : > { %4627 = vmatpush.bf16.msra.mxu1 %v7929_v34  ;;  %4653 = vmatpush.bf16.msra.mxu3 %v7933_v36  ;;  %v8081_v34 = vor.u32 %v9067_v50, %v8080_v19  ;;  %v8085_v36 = vor.u32 %v9065_v20, %v8082_v24  ;;  %v8016_v19 = vld [vmem:[#allocation9 + $0x2b0] sm:$0xf]  ;;  %v9051_v50 = vld [vmem:[#allocation9 + $0x33c] sm:$0xf0]  ;;  %v8018_v24 = vld [vmem:[#allocation9 + $0x340] sm:$0xf0] }
 0x35e   : > { %v8021_v31 = vor.u32 %v9049_v23, %v8018_v24  ;;  %v8072_v24 = vld [vmem:[#allocation9 + $0x618] sm:$0xf] }
 0x35f   : > { %4616 = vmatpush.bf16.msra.mxu0 %v7769_v44  ;;  %4642 = vmatpush.bf16.msra.mxu2 %v7773_v45  ;;  %v8066_v44 = vld [vmem:[#allocation9 + $0x6a0] sm:$0xf0]  ;;  %v8208_v45 = vld [vmem:[#allocation9 + $0x1030] sm:$0xf] }
 0x360   : > { %v8209_v52 = vor.u32 %v9099_v8, %v8208_v45  ;;  %v7984_v8 = vld [vmem:[#allocation9 + $0x70] sm:$0xf] }
 0x361   : > { %4628 = vmatpush.bf16.msra.mxu1 %v7913_v48  ;;  %4654 = vmatpush.bf16.msra.mxu3 %v7917_v6  ;;  %v8065_v48 = vor.u32 %v9063_v40, %v8064_v39  ;;  %v8069_v6 = vor.u32 %v9061_v43, %v8066_v44  ;;  %v8002_v39 = vld [vmem:[#allocation9 + $0x220] sm:$0xf0]  ;;  %v8144_v40 = vld [vmem:[#allocation9 + $0xbb0] sm:$0xf]  ;;  %v9081_v43 = vld [vmem:[#allocation9 + $0xbb4] sm:$0xf] }
 0x362   : > { %v8146_v44 = vld [vmem:[#allocation9 + $0xc40] sm:$0xf0] }
 0x363   : > { %4617 = vmatpush.bf16.msra.mxu0 %v7753_v59  ;;  %4643 = vmatpush.bf16.msra.mxu2 %v7757_v60  ;;  %v9093_v59 = vld [vmem:[#allocation9 + $0xf14] sm:$0xf]  ;;  %v8194_v60 = vld [vmem:[#allocation9 + $0xfa0] sm:$0xf0]  ;;  %v8149_v54 = vor.u32 %v9081_v43, %v8146_v44  ;;  %v8058_v43 = vld [vmem:[#allocation9 + $0x588] sm:$0xf0] }
 0x364   : > { %v8200_v44 = vld [vmem:[#allocation9 + $0xf18] sm:$0xf] }
 0x365   : > { %4629 = vmatpush.bf16.msra.mxu1 %v7897_v3  ;;  %4655 = vmatpush.bf16.msra.mxu3 %v7901_v4  ;;  %v8193_v3 = vor.u32 %v9095_v58, %v8192_v25  ;;  %v8197_v4 = vor.u32 %v9093_v59, %v8194_v60  ;;  %v9072_v25 = vld [vmem:[#allocation9 + $0x8e4] sm:$0xf0]  ;;  %v8106_v58 = vld [vmem:[#allocation9 + $0x8e8] sm:$0xf0]  ;;  %v8128_v59 = vld [vmem:[#allocation9 + $0xa90] sm:$0xf] }
 0x366   : > { %v9079_v60 = vld [vmem:[#allocation9 + $0xb1c] sm:$0xf0]  ;;  %v8105_v2 = vor.u32 %v9072_v25, %v8104_v55  ;;  %v9054_v55 = vld [vmem:[#allocation9 + $0x3dc] sm:$0xf]  ;;  %v8042_v25 = vld [vmem:[#allocation9 + $0x468] sm:$0xf0] }
 0x367   : > { %4618 = vmatpush.bf16.msra.mxu0 %v7737_v15  ;;  %4644 = vmatpush.bf16.msra.mxu2 %v7741_v16  ;;  %v3616_v56 = vpop.f32.mrf.mxu0  ;;  %v8037_v15 = vor.u32 %v9053_v5, %v8034_v7  ;;  %v9068_v5 = vld [vmem:[#allocation9 + $0x7c4] sm:$0xf0]  ;;  %v9066_v7 = vld [vmem:[#allocation9 + $0x73c] sm:$0xf] }
 0x368   : > { %v3617_v13 = vadd.f32 %v3616_v56, %v3229_v61  ;;  %v9070_v56 = vld [vmem:[#allocation9 + $0x85c] sm:$0xf]  ;;  %v9077_v61 = vld [vmem:[#allocation9 + $0xa94] sm:$0xf] }
 0x369   : > { %4630 = vmatpush.bf16.msra.mxu1 %v7881_v21  ;;  %4656 = vmatpush.bf16.msra.mxu3 %v7885_v22  ;;  %v8177_v21 = vor.u32 %v9091_v10, %v8176_v9  ;;  %v8181_v22 = vor.u32 %v9089_v11, %v8178_v12  ;;  %v8129_v9 = vor.u32 %v9079_v60, %v8128_v59  ;;  %v8090_v12 = vld [vmem:[#allocation9 + $0x7c8] sm:$0xf0]  ;;  %v9090_v59 = vld [vmem:[#allocation9 + $0xdfc] sm:$0xf] }
 0x36a   : > { %4619 = vmatmul.bf16.vlgmr.msra.gmra.mxu0 %v9586_v35  ;;  %4645 = vmatmul.bf16.vlgmr.msra.gmra.mxu2 %v9586_v35  ;;  %v8186_v60 = vld [vmem:[#allocation9 + $0xe88] sm:$0xf0] }
 0x36b   : > { %5061 = vmatpush.bf16.msrb.mxu0 %v8097_v17  ;;  %5087 = vmatpush.bf16.msrb.mxu2 %v8101_v18  ;;  %v3230_v17 = vperm.slane %v9686_v62, 3  ;;  %v8017_v62 = vor.u32 %v9051_v50, %v8016_v19  ;;  %v9102_v19 = vld [vmem:[#allocation9 + $0x115c] sm:$0xf]  ;;  %v8234_v50 = vld [vmem:[#allocation9 + $0x11e8] sm:$0xf0] }
 0x36d   : > { %4631 = vmatpush.bf16.msra.mxu1 %v7865_v37  ;;  %4657 = vmatpush.bf16.msra.mxu3 %v7869_v38  ;;  %v3629_v16 = vpop.f32.mrf.mxu1  ;;  %v3642_v18 = vpop.f32.mrf.mxu2  ;;  %v8165_v37 = vor.u32 %v9085_v29, %v8162_v30  ;;  %v9045_v38 = vld [vmem:[#allocation9 + $0x194] sm:$0xf]  ;;  %v9062_v29 = vld [vmem:[#allocation9 + $0x61c] sm:$0xf]  ;;  %v8074_v30 = vld [vmem:[#allocation9 + $0x6a8] sm:$0xf0] }
 0x36e   : > { %v3630_v20 = vadd.f32 %v3629_v16, %v3617_v13  ;;  %v8005_v47 = vor.u32 %v9045_v38, %v8002_v39  ;;  %v8112_v13 = vld [vmem:[#allocation9 + $0x970] sm:$0xf]  ;;  %v8114_v16 = vld [vmem:[#allocation9 + $0xa00] sm:$0xf0]  ;;  %v8056_v38 = vld [vmem:[#allocation9 + $0x4f8] sm:$0xf] }
 0x36f   : > { %5062 = vmatpush.bf16.msrb.mxu0 %v8081_v34  ;;  %5088 = vmatpush.bf16.msrb.mxu2 %v8085_v36  ;;  %v3618_v27 = vpop.f32.mrf.mxu0  ;;  %v3643_v34 = vadd.f32 %v3642_v18, %v3230_v17  ;;  %v8161_v36 = vor.u32 %v9087_v28, %v8160_v26  ;;  %v8232_v17 = vld [vmem:[#allocation9 + $0x1158] sm:$0xf]  ;;  %v9104_v18 = vld [vmem:[#allocation9 + $0x11e4] sm:$0xf0]  ;;  %v8237_v28 = vor.u32 %v9102_v19, %v8234_v50 }
 0x370   : > { %4632 = vmatmul.bf16.vlgmr.msra.gmra.mxu1 %v9590_v57  ;;  %4658 = vmatmul.bf16.vlgmr.msra.gmra.mxu3 %v9590_v57  ;;  %3661 = vst [vmem:[%s9621_s28 + $0x90] sm:$0xff] %v3630_v20  ;;  %v9064_v26 = vld [vmem:[#allocation9 + $0x6a4] sm:$0xf0]  ;;  %v8233_v27 = vor.u32 %v9104_v18, %v8232_v17  ;;  %v8170_v17 = vld [vmem:[#allocation9 + $0xd68] sm:$0xf0] }
 0x371   : > { %5074 = vmatpush.bf16.msrb.mxu1 %v8225_v41  ;;  %5100 = vmatpush.bf16.msrb.mxu3 %v8229_v42  ;;  %v9083_v42 = vld [vmem:[#allocation9 + $0xc3c] sm:$0xf0]  ;;  %v9060_v39 = vld [vmem:[#allocation9 + $0x584] sm:$0xf0]  ;;  %v8008_v50 = vld [vmem:[#allocation9 + $0x198] sm:$0xf] }
 0x373   : > { %5063 = vmatpush.bf16.msrb.mxu0 %v8065_v48  ;;  %5089 = vmatpush.bf16.msrb.mxu2 %v8069_v6  ;;  %v3655_v41 = vpop.f32.mrf.mxu3 }
 0x374   : > { %v3656_v45 = vadd.f32 %v3655_v41, %v3643_v34  ;;  %v8073_v34 = vor.u32 %v9064_v26, %v8072_v24  ;;  %v8221_v41 = vor.u32 %v9098_v32, %v8218_v33  ;;  %v9046_v24 = vld [vmem:[#allocation9 + $0x19c] sm:$0xf]  ;;  %v8010_v26 = vld [vmem:[#allocation9 + $0x228] sm:$0xf0]  ;;  %v7992_v32 = vld [vmem:[#allocation9 + $0x78] sm:$0xf] }
 0x375   : > { %5075 = vmatpush.bf16.msrb.mxu1 %v8209_v52  ;;  %5101 = vmatpush.bf16.msrb.mxu3 %v8213_v53  ;;  %v3631_v48 = vpop.f32.mrf.mxu1  ;;  %v3644_v6 = vpop.f32.mrf.mxu2  ;;  %v7986_v52 = vld [vmem:[#allocation9 + $0x100] sm:$0xf0]  ;;  %v8145_v53 = vor.u32 %v9083_v42, %v8144_v40  ;;  %v9058_v42 = vld [vmem:[#allocation9 + $0x4fc] sm:$0xf] }
 0x376   : > { %3662 = vst [vmem:[%s9621_s28 + $0x98] sm:$0xff] %v3656_v45  ;;  %v7989_v1 = vor.u32 %v9041_v51, %v7986_v52  ;;  %v8057_v6 = vor.u32 %v9060_v39, %v8056_v38  ;;  %v8040_v51 = vld [vmem:[#allocation9 + $0x3d8] sm:$0xf]  ;;  %v9056_v52 = vld [vmem:[#allocation9 + $0x464] sm:$0xf0] }
 0x377   : > { %5064 = vmatpush.bf16.msrb.mxu0 %v8049_v63  ;;  %5090 = vmatpush.bf16.msrb.mxu2 %v8053_v0  ;;  %v8130_v63 = vld [vmem:[#allocation9 + $0xb20] sm:$0xf0]  ;;  %v7985_v0 = vor.u32 %v9043_v49, %v7984_v8  ;;  %v9096_v8 = vld [vmem:[#allocation9 + $0xfa4] sm:$0xf0]  ;;  %v8061_v49 = vor.u32 %v9058_v42, %v8058_v43 }
 0x378   : > { %v8133_v10 = vor.u32 %v9077_v61, %v8130_v63  ;;  %v8041_v63 = vor.u32 %v9056_v52, %v8040_v51  ;;  %v9044_v39 = vld [vmem:[#allocation9 + $0x104] sm:$0xf0] }
 0x379   : > { %5076 = vmatpush.bf16.msrb.mxu1 %v8193_v3  ;;  %5102 = vmatpush.bf16.msrb.mxu3 %v8197_v4  ;;  %v8109_v3 = vor.u32 %v9070_v56, %v8106_v58  ;;  %v8088_v4 = vld [vmem:[#allocation9 + $0x738] sm:$0xf]  ;;  %v9092_v58 = vld [vmem:[#allocation9 + $0xe84] sm:$0xf0]  ;;  %v7993_v51 = vor.u32 %v9044_v39, %v7992_v32  ;;  %v9159_v32 = vld [vmem:[#allocation9 + $0xfac] sm:$0xf0] }
 0x37a   : > { %v8089_v20 = vor.u32 %v9068_v5, %v8088_v4  ;;  %v8184_v56 = vld [vmem:[#allocation9 + $0xdf8] sm:$0xf]  ;;  %v9052_v5 = vld [vmem:[#allocation9 + $0x344] sm:$0xf0] }
 0x37b   : > { %5065 = vmatpush.bf16.msrb.mxu0 %v8033_v14  ;;  %5091 = vmatpush.bf16.msrb.mxu2 %v8037_v15  ;;  %v3657_v11 = vpop.f32.mrf.mxu3  ;;  %v9075_v14 = vld [vmem:[#allocation9 + $0x9fc] sm:$0xf0]  ;;  %v9073_v15 = vld [vmem:[#allocation9 + $0x974] sm:$0xf]  ;;  %v8024_v4 = vld [vmem:[#allocation9 + $0x2b8] sm:$0xf] }
 0x37c   : > { %v8117_v23 = vor.u32 %v9073_v15, %v8114_v16  ;;  %v9050_v11 = vld [vmem:[#allocation9 + $0x2bc] sm:$0xf]  ;;  %v9088_v15 = vld [vmem:[#allocation9 + $0xd64] sm:$0xf0]  ;;  %v8025_v18 = vor.u32 %v9052_v5, %v8024_v4  ;;  %v9167_v4 = vld [vmem:[#allocation9 + $0x11ec] sm:$0xf0] }
 0x37d   : > { %5077 = vmatpush.bf16.msrb.mxu1 %v8177_v21  ;;  %5103 = vmatpush.bf16.msrb.mxu3 %v8181_v22  ;;  %v8093_v21 = vor.u32 %v9066_v7, %v8090_v12  ;;  %v8113_v22 = vor.u32 %v9075_v14, %v8112_v13  ;;  %v8026_v12 = vld [vmem:[#allocation9 + $0x348] sm:$0xf0]  ;;  %v8168_v13 = vld [vmem:[#allocation9 + $0xcd8] sm:$0xf]  ;;  %v9086_v16 = vld [vmem:[#allocation9 + $0xcdc] sm:$0xf] }
 0x37e   : > { %v8029_v19 = vor.u32 %v9050_v11, %v8026_v12  ;;  %v9165_v5 = vld [vmem:[#allocation9 + $0x1164] sm:$0xf] }
 0x37f   : > { %5066 = vmatpush.bf16.msrb.mxu0 %v8017_v62  ;;  %5092 = vmatpush.bf16.msrb.mxu2 %v8021_v31  ;;  %v8216_v62 = vld [vmem:[#allocation9 + $0x1038] sm:$0xf]  ;;  %v9100_v31 = vld [vmem:[#allocation9 + $0x10c4] sm:$0xf0] }
 0x380   : > { %v8217_v40 = vor.u32 %v9100_v31, %v8216_v62  ;;  %v8154_v62 = vld [vmem:[#allocation9 + $0xc48] sm:$0xf0] }
 0x381   : > { %5078 = vmatpush.bf16.msrb.mxu1 %v8161_v36  ;;  %5104 = vmatpush.bf16.msrb.mxu3 %v8165_v37  ;;  %v8077_v36 = vor.u32 %v9062_v29, %v8074_v30  ;;  %v9704_v37 = vld [vmem:[#allocation10 + $0x14] sm:$0xf]  ;;  %v9084_v29 = vld [vmem:[#allocation9 + $0xc44] sm:$0xf0]  ;;  %v9082_v30 = vld [vmem:[#allocation9 + $0xbbc] sm:$0xf] }
 0x382   : > { %v3729_v48 = vperm.slane %v9704_v37, 0  ;;  %v8157_v43 = vor.u32 %v9082_v30, %v8154_v62  ;;  %v8306_v30 = vld [vmem:[#allocation9 + $0x590] sm:$0xf0]  ;;  %v8448_v62 = vld [vmem:[#allocation9 + $0xf20] sm:$0xf] }
 0x383   : > { %5067 = vmatpush.bf16.msrb.mxu0 %v8001_v46  ;;  %5093 = vmatpush.bf16.msrb.mxu2 %v8005_v47  ;;  %v9094_v46 = vld [vmem:[#allocation9 + $0xf1c] sm:$0xf]  ;;  %v8202_v47 = vld [vmem:[#allocation9 + $0xfa8] sm:$0xf0] }
 0x385   : > { %5079 = vmatpush.bf16.msrb.mxu1 %v8145_v53  ;;  %5105 = vmatpush.bf16.msrb.mxu3 %v8149_v54  ;;  %v8201_v53 = vor.u32 %v9096_v8, %v8200_v44  ;;  %v8205_v54 = vor.u32 %v9094_v46, %v8202_v47  ;;  %v8352_v44 = vld [vmem:[#allocation9 + $0x860] sm:$0xf]  ;;  %v9133_v8 = vld [vmem:[#allocation9 + $0x864] sm:$0xf]  ;;  %v8354_v46 = vld [vmem:[#allocation9 + $0x8f0] sm:$0xf0] }
 0x386   : > { %v8136_v47 = vld [vmem:[#allocation9 + $0xa98] sm:$0xf] }
 0x387   : > { %5068 = vmatpush.bf16.msrb.mxu0 %v7985_v0  ;;  %5094 = vmatpush.bf16.msrb.mxu2 %v7989_v1  ;;  %v4066_v45 = vpop.f32.mrf.mxu0  ;;  %v8045_v0 = vor.u32 %v9054_v55, %v8042_v25  ;;  %v8336_v55 = vld [vmem:[#allocation9 + $0x740] sm:$0xf]  ;;  %v9131_v25 = vld [vmem:[#allocation9 + $0x7cc] sm:$0xf0] }
 0x388   : > { %v4067_v61 = vadd.f32 %v4066_v45, %v3729_v48  ;;  %v9135_v45 = vld [vmem:[#allocation9 + $0x8ec] sm:$0xf0]  ;;  %v9080_v48 = vld [vmem:[#allocation9 + $0xb24] sm:$0xf0] }
 0x389   : > { %5080 = vmatpush.bf16.msrb.mxu1 %v8129_v9  ;;  %5106 = vmatpush.bf16.msrb.mxu3 %v8133_v10  ;;  %v8185_v9 = vor.u32 %v9092_v58, %v8184_v56  ;;  %v8189_v10 = vor.u32 %v9090_v59, %v8186_v60  ;;  %v9129_v56 = vld [vmem:[#allocation9 + $0x744] sm:$0xf]  ;;  %v8137_v58 = vor.u32 %v9080_v48, %v8136_v47  ;;  %v8434_v48 = vld [vmem:[#allocation9 + $0xe90] sm:$0xf0] }
 0x38a   : > { %5069 = vmatmul.bf16.vlgmr.msrb.gmra.mxu0 %v9586_v35  ;;  %5095 = vmatmul.bf16.vlgmr.msrb.gmra.mxu2 %v9586_v35  ;;  %v9153_v47 = vld [vmem:[#allocation9 + $0xe04] sm:$0xf] }
 0x38b   : > { %5113 = vmatpush.bf16.msra.mxu0 %v8105_v2  ;;  %5139 = vmatpush.bf16.msra.mxu2 %v8109_v3  ;;  %v3730_v2 = vperm.slane %v9704_v37, 1 }
 0x38d   : > { %5081 = vmatpush.bf16.msrb.mxu1 %v8113_v22  ;;  %5107 = vmatpush.bf16.msrb.mxu3 %v8117_v23  ;;  %v4079_v1 = vpop.f32.mrf.mxu1  ;;  %v4092_v3 = vpop.f32.mrf.mxu2  ;;  %v8169_v22 = vor.u32 %v9088_v15, %v8168_v13  ;;  %v8173_v23 = vor.u32 %v9086_v16, %v8170_v17  ;;  %v8320_v13 = vld [vmem:[#allocation9 + $0x620] sm:$0xf]  ;;  %v9125_v17 = vld [vmem:[#allocation9 + $0x624] sm:$0xf] }
 0x38e   : > { %v4080_v7 = vadd.f32 %v4079_v1, %v4067_v61  ;;  %v8338_v61 = vld [vmem:[#allocation9 + $0x7d0] sm:$0xf0]  ;;  %v9074_v1 = vld [vmem:[#allocation9 + $0x97c] sm:$0xf] }
 0x38f   : > { %5114 = vmatpush.bf16.msra.mxu0 %v8089_v20  ;;  %5140 = vmatpush.bf16.msra.mxu2 %v8093_v21  ;;  %v4068_v14 = vpop.f32.mrf.mxu0  ;;  %v9048_v20 = vld [vmem:[#allocation9 + $0x224] sm:$0xf0]  ;;  %v4093_v21 = vadd.f32 %v4092_v3, %v3730_v2  ;;  %v8122_v2 = vld [vmem:[#allocation9 + $0xa08] sm:$0xf0]  ;;  %v8480_v3 = vld [vmem:[#allocation9 + $0x1160] sm:$0xf] }
 0x390   : > { %5082 = vmatmul.bf16.vlgmr.msrb.gmra.mxu1 %v9590_v57  ;;  %5108 = vmatmul.bf16.vlgmr.msrb.gmra.mxu3 %v9590_v57  ;;  %4161 = vst [vmem:[%s9621_s28 + $0xa0] sm:$0xff] %v4080_v7  ;;  %v8009_v33 = vor.u32 %v9048_v20, %v8008_v50  ;;  %v8482_v7 = vld [vmem:[#allocation9 + $0x11f0] sm:$0xf0]  ;;  %v8125_v12 = vor.u32 %v9074_v1, %v8122_v2  ;;  %v9127_v14 = vld [vmem:[#allocation9 + $0x6ac] sm:$0xf0] }
 0x391   : > { %5126 = vmatpush.bf16.msra.mxu1 %v8233_v27  ;;  %5152 = vmatpush.bf16.msra.mxu3 %v8237_v28  ;;  %v8152_v27 = vld [vmem:[#allocation9 + $0xbb8] sm:$0xf]  ;;  %v8481_v15 = vor.u32 %v9167_v4, %v8480_v3  ;;  %v8485_v16 = vor.u32 %v9165_v5, %v8482_v7  ;;  %v9163_v50 = vld [vmem:[#allocation9 + $0x10cc] sm:$0xf0]  ;;  %v9161_v20 = vld [vmem:[#allocation9 + $0x1044] sm:$0xf] }
 0x392   : > { %v8153_v42 = vor.u32 %v9084_v29, %v8152_v27  ;;  %v9121_v29 = vld [vmem:[#allocation9 + $0x504] sm:$0xf]  ;;  %v9151_v1 = vld [vmem:[#allocation9 + $0xd6c] sm:$0xf0]  ;;  %v8418_v3 = vld [vmem:[#allocation9 + $0xd70] sm:$0xf0] }
 0x393   : > { %5115 = vmatpush.bf16.msra.mxu0 %v8073_v34  ;;  %5141 = vmatpush.bf16.msra.mxu2 %v8077_v36  ;;  %v4105_v28 = vpop.f32.mrf.mxu3  ;;  %v8013_v34 = vor.u32 %v9046_v24, %v8010_v26  ;;  %v8304_v24 = vld [vmem:[#allocation9 + $0x500] sm:$0xf]  ;;  %v9123_v26 = vld [vmem:[#allocation9 + $0x58c] sm:$0xf0]  ;;  %v8309_v39 = vor.u32 %v9121_v29, %v8306_v30  ;;  %v9149_v2 = vld [vmem:[#allocation9 + $0xce4] sm:$0xf] }
 0x394   : > { %v4106_v31 = vadd.f32 %v4105_v28, %v4093_v21  ;;  %v8466_v21 = vld [vmem:[#allocation9 + $0x10d0] sm:$0xf0]  ;;  %v8256_v5 = vld [vmem:[#allocation9 + $0x1a0] sm:$0xf]  ;;  %v9111_v7 = vld [vmem:[#allocation9 + $0x22c] sm:$0xf0] }
 0x395   : > { %5127 = vmatpush.bf16.msra.mxu1 %v8217_v40  ;;  %5153 = vmatpush.bf16.msra.mxu3 %v8221_v41  ;;  %v4081_v36 = vpop.f32.mrf.mxu1  ;;  %v4094_v38 = vpop.f32.mrf.mxu2  ;;  %v9042_v40 = vld [vmem:[#allocation9 + $0x7c] sm:$0xf]  ;;  %v7994_v41 = vld [vmem:[#allocation9 + $0x108] sm:$0xf0]  ;;  %v8469_v28 = vor.u32 %v9161_v20, %v8466_v21  ;;  %v8257_v20 = vor.u32 %v9111_v7, %v8256_v5  ;;  %v8360_v30 = vld [vmem:[#allocation9 + $0x868] sm:$0xf] }
 0x396   : > { %4162 = vst [vmem:[%s9621_s28 + $0xa8] sm:$0xff] %v4106_v31  ;;  %v7997_v52 = vor.u32 %v9042_v40, %v7994_v41  ;;  %v3731_v36 = vperm.slane %v9704_v37, 2  ;;  %v8305_v38 = vor.u32 %v9123_v26, %v8304_v24  ;;  %v8288_v40 = vld [vmem:[#allocation9 + $0x3e0] sm:$0xf]  ;;  %v9119_v41 = vld [vmem:[#allocation9 + $0x46c] sm:$0xf0] }
 0x397   : > { %5116 = vmatpush.bf16.msra.mxu0 %v8057_v6  ;;  %5142 = vmatpush.bf16.msra.mxu2 %v8061_v49  ;;  %v9078_v6 = vld [vmem:[#allocation9 + $0xa9c] sm:$0xf]  ;;  %v8138_v49 = vld [vmem:[#allocation9 + $0xb28] sm:$0xf0]  ;;  %v9107_v24 = vld [vmem:[#allocation9 + $0x10c] sm:$0xf0] }
 0x398   : > { %v8141_v59 = vor.u32 %v9078_v6, %v8138_v49  ;;  %v8289_v49 = vor.u32 %v9119_v41, %v8288_v40  ;;  %v9105_v26 = vld [vmem:[#allocation9 + $0x84] sm:$0xf]  ;;  %v9162_v5 = vld [vmem:[#allocation9 + $0x104c] sm:$0xf]  ;;  %v8474_v7 = vld [vmem:[#allocation9 + $0x10d8] sm:$0xf0] }
 0x399   : > { %5128 = vmatpush.bf16.msra.mxu1 %v8201_v53  ;;  %5154 = vmatpush.bf16.msra.mxu3 %v8205_v54  ;;  %v8353_v53 = vor.u32 %v9135_v45, %v8352_v44  ;;  %v8357_v54 = vor.u32 %v9133_v8, %v8354_v46  ;;  %v9117_v44 = vld [vmem:[#allocation9 + $0x3e4] sm:$0xf]  ;;  %v8290_v45 = vld [vmem:[#allocation9 + $0x470] sm:$0xf0]  ;;  %v8432_v8 = vld [vmem:[#allocation9 + $0xe00] sm:$0xf] }
 0x39a   : > { %v9155_v46 = vld [vmem:[#allocation9 + $0xe8c] sm:$0xf0] }
 0x39b   : > { %5117 = vmatpush.bf16.msra.mxu0 %v8041_v63  ;;  %5143 = vmatpush.bf16.msra.mxu2 %v8045_v0  ;;  %v4107_v60 = vpop.f32.mrf.mxu3  ;;  %v8120_v63 = vld [vmem:[#allocation9 + $0x978] sm:$0xf]  ;;  %v9076_v0 = vld [vmem:[#allocation9 + $0xa04] sm:$0xf0] }
 0x39c   : > { %v8121_v11 = vor.u32 %v9076_v0, %v8120_v63  ;;  %v9113_v60 = vld [vmem:[#allocation9 + $0x2c4] sm:$0xf]  ;;  %v8416_v63 = vld [vmem:[#allocation9 + $0xce0] sm:$0xf] }
 0x39d   : > { %5129 = vmatpush.bf16.msra.mxu1 %v8185_v9  ;;  %5155 = vmatpush.bf16.msra.mxu3 %v8189_v10  ;;  %v8337_v9 = vor.u32 %v9131_v25, %v8336_v55  ;;  %v8341_v10 = vor.u32 %v9129_v56, %v8338_v61  ;;  %v8272_v55 = vld [vmem:[#allocation9 + $0x2c0] sm:$0xf]  ;;  %v9115_v25 = vld [vmem:[#allocation9 + $0x34c] sm:$0xf0]  ;;  %v8274_v61 = vld [vmem:[#allocation9 + $0x350] sm:$0xf0] }
 0x39e   : > { %v8277_v4 = vor.u32 %v9113_v60, %v8274_v61  ;;  %v8328_v61 = vld [vmem:[#allocation9 + $0x628] sm:$0xf] }
 0x39f   : > { %5118 = vmatpush.bf16.msra.mxu0 %v8025_v18  ;;  %5144 = vmatpush.bf16.msra.mxu2 %v8029_v19  ;;  %v8322_v18 = vld [vmem:[#allocation9 + $0x6b0] sm:$0xf0]  ;;  %v8464_v19 = vld [vmem:[#allocation9 + $0x1040] sm:$0xf] }
 0x3a0   : > { %v8465_v27 = vor.u32 %v9163_v50, %v8464_v19  ;;  %v8240_v50 = vld [vmem:[#allocation9 + $0x80] sm:$0xf] }
 0x3a1   : > { %5130 = vmatpush.bf16.msra.mxu1 %v8169_v22  ;;  %5156 = vmatpush.bf16.msra.mxu3 %v8173_v23  ;;  %v8321_v22 = vor.u32 %v9127_v14, %v8320_v13  ;;  %v8325_v23 = vor.u32 %v9125_v17, %v8322_v18  ;;  %v8258_v13 = vld [vmem:[#allocation9 + $0x230] sm:$0xf0]  ;;  %v8400_v14 = vld [vmem:[#allocation9 + $0xbc0] sm:$0xf]  ;;  %v9145_v17 = vld [vmem:[#allocation9 + $0xbc4] sm:$0xf] }
 0x3a2   : > { %v8402_v18 = vld [vmem:[#allocation9 + $0xc50] sm:$0xf0] }
 0x3a3   : > { %5119 = vmatpush.bf16.msra.mxu0 %v8009_v33  ;;  %5145 = vmatpush.bf16.msra.mxu2 %v8013_v34  ;;  %v9157_v33 = vld [vmem:[#allocation9 + $0xf24] sm:$0xf]  ;;  %v8450_v34 = vld [vmem:[#allocation9 + $0xfb0] sm:$0xf0]  ;;  %v8405_v29 = vor.u32 %v9145_v17, %v8402_v18  ;;  %v8314_v17 = vld [vmem:[#allocation9 + $0x598] sm:$0xf0] }
 0x3a4   : > { %v8456_v18 = vld [vmem:[#allocation9 + $0xf28] sm:$0xf] }
 0x3a5   : > { %5131 = vmatpush.bf16.msra.mxu1 %v8153_v42  ;;  %5157 = vmatpush.bf16.msra.mxu3 %v8157_v43  ;;  %v8449_v42 = vor.u32 %v9159_v32, %v8448_v62  ;;  %v8453_v43 = vor.u32 %v9157_v33, %v8450_v34  ;;  %v9136_v62 = vld [vmem:[#allocation9 + $0x8f4] sm:$0xf0]  ;;  %v8362_v32 = vld [vmem:[#allocation9 + $0x8f8] sm:$0xf0]  ;;  %v8384_v33 = vld [vmem:[#allocation9 + $0xaa0] sm:$0xf] }
 0x3a6   : > { %v9143_v34 = vld [vmem:[#allocation9 + $0xb2c] sm:$0xf0]  ;;  %v8361_v41 = vor.u32 %v9136_v62, %v8360_v30  ;;  %v9118_v30 = vld [vmem:[#allocation9 + $0x3ec] sm:$0xf]  ;;  %v8298_v62 = vld [vmem:[#allocation9 + $0x478] sm:$0xf0] }
 0x3a7   : > { %5120 = vmatpush.bf16.msra.mxu0 %v7993_v51  ;;  %5146 = vmatpush.bf16.msra.mxu2 %v7997_v52  ;;  %v4118_v31 = vpop.f32.mrf.mxu0  ;;  %v8293_v51 = vor.u32 %v9117_v44, %v8290_v45  ;;  %v9132_v44 = vld [vmem:[#allocation9 + $0x7d4] sm:$0xf0]  ;;  %v9130_v45 = vld [vmem:[#allocation9 + $0x74c] sm:$0xf] }
 0x3a8   : > { %v4119_v6 = vadd.f32 %v4118_v31, %v3731_v36  ;;  %v9134_v31 = vld [vmem:[#allocation9 + $0x86c] sm:$0xf]  ;;  %v9141_v36 = vld [vmem:[#allocation9 + $0xaa4] sm:$0xf] }
 0x3a9   : > { %5132 = vmatpush.bf16.msra.mxu1 %v8137_v58  ;;  %5158 = vmatpush.bf16.msra.mxu3 %v8141_v59  ;;  %v8433_v58 = vor.u32 %v9155_v46, %v8432_v8  ;;  %v8437_v59 = vor.u32 %v9153_v47, %v8434_v48  ;;  %v8385_v8 = vor.u32 %v9143_v34, %v8384_v33  ;;  %v8346_v48 = vld [vmem:[#allocation9 + $0x7d8] sm:$0xf0]  ;;  %v9154_v33 = vld [vmem:[#allocation9 + $0xe0c] sm:$0xf] }
 0x3aa   : > { %5121 = vmatmul.bf16.vlgmr.msra.gmra.mxu0 %v9586_v35  ;;  %5147 = vmatmul.bf16.vlgmr.msra.gmra.mxu2 %v9586_v35  ;;  %v8442_v34 = vld [vmem:[#allocation9 + $0xe98] sm:$0xf0] }
 0x3ab   : > { %5563 = vmatpush.bf16.msrb.mxu0 %v8353_v53  ;;  %5589 = vmatpush.bf16.msrb.mxu2 %v8357_v54  ;;  %v3732_v53 = vperm.slane %v9704_v37, 3  ;;  %v8273_v37 = vor.u32 %v9115_v25, %v8272_v55  ;;  %v9166_v55 = vld [vmem:[#allocation9 + $0x116c] sm:$0xf]  ;;  %v8490_v25 = vld [vmem:[#allocation9 + $0x11f8] sm:$0xf0] }
 0x3ad   : > { %5133 = vmatpush.bf16.msra.mxu1 %v8121_v11  ;;  %5159 = vmatpush.bf16.msra.mxu3 %v8125_v12  ;;  %v4131_v52 = vpop.f32.mrf.mxu1  ;;  %v4144_v54 = vpop.f32.mrf.mxu2  ;;  %v8421_v11 = vor.u32 %v9149_v2, %v8418_v3  ;;  %v9109_v12 = vld [vmem:[#allocation9 + $0x1a4] sm:$0xf]  ;;  %v9126_v2 = vld [vmem:[#allocation9 + $0x62c] sm:$0xf]  ;;  %v8330_v3 = vld [vmem:[#allocation9 + $0x6b8] sm:$0xf0] }
 0x3ae   : > { %v4132_v56 = vadd.f32 %v4131_v52, %v4119_v6  ;;  %v8261_v21 = vor.u32 %v9109_v12, %v8258_v13  ;;  %v8368_v6 = vld [vmem:[#allocation9 + $0x980] sm:$0xf]  ;;  %v8370_v52 = vld [vmem:[#allocation9 + $0xa10] sm:$0xf0]  ;;  %v8312_v12 = vld [vmem:[#allocation9 + $0x508] sm:$0xf] }
 0x3af   : > { %5564 = vmatpush.bf16.msrb.mxu0 %v8337_v9  ;;  %5590 = vmatpush.bf16.msrb.mxu2 %v8341_v10  ;;  %v4120_v0 = vpop.f32.mrf.mxu0  ;;  %v4145_v9 = vadd.f32 %v4144_v54, %v3732_v53  ;;  %v8417_v10 = vor.u32 %v9151_v1, %v8416_v63  ;;  %v8488_v53 = vld [vmem:[#allocation9 + $0x1168] sm:$0xf]  ;;  %v9168_v54 = vld [vmem:[#allocation9 + $0x11f4] sm:$0xf0]  ;;  %v8493_v1 = vor.u32 %v9166_v55, %v8490_v25 }
 0x3b0   : > { %5134 = vmatmul.bf16.vlgmr.msra.gmra.mxu1 %v9590_v57  ;;  %5160 = vmatmul.bf16.vlgmr.msra.gmra.mxu3 %v9590_v57  ;;  %4163 = vst [vmem:[%s9621_s28 + $0xb0] sm:$0xff] %v4132_v56  ;;  %v9128_v63 = vld [vmem:[#allocation9 + $0x6b4] sm:$0xf0]  ;;  %v8489_v0 = vor.u32 %v9168_v54, %v8488_v53  ;;  %v8426_v53 = vld [vmem:[#allocation9 + $0xd78] sm:$0xf0] }
 0x3b1   : > { %5576 = vmatpush.bf16.msrb.mxu1 %v8481_v15  ;;  %5602 = vmatpush.bf16.msrb.mxu3 %v8485_v16  ;;  %v9147_v16 = vld [vmem:[#allocation9 + $0xc4c] sm:$0xf0]  ;;  %v9124_v13 = vld [vmem:[#allocation9 + $0x594] sm:$0xf0]  ;;  %v8264_v25 = vld [vmem:[#allocation9 + $0x1a8] sm:$0xf] }
 0x3b3   : > { %5565 = vmatpush.bf16.msrb.mxu0 %v8321_v22  ;;  %5591 = vmatpush.bf16.msrb.mxu2 %v8325_v23  ;;  %v4157_v15 = vpop.f32.mrf.mxu3 }
 0x3b4   : > { %v4158_v19 = vadd.f32 %v4157_v15, %v4145_v9  ;;  %v8329_v9 = vor.u32 %v9128_v63, %v8328_v61  ;;  %v8477_v15 = vor.u32 %v9162_v5, %v8474_v7  ;;  %v9110_v61 = vld [vmem:[#allocation9 + $0x1ac] sm:$0xf]  ;;  %v8266_v63 = vld [vmem:[#allocation9 + $0x238] sm:$0xf0] }
 0x3b5   : > { %5577 = vmatpush.bf16.msrb.mxu1 %v8465_v27  ;;  %5603 = vmatpush.bf16.msrb.mxu3 %v8469_v28  ;;  %v4133_v22 = vpop.f32.mrf.mxu1  ;;  %v4146_v23 = vpop.f32.mrf.mxu2  ;;  %v8242_v27 = vld [vmem:[#allocation9 + $0x110] sm:$0xf0]  ;;  %v8401_v28 = vor.u32 %v9147_v16, %v8400_v14  ;;  %v9122_v16 = vld [vmem:[#allocation9 + $0x50c] sm:$0xf]  ;;  %v8269_v7 = vor.u32 %v9110_v61, %v8266_v63 }
 0x3b6   : > { %4164 = vst [vmem:[%s9621_s28 + $0xb8] sm:$0xff] %v4158_v19  ;;  %v8245_v40 = vor.u32 %v9105_v26, %v8242_v27  ;;  %v8313_v23 = vor.u32 %v9124_v13, %v8312_v12  ;;  %v8296_v26 = vld [vmem:[#allocation9 + $0x3e8] sm:$0xf]  ;;  %v9120_v27 = vld [vmem:[#allocation9 + $0x474] sm:$0xf0] }
 0x3b7   : > { %5566 = vmatpush.bf16.msrb.mxu0 %v8305_v38  ;;  %5592 = vmatpush.bf16.msrb.mxu2 %v8309_v39  ;;  %v8386_v38 = vld [vmem:[#allocation9 + $0xb30] sm:$0xf0]  ;;  %v8241_v39 = vor.u32 %v9107_v24, %v8240_v50  ;;  %v9160_v50 = vld [vmem:[#allocation9 + $0xfb4] sm:$0xf0]  ;;  %v8317_v24 = vor.u32 %v9122_v16, %v8314_v17  ;;  %v8248_v12 = vld [vmem:[#allocation9 + $0x88] sm:$0xf] }
 0x3b8   : > { %v8389_v46 = vor.u32 %v9141_v36, %v8386_v38  ;;  %v8297_v38 = vor.u32 %v9120_v27, %v8296_v26  ;;  %v9108_v13 = vld [vmem:[#allocation9 + $0x114] sm:$0xf0]  ;;  %v8250_v17 = vld [vmem:[#allocation9 + $0x118] sm:$0xf0]  ;;  %v8376_v26 = vld [vmem:[#allocation9 + $0x988] sm:$0xf] }
 0x3b9   : > { %5578 = vmatpush.bf16.msrb.mxu1 %v8449_v42  ;;  %5604 = vmatpush.bf16.msrb.mxu3 %v8453_v43  ;;  %v8365_v42 = vor.u32 %v9134_v31, %v8362_v32  ;;  %v8344_v43 = vld [vmem:[#allocation9 + $0x748] sm:$0xf]  ;;  %v9156_v32 = vld [vmem:[#allocation9 + $0xe94] sm:$0xf0] }
 0x3ba   : > { %v8345_v56 = vor.u32 %v9132_v44, %v8344_v43  ;;  %v8440_v31 = vld [vmem:[#allocation9 + $0xe08] sm:$0xf]  ;;  %v9116_v44 = vld [vmem:[#allocation9 + $0x354] sm:$0xf0] }
 0x3bb   : > { %5567 = vmatpush.bf16.msrb.mxu0 %v8289_v49  ;;  %5593 = vmatpush.bf16.msrb.mxu2 %v8293_v51  ;;  %v4159_v47 = vpop.f32.mrf.mxu3  ;;  %v9139_v49 = vld [vmem:[#allocation9 + $0xa0c] sm:$0xf0]  ;;  %v9137_v51 = vld [vmem:[#allocation9 + $0x984] sm:$0xf]  ;;  %v8280_v43 = vld [vmem:[#allocation9 + $0x2c8] sm:$0xf] }
 0x3bc   : > { %v8373_v60 = vor.u32 %v9137_v51, %v8370_v52  ;;  %v9114_v47 = vld [vmem:[#allocation9 + $0x2cc] sm:$0xf]  ;;  %v9152_v51 = vld [vmem:[#allocation9 + $0xd74] sm:$0xf0]  ;;  %v8281_v54 = vor.u32 %v9116_v44, %v8280_v43 }
 0x3bd   : > { %5579 = vmatpush.bf16.msrb.mxu1 %v8433_v58  ;;  %5605 = vmatpush.bf16.msrb.mxu3 %v8437_v59  ;;  %v8349_v58 = vor.u32 %v9130_v45, %v8346_v48  ;;  %v8369_v59 = vor.u32 %v9139_v49, %v8368_v6  ;;  %v8282_v48 = vld [vmem:[#allocation9 + $0x358] sm:$0xf0]  ;;  %v8424_v6 = vld [vmem:[#allocation9 + $0xce8] sm:$0xf]  ;;  %v9150_v52 = vld [vmem:[#allocation9 + $0xcec] sm:$0xf] }
 0x3be   : > { %v8285_v55 = vor.u32 %v9114_v47, %v8282_v48 }
 0x3bf   : > { %5568 = vmatpush.bf16.msrb.mxu0 %v8273_v37  ;;  %5594 = vmatpush.bf16.msrb.mxu2 %v8277_v4  ;;  %v8472_v37 = vld [vmem:[#allocation9 + $0x1048] sm:$0xf]  ;;  %v9164_v4 = vld [vmem:[#allocation9 + $0x10d4] sm:$0xf0] }
 0x3c0   : > { %v8473_v14 = vor.u32 %v9164_v4, %v8472_v37  ;;  %v8410_v37 = vld [vmem:[#allocation9 + $0xc58] sm:$0xf0] }
 0x3c1   : > { %5580 = vmatpush.bf16.msrb.mxu1 %v8417_v10  ;;  %5606 = vmatpush.bf16.msrb.mxu3 %v8421_v11  ;;  %v8333_v10 = vor.u32 %v9126_v2, %v8330_v3  ;;  %v9722_v11 = vld [vmem:[#allocation10 + $0x18] sm:$0xf]  ;;  %v9146_v3 = vld [vmem:[#allocation9 + $0xbcc] sm:$0xf] }
 0x3c2   : > { %v4231_v22 = vperm.slane %v9722_v11, 0  ;;  %v9148_v2 = vld [vmem:[#allocation9 + $0xc54] sm:$0xf0]  ;;  %v8413_v16 = vor.u32 %v9146_v3, %v8410_v37 }
 0x3c3   : > { %5569 = vmatpush.bf16.msrb.mxu0 %v8257_v20  ;;  %5595 = vmatpush.bf16.msrb.mxu2 %v8261_v21  ;;  %v9158_v20 = vld [vmem:[#allocation9 + $0xf2c] sm:$0xf]  ;;  %v8458_v21 = vld [vmem:[#allocation9 + $0xfb8] sm:$0xf0] }
 0x3c5   : > { %5581 = vmatpush.bf16.msrb.mxu1 %v8401_v28  ;;  %5607 = vmatpush.bf16.msrb.mxu3 %v8405_v29  ;;  %v8457_v28 = vor.u32 %v9160_v50, %v8456_v18  ;;  %v8461_v29 = vor.u32 %v9158_v20, %v8458_v21  ;;  %v8392_v18 = vld [vmem:[#allocation9 + $0xaa8] sm:$0xf]  ;;  %v9142_v50 = vld [vmem:[#allocation9 + $0xaac] sm:$0xf]  ;;  %v8394_v20 = vld [vmem:[#allocation9 + $0xb38] sm:$0xf0]  ;;  %v8249_v21 = vor.u32 %v9108_v13, %v8248_v12 }
 0x3c6   : > { %v5233_v12 = vld [vmem:[#allocation10 + $0x20] sm:$0xf] }
 0x3c7   : > { %5570 = vmatpush.bf16.msrb.mxu0 %v8241_v39  ;;  %5596 = vmatpush.bf16.msrb.mxu2 %v8245_v40  ;;  %v4568_v19 = vpop.f32.mrf.mxu0  ;;  %v8301_v39 = vor.u32 %v9118_v30, %v8298_v62  ;;  %v8378_v30 = vld [vmem:[#allocation9 + $0xa18] sm:$0xf0] }
 0x3c8   : > { %v4569_v36 = vadd.f32 %v4568_v19, %v4231_v22  ;;  %v9144_v19 = vld [vmem:[#allocation9 + $0xb34] sm:$0xf0] }
 0x3c9   : > { %5582 = vmatpush.bf16.msrb.mxu1 %v8385_v8  ;;  %5608 = vmatpush.bf16.msrb.mxu3 %v8389_v46  ;;  %v8441_v8 = vor.u32 %v9156_v32, %v8440_v31  ;;  %v8445_v46 = vor.u32 %v9154_v33, %v8442_v34  ;;  %v4233_v33 = vperm.slane %v9722_v11, 2 }
 0x3ca   : > { %5571 = vmatmul.bf16.vlgmr.msrb.gmra.mxu0 %v9586_v35  ;;  %5597 = vmatmul.bf16.vlgmr.msrb.gmra.mxu2 %v9586_v35 }
 0x3cb   : > { %5615 = vmatpush.bf16.msra.mxu0 %v8361_v41  ;;  %5641 = vmatpush.bf16.msra.mxu2 %v8365_v42  ;;  %v4232_v41 = vperm.slane %v9722_v11, 1 }
 0x3cd   : > { %5583 = vmatpush.bf16.msrb.mxu1 %v8369_v59  ;;  %5609 = vmatpush.bf16.msrb.mxu3 %v8373_v60  ;;  %v4581_v40 = vpop.f32.mrf.mxu1  ;;  %v4594_v42 = vpop.f32.mrf.mxu2  ;;  %v8425_v59 = vor.u32 %v9152_v51, %v8424_v6  ;;  %v8429_v60 = vor.u32 %v9150_v52, %v8426_v53 }
 0x3ce   : > { %v4582_v45 = vadd.f32 %v4581_v40, %v4569_v36  ;;  %v4234_v40 = vperm.slane %v9722_v11, 3 }
 0x3cf   : > { %5616 = vmatpush.bf16.msra.mxu0 %v8345_v56  ;;  %5642 = vmatpush.bf16.msra.mxu2 %v8349_v58  ;;  %v4570_v49 = vpop.f32.mrf.mxu0  ;;  %v9112_v56 = vld [vmem:[#allocation9 + $0x234] sm:$0xf0]  ;;  %v4595_v58 = vadd.f32 %v4594_v42, %v4232_v41 }
 0x3d0   : > { %5584 = vmatmul.bf16.vlgmr.msrb.gmra.mxu1 %v9590_v57  ;;  %5610 = vmatmul.bf16.vlgmr.msrb.gmra.mxu3 %v9590_v57  ;;  %4663 = vst [vmem:[%s9621_s28 + $0xc0] sm:$0xff] %v4582_v45  ;;  %v8265_v5 = vor.u32 %v9112_v56, %v8264_v25 }
 0x3d1   : > { %5628 = vmatpush.bf16.msra.mxu1 %v8489_v0  ;;  %5654 = vmatpush.bf16.msra.mxu3 %v8493_v1  ;;  %v8408_v0 = vld [vmem:[#allocation9 + $0xbc8] sm:$0xf] }
 0x3d3   : > { %5617 = vmatpush.bf16.msra.mxu0 %v8329_v9  ;;  %5643 = vmatpush.bf16.msra.mxu2 %v8333_v10  ;;  %v4607_v1 = vpop.f32.mrf.mxu3 }
 0x3d4   : > { %v4608_v4 = vadd.f32 %v4607_v1, %v4595_v58 }
 0x3d5   : > { %5629 = vmatpush.bf16.msra.mxu1 %v8473_v14  ;;  %5655 = vmatpush.bf16.msra.mxu3 %v8477_v15  ;;  %v4583_v9 = vpop.f32.mrf.mxu1  ;;  %v4596_v10 = vpop.f32.mrf.mxu2  ;;  %v9106_v14 = vld [vmem:[#allocation9 + $0x8c] sm:$0xf]  ;;  %v8409_v15 = vor.u32 %v9148_v2, %v8408_v0 }
 0x3d6   : > { %4664 = vst [vmem:[%s9621_s28 + $0xc8] sm:$0xff] %v4608_v4  ;;  %v8253_v22 = vor.u32 %v9106_v14, %v8250_v17  ;;  %v5235_v14 = vperm.slane %v5233_v12, 0 }
 0x3d7   : > { %5618 = vmatpush.bf16.msra.mxu0 %v8313_v23  ;;  %5644 = vmatpush.bf16.msra.mxu2 %v8317_v24  ;;  %v8393_v23 = vor.u32 %v9144_v19, %v8392_v18  ;;  %v8397_v24 = vor.u32 %v9142_v50, %v8394_v20  ;;  %v5236_v19 = vperm.slane %v5233_v12, 1 }
 0x3d9   : > { %5630 = vmatpush.bf16.msra.mxu1 %v8457_v28  ;;  %5656 = vmatpush.bf16.msra.mxu3 %v8461_v29  ;;  %v9140_v28 = vld [vmem:[#allocation9 + $0xa14] sm:$0xf0]  ;;  %v9138_v29 = vld [vmem:[#allocation9 + $0x98c] sm:$0xf] }
 0x3da   : > { %v8377_v62 = vor.u32 %v9140_v28, %v8376_v26  ;;  %v8381_v31 = vor.u32 %v9138_v29, %v8378_v30 }
 0x3db   : > { %5619 = vmatpush.bf16.msra.mxu0 %v8297_v38  ;;  %5645 = vmatpush.bf16.msra.mxu2 %v8301_v39  ;;  %v4609_v27 = vpop.f32.mrf.mxu3 }
 0x3dc   : > { %v5237_v27 = vperm.slane %v5233_v12, 2 }
 0x3dd   : > { %5631 = vmatpush.bf16.msra.mxu1 %v8441_v8  ;;  %5657 = vmatpush.bf16.msra.mxu3 %v8445_v46 }
 0x3df   : > { %5620 = vmatpush.bf16.msra.mxu0 %v8281_v54  ;;  %5646 = vmatpush.bf16.msra.mxu2 %v8285_v55 }
 0x3e1   : > { %5632 = vmatpush.bf16.msra.mxu1 %v8425_v59  ;;  %5658 = vmatpush.bf16.msra.mxu3 %v8429_v60 }
 0x3e3   : > { %5621 = vmatpush.bf16.msra.mxu0 %v8265_v5  ;;  %5647 = vmatpush.bf16.msra.mxu2 %v8269_v7 }
 0x3e5   : > { %5633 = vmatpush.bf16.msra.mxu1 %v8409_v15  ;;  %5659 = vmatpush.bf16.msra.mxu3 %v8413_v16 }
 0x3e7   : > { %5622 = vmatpush.bf16.msra.mxu0 %v8249_v21  ;;  %5648 = vmatpush.bf16.msra.mxu2 %v8253_v22  ;;  %v4620_v32 = vpop.f32.mrf.mxu0 }
 0x3e8   : > { %v4621_v34 = vadd.f32 %v4620_v32, %v4233_v33 }
 0x3e9   : > { %5634 = vmatpush.bf16.msra.mxu1 %v8393_v23  ;;  %5660 = vmatpush.bf16.msra.mxu3 %v8397_v24 }
 0x3ea   : > { %5623 = vmatmul.bf16.vlgmr.msra.gmra.mxu0 %v9586_v35  ;;  %5649 = vmatmul.bf16.vlgmr.msra.gmra.mxu2 %v9586_v35 }
 0x3ed   : > { %5635 = vmatpush.bf16.msra.mxu1 %v8377_v62  ;;  %5661 = vmatpush.bf16.msra.mxu3 %v8381_v31  ;;  %v4633_v36 = vpop.f32.mrf.mxu1  ;;  %v4646_v38 = vpop.f32.mrf.mxu2  ;;  %v5238_v31 = vperm.slane %v5233_v12, 3 }
 0x3ee   : > { %v4634_v39 = vadd.f32 %v4633_v36, %v4621_v34  ;;  %v4647_v42 = vadd.f32 %v4646_v38, %v4234_v40 }
 0x3ef   : > { %v4622_v41 = vpop.f32.mrf.mxu0 }
 0x3f0   : > { %5636 = vmatmul.bf16.vlgmr.msra.gmra.mxu1 %v9590_v57  ;;  %5662 = vmatmul.bf16.vlgmr.msra.gmra.mxu3 %v9590_v57  ;;  %4665 = vst [vmem:[%s9621_s28 + $0xd0] sm:$0xff] %v4634_v39  ;;  %v4731_v57 = vld [vmem:[#allocation10 + $0x1c] sm:$0xf] }
 0x3f1   : > { %v4733_v47 = vperm.slane %v4731_v57, 0  ;;  %v4734_v52 = vperm.slane %v4731_v57, 1  ;;  %v4735_v60 = vperm.slane %v4731_v57, 2  ;;  %v4736_v2 = vperm.slane %v4731_v57, 3 }
 0x3f3   : > { %v4659_v35 = vpop.f32.mrf.mxu3 }
 0x3f4   : > { %v4660_v43 = vadd.f32 %v4659_v35, %v4647_v42 }
 0x3f5   : > { %v4635_v44 = vpop.f32.mrf.mxu1  ;;  %v4648_v45 = vpop.f32.mrf.mxu2 }
 0x3f6   : > { %4666 = vst [vmem:[%s9621_s28 + $0xd8] sm:$0xff] %v4660_v43 }
 0x3fb   : > { %v4661_v8 = vpop.f32.mrf.mxu3 }
 0x407   : > { %v5070_v46 = vpop.f32.mrf.mxu0 }
 0x408   : > { %v5071_v48 = vadd.f32 %v5070_v46, %v4733_v47 }
 0x40d   : > { %v5083_v6 = vpop.f32.mrf.mxu1  ;;  %v5096_v49 = vpop.f32.mrf.mxu2 }
 0x40e   : > { %v5084_v51 = vadd.f32 %v5083_v6, %v5071_v48  ;;  %v5097_v53 = vadd.f32 %v5096_v49, %v4734_v52 }
 0x40f   : > { %v5072_v11 = vpop.f32.mrf.mxu0 }
 0x410   : > { %5165 = vst [vmem:[%s9621_s28 + $0xe0] sm:$0xff] %v5084_v51 }
 0x413   : > { %v5109_v54 = vpop.f32.mrf.mxu3 }
 0x414   : > { %v5110_v55 = vadd.f32 %v5109_v54, %v5097_v53 }
 0x415   : > { %v5085_v25 = vpop.f32.mrf.mxu1  ;;  %v5098_v56 = vpop.f32.mrf.mxu2 }
 0x416   : > { %5166 = vst [vmem:[%s9621_s28 + $0xe8] sm:$0xff] %v5110_v55 }
 0x41b   : > { %v5111_v58 = vpop.f32.mrf.mxu3 }
 0x427   : > { %v5122_v59 = vpop.f32.mrf.mxu0 }
 0x428   : > { %v5123_v61 = vadd.f32 %v5122_v59, %v4735_v60 }
 0x42d   : > { %v5135_v63 = vpop.f32.mrf.mxu1  ;;  %v5148_v0 = vpop.f32.mrf.mxu2 }
 0x42e   : > { %v5136_v1 = vadd.f32 %v5135_v63, %v5123_v61  ;;  %v5149_v37 = vadd.f32 %v5148_v0, %v4736_v2 }
 0x42f   : > { %v5124_v3 = vpop.f32.mrf.mxu0 }
 0x430   : > { %5167 = vst [vmem:[%s9621_s28 + $0xf0] sm:$0xff] %v5136_v1 }
 0x433   : > { %v5161_v4 = vpop.f32.mrf.mxu3 }
 0x434   : > { %v5162_v5 = vadd.f32 %v5161_v4, %v5149_v37 }
 0x435   : > { %v5137_v7 = vpop.f32.mrf.mxu1  ;;  %v5150_v9 = vpop.f32.mrf.mxu2 }
 0x436   : > { %5168 = vst [vmem:[%s9621_s28 + $0xf8] sm:$0xff] %v5162_v5 }
 0x43b   : > { %v5163_v10 = vpop.f32.mrf.mxu3 }
 0x447   : > { %v5572_v13 = vpop.f32.mrf.mxu0 }
 0x448   : > { %v5573_v15 = vadd.f32 %v5572_v13, %v5235_v14 }
 0x44d   : > { %v5585_v16 = vpop.f32.mrf.mxu1  ;;  %v5598_v17 = vpop.f32.mrf.mxu2 }
 0x44e   : > { %v5586_v18 = vadd.f32 %v5585_v16, %v5573_v15  ;;  %v5599_v20 = vadd.f32 %v5598_v17, %v5236_v19 }
 0x44f   : > { %v5574_v50 = vpop.f32.mrf.mxu0 }
 0x450   : > { %5667 = vst [vmem:[%s9621_s28 + $0x100] sm:$0xff] %v5586_v18 }
 0x453   : > { %v5611_v21 = vpop.f32.mrf.mxu3 }
 0x454   : > { %v5612_v22 = vadd.f32 %v5611_v21, %v5599_v20 }
 0x455   : > { %v5587_v23 = vpop.f32.mrf.mxu1  ;;  %v5600_v24 = vpop.f32.mrf.mxu2 }
 0x456   : > { %5668 = vst [vmem:[%s9621_s28 + $0x108] sm:$0xff] %v5612_v22 }
 0x45b   : > { %v5613_v26 = vpop.f32.mrf.mxu3 }
 0x467   : > { %v5624_v28 = vpop.f32.mrf.mxu0 }
 0x468   : > { %v5625_v29 = vadd.f32 %v5624_v28, %v5237_v27 }
 0x46d   : > { %v5637_v30 = vpop.f32.mrf.mxu1  ;;  %v5650_v32 = vpop.f32.mrf.mxu2 }
 0x46e   : > { %v5638_v62 = vadd.f32 %v5637_v30, %v5625_v29  ;;  %v5651_v34 = vadd.f32 %v5650_v32, %v5238_v31 }
 0x46f   : > { %v5626_v33 = vpop.f32.mrf.mxu0 }
 0x470   : > { %5669 = vst [vmem:[%s9621_s28 + $0x110] sm:$0xff] %v5638_v62 }
 0x473   : > { %v5663_v36 = vpop.f32.mrf.mxu3 }
 0x474   : > { %v5664_v38 = vadd.f32 %v5663_v36, %v5651_v34 }
 0x475   : > { %v5639_v39 = vpop.f32.mrf.mxu1  ;;  %v5652_v40 = vpop.f32.mrf.mxu2 }
 0x476   : > { %5670 = vst [vmem:[%s9621_s28 + $0x118] sm:$0xff] %v5664_v38 }
 0x47b   : > { %v5665_v41 = vpop.f32.mrf.mxu3 }
 0x47c PF: > { %s21_s24 = sadd.s32 1, %s9447_s24  }
 0x47d   : > { %p18_p7 = scmp.ge.s32.totalorder %s21_s24, 4  }
 0x47f   :  { %20 = sbr.rel (!%p18_p7) target bundleno = 4 (0x4), region = 105 }
 0x484   :  { %5692 = vsyncpa [#allocation3], 1 }
 0x485   :  { %5694 = vsyncpa [#allocation3 + $0x1], 1 }
 0x486   :  { %5695 = vsyncpa [#allocation5], 1 }
 0x487   :  { %5696 = vsyncpa [#allocation8], 1 }
 0x488   :  { %5697 = vsyncpa [#allocation11], 1 }

</bundles_post_ra>
